<compile_context>
chip_gen: v7x
topology: tpu7x:2x2x1
jax: 0.10.0
libtpu: 0.0.40
codegen_flags: <defaults>
</compile_context>

<pallas_src>
import jax
import jax.numpy as jnp
from jax.experimental import pallas as pl
from jax.experimental.pallas import tpu as pltpu


def _torch_model_kernel(ids_ref, emb_hbm, w_ref, b_ref, out_ref, rows_vmem, copy_sems):
    """One grid step processes a (TB, S) block of token ids -> (TB, S) outputs."""
    i = pl.program_id(0)
    TB, S = out_ref.shape          # batch block, sentence length
    D = w_ref.shape[0]             # embedding dim

    # ---- Embedding gather: DMA the TB*S needed rows of the HBM table into VMEM.
    # All copies are issued first (fully overlapped), then waited on.
    copies = []
    for s in range(S):
        for r in range(TB):
            tok = ids_ref[i * TB + r, s]                     # scalar read from SMEM
            cp = pltpu.make_async_copy(
                emb_hbm.at[pl.ds(tok, 1), :],                # (1, D) row of the table
                rows_vmem.at[pl.ds(s * TB + r, 1), :],       # (1, D) slot in scratch
                copy_sems.at[s * TB + r],
            )
            cp.start()
            copies.append(cp)
    for cp in copies:
        cp.wait()

    # ---- AvgPool1d over the sequence: S VPU adds of (TB, D) tiles,
    # then a single 1/S scale on the (TB, D) result (not on a vocab-sized tile).
    acc = rows_vmem[pl.ds(0, TB), :]
    for s in range(1, S):
        acc = acc + rows_vmem[pl.ds(s * TB, TB), :]
    pooled = acc * (1.0 / S)                                 # (TB, D) f32

    # ---- Linear(D -> S) on the MXU: bf16 operands, f32 accumulation; + sigmoid.
    logits = jnp.dot(
        pooled.astype(jnp.bfloat16),
        w_ref[...].astype(jnp.bfloat16),
        preferred_element_type=jnp.float32,
    ) + b_ref[...]                                           # (TB, S)
    out_ref[...] = jax.nn.sigmoid(logits)


def torch_model_forward(x, emb, w, b, *, block_b=8):
    """sigmoid(mean_s(emb[x]) @ w + b) via a single Pallas kernel, gridded over batch."""
    B, S = x.shape
    V, D = emb.shape
    assert w.shape == (D, S) and b.shape == (S,)

    TB = block_b
    padded_B = ((B + TB - 1) // TB) * TB
    if padded_B != B:
        # Pad with token id 0 (always valid); padded rows are sliced off below.
        x = jnp.concatenate(
            [x, jnp.zeros((padded_B - B, S), dtype=x.dtype)], axis=0)
    nb = padded_B // TB

    grid_spec = pltpu.PrefetchScalarGridSpec(
        num_scalar_prefetch=1,                               # token ids -> SMEM
        grid=(nb,),
        in_specs=[
            pl.BlockSpec(memory_space=pl.ANY),               # emb stays in HBM, DMA-gathered
            pl.BlockSpec((D, S), lambda i, ids: (0, 0)),     # w: resident, fetched once
            pl.BlockSpec((1, S), lambda i, ids: (0, 0)),     # b: resident, fetched once
        ],
        out_specs=pl.BlockSpec((TB, S), lambda i, ids: (i, 0)),
        scratch_shapes=[
            pltpu.VMEM((S * TB, D), jnp.float32),            # gathered embedding rows
            pltpu.SemaphoreType.DMA((S * TB,)),              # one sem per gather DMA
        ],
    )

    flops = 2 * padded_B * D * S + padded_B * S * D          # classifier matmul + pooling adds
    bytes_accessed = (
        padded_B * S * 4                                     # token ids
        + padded_B * S * D * 4                               # gathered embedding rows
        + D * S * 4 + S * 4                                  # classifier weight + bias
        + padded_B * S * 4                                   # output
    )

    out = pl.pallas_call(
        _torch_model_kernel,
        out_shape=jax.ShapeDtypeStruct((padded_B, S), jnp.float32),
        grid_spec=grid_spec,
        compiler_params=pltpu.CompilerParams(
            dimension_semantics=("parallel",),               # shard batch blocks across TCs (v7x)
            vmem_limit_bytes=32 * 1024 * 1024,
        ),
        cost_estimate=pl.CostEstimate(
            flops=flops,
            transcendentals=padded_B * S,                    # sigmoid
            bytes_accessed=bytes_accessed,
        ),
    )(x, emb, w, b.reshape(1, S))
    return out[:B]


def reference_forward(x, emb, w, b):
    # Pure-JAX reference mirroring the PyTorch forward exactly (f32 throughout).
    e = emb[x]                                               # (B, S, D)
    pooled = jnp.mean(e, axis=1)                             # AvgPool1d over seq + squeeze
    logits = pooled @ w + b                                  # Linear(D -> S)
    return jax.nn.sigmoid(logits)


if __name__ == "__main__":
    # Small shapes consistent with the module's forward.
    vector_dim = 32        # D
    sentence_length = 8    # S
    vocab_size = 30        # V
    batch = 16             # B  (-> grid of 2 batch blocks of 8)

    key = jax.random.PRNGKey(0)
    k_x, k_emb, k_w, k_b, k_x2 = jax.random.split(key, 5)

    emb = jax.random.normal(k_emb, (vocab_size, vector_dim), dtype=jnp.float32)
    bound = 1.0 / (vector_dim ** 0.5)
    w = jax.random.uniform(k_w, (vector_dim, sentence_length),
                           minval=-bound, maxval=bound, dtype=jnp.float32)
    b = jax.random.uniform(k_b, (sentence_length,),
                           minval=-bound, maxval=bound, dtype=jnp.float32)
    x = jax.random.randint(k_x, (batch, sentence_length), 0, vocab_size,
                           dtype=jnp.int32)

    y_pred = torch_model_forward(x, emb, w, b)
    jax.block_until_ready(y_pred)
    y_ref = reference_forward(x, emb, w, b)
    assert y_pred.shape == (batch, sentence_length)
    # bf16 MXU operands with f32 accumulation -> relaxed tolerance.
    assert jnp.allclose(y_pred, y_ref, atol=1e-2, rtol=1e-2)

    # Exercise the batch-padding path (B not a multiple of the batch block).
    x2 = jax.random.randint(k_x2, (5, sentence_length), 0, vocab_size,
                            dtype=jnp.int32)
    y2 = torch_model_forward(x2, emb, w, b)
    jax.block_until_ready(y2)
    assert jnp.allclose(y2, reference_forward(x2, emb, w, b), atol=1e-2, rtol=1e-2)

    # TODO(synk): training-mode branch (mse_loss when y is given) is not a
    # kernel hot path; only the inference forward (y=None) is implemented.
    print("KERNEL_OK")
</pallas_src>

<mosaic_0001>
module attributes {stable_mosaic.version = 11 : i64} {
  func.func @_torch_model_kernel(%arg0: i32, %arg1: memref<16x8xi32, #tpu.memory_space<smem>>, %arg2: memref<30x32xf32, #tpu.memory_space<any>>, %arg3: memref<32x8xf32, #tpu.memory_space<vmem>>, %arg4: memref<1x8xf32, #tpu.memory_space<vmem>>, %arg5: memref<8x8xf32, #tpu.memory_space<vmem>>, %arg6: memref<64x32xf32, #tpu.memory_space<vmem>>, %arg7: memref<64x!tpu.dma_semaphore, #tpu.memory_space<semaphore_mem>>) attributes {dimension_semantics = [#tpu.dimension_semantics<parallel>], iteration_bounds = array<i64: 2>, scalar_prefetch = 1 : i64, scratch_operands = 2 : i64, tpu.core_type = #tpu.core_type<tc>, window_params = [{}, {pipeline_mode = #tpu.pipeline_mode<synchronous>, transform_indices = @transform_1, window_bounds = array<i64: 32, 8>}, {pipeline_mode = #tpu.pipeline_mode<synchronous>, transform_indices = @transform_2, window_bounds = array<i64: 1, 8>}, {transform_indices = @transform_3, window_bounds = array<i64: 8, 8>}]} {
    %c8_i32 = arith.constant 8 : i32
    %0 = arith.muli %arg0, %c8_i32 : i32
    %c0_i32 = arith.constant 0 : i32
    %1 = arith.addi %0, %c0_i32 : i32
    %2 = arith.index_cast %1 : i32 to index
    %c0 = arith.constant 0 : index
    %3 = memref.load %arg1[%2, %c0] : memref<16x8xi32, #tpu.memory_space<smem>>
    %c0_i32_0 = arith.constant 0 : i32
    %c0_i32_1 = arith.constant 0 : i32
    %4 = tpu.memref_slice %arg2[%3, %c0_i32_1] : memref<30x32xf32, #tpu.memory_space<any>> -> memref<1x32xf32, #tpu.memory_space<any>>
    %c0_i32_2 = arith.constant 0 : i32
    %c0_i32_3 = arith.constant 0 : i32
    %5 = tpu.memref_slice %arg6[%c0_i32_2, %c0_i32_3] : memref<64x32xf32, #tpu.memory_space<vmem>> -> memref<1x32xf32, #tpu.memory_space<vmem>>
    %6 = tpu.memref_slice %arg7[%c0_i32_0] : memref<64x!tpu.dma_semaphore, #tpu.memory_space<semaphore_mem>> -> memref<1x!tpu.dma_semaphore, #tpu.memory_space<semaphore_mem>>
    %7 = tpu.memref_squeeze %6 : memref<1x!tpu.dma_semaphore, #tpu.memory_space<semaphore_mem>> -> memref<!tpu.dma_semaphore, #tpu.memory_space<semaphore_mem>>
    tpu.enqueue_dma source(%4 : memref<1x32xf32, #tpu.memory_space<any>>) target(%5 : memref<1x32xf32, #tpu.memory_space<vmem>>) target_semaphore(%7 : memref<!tpu.dma_semaphore, #tpu.memory_space<semaphore_mem>>)
    %c8_i32_4 = arith.constant 8 : i32
    %8 = arith.muli %arg0, %c8_i32_4 : i32
    %c1_i32 = arith.constant 1 : i32
    %9 = arith.addi %8, %c1_i32 : i32
    %10 = arith.index_cast %9 : i32 to index
    %c0_5 = arith.constant 0 : index
    %11 = memref.load %arg1[%10, %c0_5] : memref<16x8xi32, #tpu.memory_space<smem>>
    %c1_i32_6 = arith.constant 1 : i32
    %c0_i32_7 = arith.constant 0 : i32
    %12 = tpu.memref_slice %arg2[%11, %c0_i32_7] : memref<30x32xf32, #tpu.memory_space<any>> -> memref<1x32xf32, #tpu.memory_space<any>>
    %c1_i32_8 = arith.constant 1 : i32
    %c0_i32_9 = arith.constant 0 : i32
    %13 = tpu.memref_slice %arg6[%c1_i32_8, %c0_i32_9] : memref<64x32xf32, #tpu.memory_space<vmem>> -> memref<1x32xf32, #tpu.memory_space<vmem>>
    %14 = tpu.memref_slice %arg7[%c1_i32_6] : memref<64x!tpu.dma_semaphore, #tpu.memory_space<semaphore_mem>> -> memref<1x!tpu.dma_semaphore, #tpu.memory_space<semaphore_mem>>
    %15 = tpu.memref_squeeze %14 : memref<1x!tpu.dma_semaphore, #tpu.memory_space<semaphore_mem>> -> memref<!tpu.dma_semaphore, #tpu.memory_space<semaphore_mem>>
    tpu.enqueue_dma source(%12 : memref<1x32xf32, #tpu.memory_space<any>>) target(%13 : memref<1x32xf32, #tpu.memory_space<vmem>>) target_semaphore(%15 : memref<!tpu.dma_semaphore, #tpu.memory_space<semaphore_mem>>)
    %c8_i32_10 = arith.constant 8 : i32
    %16 = arith.muli %arg0, %c8_i32_10 : i32
    %c2_i32 = arith.constant 2 : i32
    %17 = arith.addi %16, %c2_i32 : i32
    %18 = arith.index_cast %17 : i32 to index
    %c0_11 = arith.constant 0 : index
    %19 = memref.load %arg1[%18, %c0_11] : memref<16x8xi32, #tpu.memory_space<smem>>
    %c2_i32_12 = arith.constant 2 : i32
    %c0_i32_13 = arith.constant 0 : i32
    %20 = tpu.memref_slice %arg2[%19, %c0_i32_13] : memref<30x32xf32, #tpu.memory_space<any>> -> memref<1x32xf32, #tpu.memory_space<any>>
    %c2_i32_14 = arith.constant 2 : i32
    %c0_i32_15 = arith.constant 0 : i32
    %21 = tpu.memref_slice %arg6[%c2_i32_14, %c0_i32_15] : memref<64x32xf32, #tpu.memory_space<vmem>> -> memref<1x32xf32, #tpu.memory_space<vmem>>
    %22 = tpu.memref_slice %arg7[%c2_i32_12] : memref<64x!tpu.dma_semaphore, #tpu.memory_space<semaphore_mem>> -> memref<1x!tpu.dma_semaphore, #tpu.memory_space<semaphore_mem>>
    %23 = tpu.memref_squeeze %22 : memref<1x!tpu.dma_semaphore, #tpu.memory_space<semaphore_mem>> -> memref<!tpu.dma_semaphore, #tpu.memory_space<semaphore_mem>>
    tpu.enqueue_dma source(%20 : memref<1x32xf32, #tpu.memory_space<any>>) target(%21 : memref<1x32xf32, #tpu.memory_space<vmem>>) target_semaphore(%23 : memref<!tpu.dma_semaphore, #tpu.memory_space<semaphore_mem>>)
    %c8_i32_16 = arith.constant 8 : i32
    %24 = arith.muli %arg0, %c8_i32_16 : i32
    %c3_i32 = arith.constant 3 : i32
    %25 = arith.addi %24, %c3_i32 : i32
    %26 = arith.index_cast %25 : i32 to index
    %c0_17 = arith.constant 0 : index
    %27 = memref.load %arg1[%26, %c0_17] : memref<16x8xi32, #tpu.memory_space<smem>>
    %c3_i32_18 = arith.constant 3 : i32
    %c0_i32_19 = arith.constant 0 : i32
    %28 = tpu.memref_slice %arg2[%27, %c0_i32_19] : memref<30x32xf32, #tpu.memory_space<any>> -> memref<1x32xf32, #tpu.memory_space<any>>
    %c3_i32_20 = arith.constant 3 : i32
    %c0_i32_21 = arith.constant 0 : i32
    %29 = tpu.memref_slice %arg6[%c3_i32_20, %c0_i32_21] : memref<64x32xf32, #tpu.memory_space<vmem>> -> memref<1x32xf32, #tpu.memory_space<vmem>>
    %30 = tpu.memref_slice %arg7[%c3_i32_18] : memref<64x!tpu.dma_semaphore, #tpu.memory_space<semaphore_mem>> -> memref<1x!tpu.dma_semaphore, #tpu.memory_space<semaphore_mem>>
    %31 = tpu.memref_squeeze %30 : memref<1x!tpu.dma_semaphore, #tpu.memory_space<semaphore_mem>> -> memref<!tpu.dma_semaphore, #tpu.memory_space<semaphore_mem>>
    tpu.enqueue_dma source(%28 : memref<1x32xf32, #tpu.memory_space<any>>) target(%29 : memref<1x32xf32, #tpu.memory_space<vmem>>) target_semaphore(%31 : memref<!tpu.dma_semaphore, #tpu.memory_space<semaphore_mem>>)
    %c8_i32_22 = arith.constant 8 : i32
    %32 = arith.muli %arg0, %c8_i32_22 : i32
    %c4_i32 = arith.constant 4 : i32
    %33 = arith.addi %32, %c4_i32 : i32
    %34 = arith.index_cast %33 : i32 to index
    %c0_23 = arith.constant 0 : index
    %35 = memref.load %arg1[%34, %c0_23] : memref<16x8xi32, #tpu.memory_space<smem>>
    %c4_i32_24 = arith.constant 4 : i32
    %c0_i32_25 = arith.constant 0 : i32
    %36 = tpu.memref_slice %arg2[%35, %c0_i32_25] : memref<30x32xf32, #tpu.memory_space<any>> -> memref<1x32xf32, #tpu.memory_space<any>>
    %c4_i32_26 = arith.constant 4 : i32
    %c0_i32_27 = arith.constant 0 : i32
    %37 = tpu.memref_slice %arg6[%c4_i32_26, %c0_i32_27] : memref<64x32xf32, #tpu.memory_space<vmem>> -> memref<1x32xf32, #tpu.memory_space<vmem>>
    %38 = tpu.memref_slice %arg7[%c4_i32_24] : memref<64x!tpu.dma_semaphore, #tpu.memory_space<semaphore_mem>> -> memref<1x!tpu.dma_semaphore, #tpu.memory_space<semaphore_mem>>
    %39 = tpu.memref_squeeze %38 : memref<1x!tpu.dma_semaphore, #tpu.memory_space<semaphore_mem>> -> memref<!tpu.dma_semaphore, #tpu.memory_space<semaphore_mem>>
    tpu.enqueue_dma source(%36 : memref<1x32xf32, #tpu.memory_space<any>>) target(%37 : memref<1x32xf32, #tpu.memory_space<vmem>>) target_semaphore(%39 : memref<!tpu.dma_semaphore, #tpu.memory_space<semaphore_mem>>)
    %c8_i32_28 = arith.constant 8 : i32
    %40 = arith.muli %arg0, %c8_i32_28 : i32
    %c5_i32 = arith.constant 5 : i32
    %41 = arith.addi %40, %c5_i32 : i32
    %42 = arith.index_cast %41 : i32 to index
    %c0_29 = arith.constant 0 : index
    %43 = memref.load %arg1[%42, %c0_29] : memref<16x8xi32, #tpu.memory_space<smem>>
    %c5_i32_30 = arith.constant 5 : i32
    %c0_i32_31 = arith.constant 0 : i32
    %44 = tpu.memref_slice %arg2[%43, %c0_i32_31] : memref<30x32xf32, #tpu.memory_space<any>> -> memref<1x32xf32, #tpu.memory_space<any>>
    %c5_i32_32 = arith.constant 5 : i32
    %c0_i32_33 = arith.constant 0 : i32
    %45 = tpu.memref_slice %arg6[%c5_i32_32, %c0_i32_33] : memref<64x32xf32, #tpu.memory_space<vmem>> -> memref<1x32xf32, #tpu.memory_space<vmem>>
    %46 = tpu.memref_slice %arg7[%c5_i32_30] : memref<64x!tpu.dma_semaphore, #tpu.memory_space<semaphore_mem>> -> memref<1x!tpu.dma_semaphore, #tpu.memory_space<semaphore_mem>>
    %47 = tpu.memref_squeeze %46 : memref<1x!tpu.dma_semaphore, #tpu.memory_space<semaphore_mem>> -> memref<!tpu.dma_semaphore, #tpu.memory_space<semaphore_mem>>
    tpu.enqueue_dma source(%44 : memref<1x32xf32, #tpu.memory_space<any>>) target(%45 : memref<1x32xf32, #tpu.memory_space<vmem>>) target_semaphore(%47 : memref<!tpu.dma_semaphore, #tpu.memory_space<semaphore_mem>>)
    %c8_i32_34 = arith.constant 8 : i32
    %48 = arith.muli %arg0, %c8_i32_34 : i32
    %c6_i32 = arith.constant 6 : i32
    %49 = arith.addi %48, %c6_i32 : i32
    %50 = arith.index_cast %49 : i32 to index
    %c0_35 = arith.constant 0 : index
    %51 = memref.load %arg1[%50, %c0_35] : memref<16x8xi32, #tpu.memory_space<smem>>
    %c6_i32_36 = arith.constant 6 : i32
    %c0_i32_37 = arith.constant 0 : i32
    %52 = tpu.memref_slice %arg2[%51, %c0_i32_37] : memref<30x32xf32, #tpu.memory_space<any>> -> memref<1x32xf32, #tpu.memory_space<any>>
    %c6_i32_38 = arith.constant 6 : i32
    %c0_i32_39 = arith.constant 0 : i32
    %53 = tpu.memref_slice %arg6[%c6_i32_38, %c0_i32_39] : memref<64x32xf32, #tpu.memory_space<vmem>> -> memref<1x32xf32, #tpu.memory_space<vmem>>
    %54 = tpu.memref_slice %arg7[%c6_i32_36] : memref<64x!tpu.dma_semaphore, #tpu.memory_space<semaphore_mem>> -> memref<1x!tpu.dma_semaphore, #tpu.memory_space<semaphore_mem>>
    %55 = tpu.memref_squeeze %54 : memref<1x!tpu.dma_semaphore, #tpu.memory_space<semaphore_mem>> -> memref<!tpu.dma_semaphore, #tpu.memory_space<semaphore_mem>>
    tpu.enqueue_dma source(%52 : memref<1x32xf32, #tpu.memory_space<any>>) target(%53 : memref<1x32xf32, #tpu.memory_space<vmem>>) target_semaphore(%55 : memref<!tpu.dma_semaphore, #tpu.memory_space<semaphore_mem>>)
    %c8_i32_40 = arith.constant 8 : i32
    %56 = arith.muli %arg0, %c8_i32_40 : i32
    %c7_i32 = arith.constant 7 : i32
    %57 = arith.addi %56, %c7_i32 : i32
    %58 = arith.index_cast %57 : i32 to index
    %c0_41 = arith.constant 0 : index
    %59 = memref.load %arg1[%58, %c0_41] : memref<16x8xi32, #tpu.memory_space<smem>>
    %c7_i32_42 = arith.constant 7 : i32
    %c0_i32_43 = arith.constant 0 : i32
    %60 = tpu.memref_slice %arg2[%59, %c0_i32_43] : memref<30x32xf32, #tpu.memory_space<any>> -> memref<1x32xf32, #tpu.memory_space<any>>
    %c7_i32_44 = arith.constant 7 : i32
    %c0_i32_45 = arith.constant 0 : i32
    %61 = tpu.memref_slice %arg6[%c7_i32_44, %c0_i32_45] : memref<64x32xf32, #tpu.memory_space<vmem>> -> memref<1x32xf32, #tpu.memory_space<vmem>>
    %62 = tpu.memref_slice %arg7[%c7_i32_42] : memref<64x!tpu.dma_semaphore, #tpu.memory_space<semaphore_mem>> -> memref<1x!tpu.dma_semaphore, #tpu.memory_space<semaphore_mem>>
    %63 = tpu.memref_squeeze %62 : memref<1x!tpu.dma_semaphore, #tpu.memory_space<semaphore_mem>> -> memref<!tpu.dma_semaphore, #tpu.memory_space<semaphore_mem>>
    tpu.enqueue_dma source(%60 : memref<1x32xf32, #tpu.memory_space<any>>) target(%61 : memref<1x32xf32, #tpu.memory_space<vmem>>) target_semaphore(%63 : memref<!tpu.dma_semaphore, #tpu.memory_space<semaphore_mem>>)
    %c8_i32_46 = arith.constant 8 : i32
    %64 = arith.muli %arg0, %c8_i32_46 : i32
    %c0_i32_47 = arith.constant 0 : i32
    %65 = arith.addi %64, %c0_i32_47 : i32
    %66 = arith.index_cast %65 : i32 to index
    %c1 = arith.constant 1 : index
    %67 = memref.load %arg1[%66, %c1] : memref<16x8xi32, #tpu.memory_space<smem>>
    %c8_i32_48 = arith.constant 8 : i32
    %c0_i32_49 = arith.constant 0 : i32
    %68 = tpu.memref_slice %arg2[%67, %c0_i32_49] : memref<30x32xf32, #tpu.memory_space<any>> -> memref<1x32xf32, #tpu.memory_space<any>>
    %c8_i32_50 = arith.constant 8 : i32
    %c0_i32_51 = arith.constant 0 : i32
    %69 = tpu.memref_slice %arg6[%c8_i32_50, %c0_i32_51] : memref<64x32xf32, #tpu.memory_space<vmem>> -> memref<1x32xf32, #tpu.memory_space<vmem>>
    %70 = tpu.memref_slice %arg7[%c8_i32_48] : memref<64x!tpu.dma_semaphore, #tpu.memory_space<semaphore_mem>> -> memref<1x!tpu.dma_semaphore, #tpu.memory_space<semaphore_mem>>
    %71 = tpu.memref_squeeze %70 : memref<1x!tpu.dma_semaphore, #tpu.memory_space<semaphore_mem>> -> memref<!tpu.dma_semaphore, #tpu.memory_space<semaphore_mem>>
    tpu.enqueue_dma source(%68 : memref<1x32xf32, #tpu.memory_space<any>>) target(%69 : memref<1x32xf32, #tpu.memory_space<vmem>>) target_semaphore(%71 : memref<!tpu.dma_semaphore, #tpu.memory_space<semaphore_mem>>)
    %c8_i32_52 = arith.constant 8 : i32
    %72 = arith.muli %arg0, %c8_i32_52 : i32
    %c1_i32_53 = arith.constant 1 : i32
    %73 = arith.addi %72, %c1_i32_53 : i32
    %74 = arith.index_cast %73 : i32 to index
    %c1_54 = arith.constant 1 : index
    %75 = memref.load %arg1[%74, %c1_54] : memref<16x8xi32, #tpu.memory_space<smem>>
    %c9_i32 = arith.constant 9 : i32
    %c0_i32_55 = arith.constant 0 : i32
    %76 = tpu.memref_slice %arg2[%75, %c0_i32_55] : memref<30x32xf32, #tpu.memory_space<any>> -> memref<1x32xf32, #tpu.memory_space<any>>
    %c9_i32_56 = arith.constant 9 : i32
    %c0_i32_57 = arith.constant 0 : i32
    %77 = tpu.memref_slice %arg6[%c9_i32_56, %c0_i32_57] : memref<64x32xf32, #tpu.memory_space<vmem>> -> memref<1x32xf32, #tpu.memory_space<vmem>>
    %78 = tpu.memref_slice %arg7[%c9_i32] : memref<64x!tpu.dma_semaphore, #tpu.memory_space<semaphore_mem>> -> memref<1x!tpu.dma_semaphore, #tpu.memory_space<semaphore_mem>>
    %79 = tpu.memref_squeeze %78 : memref<1x!tpu.dma_semaphore, #tpu.memory_space<semaphore_mem>> -> memref<!tpu.dma_semaphore, #tpu.memory_space<semaphore_mem>>
    tpu.enqueue_dma source(%76 : memref<1x32xf32, #tpu.memory_space<any>>) target(%77 : memref<1x32xf32, #tpu.memory_space<vmem>>) target_semaphore(%79 : memref<!tpu.dma_semaphore, #tpu.memory_space<semaphore_mem>>)
    %c8_i32_58 = arith.constant 8 : i32
    %80 = arith.muli %arg0, %c8_i32_58 : i32
    %c2_i32_59 = arith.constant 2 : i32
    %81 = arith.addi %80, %c2_i32_59 : i32
    %82 = arith.index_cast %81 : i32 to index
    %c1_60 = arith.constant 1 : index
    %83 = memref.load %arg1[%82, %c1_60] : memref<16x8xi32, #tpu.memory_space<smem>>
    %c10_i32 = arith.constant 10 : i32
    %c0_i32_61 = arith.constant 0 : i32
    %84 = tpu.memref_slice %arg2[%83, %c0_i32_61] : memref<30x32xf32, #tpu.memory_space<any>> -> memref<1x32xf32, #tpu.memory_space<any>>
    %c10_i32_62 = arith.constant 10 : i32
    %c0_i32_63 = arith.constant 0 : i32
    %85 = tpu.memref_slice %arg6[%c10_i32_62, %c0_i32_63] : memref<64x32xf32, #tpu.memory_space<vmem>> -> memref<1x32xf32, #tpu.memory_space<vmem>>
    %86 = tpu.memref_slice %arg7[%c10_i32] : memref<64x!tpu.dma_semaphore, #tpu.memory_space<semaphore_mem>> -> memref<1x!tpu.dma_semaphore, #tpu.memory_space<semaphore_mem>>
    %87 = tpu.memref_squeeze %86 : memref<1x!tpu.dma_semaphore, #tpu.memory_space<semaphore_mem>> -> memref<!tpu.dma_semaphore, #tpu.memory_space<semaphore_mem>>
    tpu.enqueue_dma source(%84 : memref<1x32xf32, #tpu.memory_space<any>>) target(%85 : memref<1x32xf32, #tpu.memory_space<vmem>>) target_semaphore(%87 : memref<!tpu.dma_semaphore, #tpu.memory_space<semaphore_mem>>)
    %c8_i32_64 = arith.constant 8 : i32
    %88 = arith.muli %arg0, %c8_i32_64 : i32
    %c3_i32_65 = arith.constant 3 : i32
    %89 = arith.addi %88, %c3_i32_65 : i32
    %90 = arith.index_cast %89 : i32 to index
    %c1_66 = arith.constant 1 : index
    %91 = memref.load %arg1[%90, %c1_66] : memref<16x8xi32, #tpu.memory_space<smem>>
    %c11_i32 = arith.constant 11 : i32
    %c0_i32_67 = arith.constant 0 : i32
    %92 = tpu.memref_slice %arg2[%91, %c0_i32_67] : memref<30x32xf32, #tpu.memory_space<any>> -> memref<1x32xf32, #tpu.memory_space<any>>
    %c11_i32_68 = arith.constant 11 : i32
    %c0_i32_69 = arith.constant 0 : i32
    %93 = tpu.memref_slice %arg6[%c11_i32_68, %c0_i32_69] : memref<64x32xf32, #tpu.memory_space<vmem>> -> memref<1x32xf32, #tpu.memory_space<vmem>>
    %94 = tpu.memref_slice %arg7[%c11_i32] : memref<64x!tpu.dma_semaphore, #tpu.memory_space<semaphore_mem>> -> memref<1x!tpu.dma_semaphore, #tpu.memory_space<semaphore_mem>>
    %95 = tpu.memref_squeeze %94 : memref<1x!tpu.dma_semaphore, #tpu.memory_space<semaphore_mem>> -> memref<!tpu.dma_semaphore, #tpu.memory_space<semaphore_mem>>
    tpu.enqueue_dma source(%92 : memref<1x32xf32, #tpu.memory_space<any>>) target(%93 : memref<1x32xf32, #tpu.memory_space<vmem>>) target_semaphore(%95 : memref<!tpu.dma_semaphore, #tpu.memory_space<semaphore_mem>>)
    %c8_i32_70 = arith.constant 8 : i32
    %96 = arith.muli %arg0, %c8_i32_70 : i32
    %c4_i32_71 = arith.constant 4 : i32
    %97 = arith.addi %96, %c4_i32_71 : i32
    %98 = arith.index_cast %97 : i32 to index
    %c1_72 = arith.constant 1 : index
    %99 = memref.load %arg1[%98, %c1_72] : memref<16x8xi32, #tpu.memory_space<smem>>
    %c12_i32 = arith.constant 12 : i32
    %c0_i32_73 = arith.constant 0 : i32
    %100 = tpu.memref_slice %arg2[%99, %c0_i32_73] : memref<30x32xf32, #tpu.memory_space<any>> -> memref<1x32xf32, #tpu.memory_space<any>>
    %c12_i32_74 = arith.constant 12 : i32
    %c0_i32_75 = arith.constant 0 : i32
    %101 = tpu.memref_slice %arg6[%c12_i32_74, %c0_i32_75] : memref<64x32xf32, #tpu.memory_space<vmem>> -> memref<1x32xf32, #tpu.memory_space<vmem>>
    %102 = tpu.memref_slice %arg7[%c12_i32] : memref<64x!tpu.dma_semaphore, #tpu.memory_space<semaphore_mem>> -> memref<1x!tpu.dma_semaphore, #tpu.memory_space<semaphore_mem>>
    %103 = tpu.memref_squeeze %102 : memref<1x!tpu.dma_semaphore, #tpu.memory_space<semaphore_mem>> -> memref<!tpu.dma_semaphore, #tpu.memory_space<semaphore_mem>>
    tpu.enqueue_dma source(%100 : memref<1x32xf32, #tpu.memory_space<any>>) target(%101 : memref<1x32xf32, #tpu.memory_space<vmem>>) target_semaphore(%103 : memref<!tpu.dma_semaphore, #tpu.memory_space<semaphore_mem>>)
    %c8_i32_76 = arith.constant 8 : i32
    %104 = arith.muli %arg0, %c8_i32_76 : i32
    %c5_i32_77 = arith.constant 5 : i32
    %105 = arith.addi %104, %c5_i32_77 : i32
    %106 = arith.index_cast %105 : i32 to index
    %c1_78 = arith.constant 1 : index
    %107 = memref.load %arg1[%106, %c1_78] : memref<16x8xi32, #tpu.memory_space<smem>>
    %c13_i32 = arith.constant 13 : i32
    %c0_i32_79 = arith.constant 0 : i32
    %108 = tpu.memref_slice %arg2[%107, %c0_i32_79] : memref<30x32xf32, #tpu.memory_space<any>> -> memref<1x32xf32, #tpu.memory_space<any>>
    %c13_i32_80 = arith.constant 13 : i32
    %c0_i32_81 = arith.constant 0 : i32
    %109 = tpu.memref_slice %arg6[%c13_i32_80, %c0_i32_81] : memref<64x32xf32, #tpu.memory_space<vmem>> -> memref<1x32xf32, #tpu.memory_space<vmem>>
    %110 = tpu.memref_slice %arg7[%c13_i32] : memref<64x!tpu.dma_semaphore, #tpu.memory_space<semaphore_mem>> -> memref<1x!tpu.dma_semaphore, #tpu.memory_space<semaphore_mem>>
    %111 = tpu.memref_squeeze %110 : memref<1x!tpu.dma_semaphore, #tpu.memory_space<semaphore_mem>> -> memref<!tpu.dma_semaphore, #tpu.memory_space<semaphore_mem>>
    tpu.enqueue_dma source(%108 : memref<1x32xf32, #tpu.memory_space<any>>) target(%109 : memref<1x32xf32, #tpu.memory_space<vmem>>) target_semaphore(%111 : memref<!tpu.dma_semaphore, #tpu.memory_space<semaphore_mem>>)
    %c8_i32_82 = arith.constant 8 : i32
    %112 = arith.muli %arg0, %c8_i32_82 : i32
    %c6_i32_83 = arith.constant 6 : i32
    %113 = arith.addi %112, %c6_i32_83 : i32
    %114 = arith.index_cast %113 : i32 to index
    %c1_84 = arith.constant 1 : index
    %115 = memref.load %arg1[%114, %c1_84] : memref<16x8xi32, #tpu.memory_space<smem>>
    %c14_i32 = arith.constant 14 : i32
    %c0_i32_85 = arith.constant 0 : i32
    %116 = tpu.memref_slice %arg2[%115, %c0_i32_85] : memref<30x32xf32, #tpu.memory_space<any>> -> memref<1x32xf32, #tpu.memory_space<any>>
    %c14_i32_86 = arith.constant 14 : i32
    %c0_i32_87 = arith.constant 0 : i32
    %117 = tpu.memref_slice %arg6[%c14_i32_86, %c0_i32_87] : memref<64x32xf32, #tpu.memory_space<vmem>> -> memref<1x32xf32, #tpu.memory_space<vmem>>
    %118 = tpu.memref_slice %arg7[%c14_i32] : memref<64x!tpu.dma_semaphore, #tpu.memory_space<semaphore_mem>> -> memref<1x!tpu.dma_semaphore, #tpu.memory_space<semaphore_mem>>
    %119 = tpu.memref_squeeze %118 : memref<1x!tpu.dma_semaphore, #tpu.memory_space<semaphore_mem>> -> memref<!tpu.dma_semaphore, #tpu.memory_space<semaphore_mem>>
    tpu.enqueue_dma source(%116 : memref<1x32xf32, #tpu.memory_space<any>>) target(%117 : memref<1x32xf32, #tpu.memory_space<vmem>>) target_semaphore(%119 : memref<!tpu.dma_semaphore, #tpu.memory_space<semaphore_mem>>)
    %c8_i32_88 = arith.constant 8 : i32
    %120 = arith.muli %arg0, %c8_i32_88 : i32
    %c7_i32_89 = arith.constant 7 : i32
    %121 = arith.addi %120, %c7_i32_89 : i32
    %122 = arith.index_cast %121 : i32 to index
    %c1_90 = arith.constant 1 : index
    %123 = memref.load %arg1[%122, %c1_90] : memref<16x8xi32, #tpu.memory_space<smem>>
    %c15_i32 = arith.constant 15 : i32
    %c0_i32_91 = arith.constant 0 : i32
    %124 = tpu.memref_slice %arg2[%123, %c0_i32_91] : memref<30x32xf32, #tpu.memory_space<any>> -> memref<1x32xf32, #tpu.memory_space<any>>
    %c15_i32_92 = arith.constant 15 : i32
    %c0_i32_93 = arith.constant 0 : i32
    %125 = tpu.memref_slice %arg6[%c15_i32_92, %c0_i32_93] : memref<64x32xf32, #tpu.memory_space<vmem>> -> memref<1x32xf32, #tpu.memory_space<vmem>>
    %126 = tpu.memref_slice %arg7[%c15_i32] : memref<64x!tpu.dma_semaphore, #tpu.memory_space<semaphore_mem>> -> memref<1x!tpu.dma_semaphore, #tpu.memory_space<semaphore_mem>>
    %127 = tpu.memref_squeeze %126 : memref<1x!tpu.dma_semaphore, #tpu.memory_space<semaphore_mem>> -> memref<!tpu.dma_semaphore, #tpu.memory_space<semaphore_mem>>
    tpu.enqueue_dma source(%124 : memref<1x32xf32, #tpu.memory_space<any>>) target(%125 : memref<1x32xf32, #tpu.memory_space<vmem>>) target_semaphore(%127 : memref<!tpu.dma_semaphore, #tpu.memory_space<semaphore_mem>>)
    %c8_i32_94 = arith.constant 8 : i32
    %128 = arith.muli %arg0, %c8_i32_94 : i32
    %c0_i32_95 = arith.constant 0 : i32
    %129 = arith.addi %128, %c0_i32_95 : i32
    %130 = arith.index_cast %129 : i32 to index
    %c2 = arith.constant 2 : index
    %131 = memref.load %arg1[%130, %c2] : memref<16x8xi32, #tpu.memory_space<smem>>
    %c16_i32 = arith.constant 16 : i32
    %c0_i32_96 = arith.constant 0 : i32
    %132 = tpu.memref_slice %arg2[%131, %c0_i32_96] : memref<30x32xf32, #tpu.memory_space<any>> -> memref<1x32xf32, #tpu.memory_space<any>>
    %c16_i32_97 = arith.constant 16 : i32
    %c0_i32_98 = arith.constant 0 : i32
    %133 = tpu.memref_slice %arg6[%c16_i32_97, %c0_i32_98] : memref<64x32xf32, #tpu.memory_space<vmem>> -> memref<1x32xf32, #tpu.memory_space<vmem>>
    %134 = tpu.memref_slice %arg7[%c16_i32] : memref<64x!tpu.dma_semaphore, #tpu.memory_space<semaphore_mem>> -> memref<1x!tpu.dma_semaphore, #tpu.memory_space<semaphore_mem>>
    %135 = tpu.memref_squeeze %134 : memref<1x!tpu.dma_semaphore, #tpu.memory_space<semaphore_mem>> -> memref<!tpu.dma_semaphore, #tpu.memory_space<semaphore_mem>>
    tpu.enqueue_dma source(%132 : memref<1x32xf32, #tpu.memory_space<any>>) target(%133 : memref<1x32xf32, #tpu.memory_space<vmem>>) target_semaphore(%135 : memref<!tpu.dma_semaphore, #tpu.memory_space<semaphore_mem>>)
    %c8_i32_99 = arith.constant 8 : i32
    %136 = arith.muli %arg0, %c8_i32_99 : i32
    %c1_i32_100 = arith.constant 1 : i32
    %137 = arith.addi %136, %c1_i32_100 : i32
    %138 = arith.index_cast %137 : i32 to index
    %c2_101 = arith.constant 2 : index
    %139 = memref.load %arg1[%138, %c2_101] : memref<16x8xi32, #tpu.memory_space<smem>>
    %c17_i32 = arith.constant 17 : i32
    %c0_i32_102 = arith.constant 0 : i32
    %140 = tpu.memref_slice %arg2[%139, %c0_i32_102] : memref<30x32xf32, #tpu.memory_space<any>> -> memref<1x32xf32, #tpu.memory_space<any>>
    %c17_i32_103 = arith.constant 17 : i32
    %c0_i32_104 = arith.constant 0 : i32
    %141 = tpu.memref_slice %arg6[%c17_i32_103, %c0_i32_104] : memref<64x32xf32, #tpu.memory_space<vmem>> -> memref<1x32xf32, #tpu.memory_space<vmem>>
    %142 = tpu.memref_slice %arg7[%c17_i32] : memref<64x!tpu.dma_semaphore, #tpu.memory_space<semaphore_mem>> -> memref<1x!tpu.dma_semaphore, #tpu.memory_space<semaphore_mem>>
    %143 = tpu.memref_squeeze %142 : memref<1x!tpu.dma_semaphore, #tpu.memory_space<semaphore_mem>> -> memref<!tpu.dma_semaphore, #tpu.memory_space<semaphore_mem>>
    tpu.enqueue_dma source(%140 : memref<1x32xf32, #tpu.memory_space<any>>) target(%141 : memref<1x32xf32, #tpu.memory_space<vmem>>) target_semaphore(%143 : memref<!tpu.dma_semaphore, #tpu.memory_space<semaphore_mem>>)
    %c8_i32_105 = arith.constant 8 : i32
    %144 = arith.muli %arg0, %c8_i32_105 : i32
    %c2_i32_106 = arith.constant 2 : i32
    %145 = arith.addi %144, %c2_i32_106 : i32
    %146 = arith.index_cast %145 : i32 to index
    %c2_107 = arith.constant 2 : index
    %147 = memref.load %arg1[%146, %c2_107] : memref<16x8xi32, #tpu.memory_space<smem>>
    %c18_i32 = arith.constant 18 : i32
    %c0_i32_108 = arith.constant 0 : i32
    %148 = tpu.memref_slice %arg2[%147, %c0_i32_108] : memref<30x32xf32, #tpu.memory_space<any>> -> memref<1x32xf32, #tpu.memory_space<any>>
    %c18_i32_109 = arith.constant 18 : i32
    %c0_i32_110 = arith.constant 0 : i32
    %149 = tpu.memref_slice %arg6[%c18_i32_109, %c0_i32_110] : memref<64x32xf32, #tpu.memory_space<vmem>> -> memref<1x32xf32, #tpu.memory_space<vmem>>
    %150 = tpu.memref_slice %arg7[%c18_i32] : memref<64x!tpu.dma_semaphore, #tpu.memory_space<semaphore_mem>> -> memref<1x!tpu.dma_semaphore, #tpu.memory_space<semaphore_mem>>
    %151 = tpu.memref_squeeze %150 : memref<1x!tpu.dma_semaphore, #tpu.memory_space<semaphore_mem>> -> memref<!tpu.dma_semaphore, #tpu.memory_space<semaphore_mem>>
    tpu.enqueue_dma source(%148 : memref<1x32xf32, #tpu.memory_space<any>>) target(%149 : memref<1x32xf32, #tpu.memory_space<vmem>>) target_semaphore(%151 : memref<!tpu.dma_semaphore, #tpu.memory_space<semaphore_mem>>)
    %c8_i32_111 = arith.constant 8 : i32
    %152 = arith.muli %arg0, %c8_i32_111 : i32
    %c3_i32_112 = arith.constant 3 : i32
    %153 = arith.addi %152, %c3_i32_112 : i32
    %154 = arith.index_cast %153 : i32 to index
    %c2_113 = arith.constant 2 : index
    %155 = memref.load %arg1[%154, %c2_113] : memref<16x8xi32, #tpu.memory_space<smem>>
    %c19_i32 = arith.constant 19 : i32
    %c0_i32_114 = arith.constant 0 : i32
    %156 = tpu.memref_slice %arg2[%155, %c0_i32_114] : memref<30x32xf32, #tpu.memory_space<any>> -> memref<1x32xf32, #tpu.memory_space<any>>
    %c19_i32_115 = arith.constant 19 : i32
    %c0_i32_116 = arith.constant 0 : i32
    %157 = tpu.memref_slice %arg6[%c19_i32_115, %c0_i32_116] : memref<64x32xf32, #tpu.memory_space<vmem>> -> memref<1x32xf32, #tpu.memory_space<vmem>>
    %158 = tpu.memref_slice %arg7[%c19_i32] : memref<64x!tpu.dma_semaphore, #tpu.memory_space<semaphore_mem>> -> memref<1x!tpu.dma_semaphore, #tpu.memory_space<semaphore_mem>>
    %159 = tpu.memref_squeeze %158 : memref<1x!tpu.dma_semaphore, #tpu.memory_space<semaphore_mem>> -> memref<!tpu.dma_semaphore, #tpu.memory_space<semaphore_mem>>
    tpu.enqueue_dma source(%156 : memref<1x32xf32, #tpu.memory_space<any>>) target(%157 : memref<1x32xf32, #tpu.memory_space<vmem>>) target_semaphore(%159 : memref<!tpu.dma_semaphore, #tpu.memory_space<semaphore_mem>>)
    %c8_i32_117 = arith.constant 8 : i32
    %160 = arith.muli %arg0, %c8_i32_117 : i32
    %c4_i32_118 = arith.constant 4 : i32
    %161 = arith.addi %160, %c4_i32_118 : i32
    %162 = arith.index_cast %161 : i32 to index
    %c2_119 = arith.constant 2 : index
    %163 = memref.load %arg1[%162, %c2_119] : memref<16x8xi32, #tpu.memory_space<smem>>
    %c20_i32 = arith.constant 20 : i32
    %c0_i32_120 = arith.constant 0 : i32
    %164 = tpu.memref_slice %arg2[%163, %c0_i32_120] : memref<30x32xf32, #tpu.memory_space<any>> -> memref<1x32xf32, #tpu.memory_space<any>>
    %c20_i32_121 = arith.constant 20 : i32
    %c0_i32_122 = arith.constant 0 : i32
    %165 = tpu.memref_slice %arg6[%c20_i32_121, %c0_i32_122] : memref<64x32xf32, #tpu.memory_space<vmem>> -> memref<1x32xf32, #tpu.memory_space<vmem>>
    %166 = tpu.memref_slice %arg7[%c20_i32] : memref<64x!tpu.dma_semaphore, #tpu.memory_space<semaphore_mem>> -> memref<1x!tpu.dma_semaphore, #tpu.memory_space<semaphore_mem>>
    %167 = tpu.memref_squeeze %166 : memref<1x!tpu.dma_semaphore, #tpu.memory_space<semaphore_mem>> -> memref<!tpu.dma_semaphore, #tpu.memory_space<semaphore_mem>>
    tpu.enqueue_dma source(%164 : memref<1x32xf32, #tpu.memory_space<any>>) target(%165 : memref<1x32xf32, #tpu.memory_space<vmem>>) target_semaphore(%167 : memref<!tpu.dma_semaphore, #tpu.memory_space<semaphore_mem>>)
    %c8_i32_123 = arith.constant 8 : i32
    %168 = arith.muli %arg0, %c8_i32_123 : i32
    %c5_i32_124 = arith.constant 5 : i32
    %169 = arith.addi %168, %c5_i32_124 : i32
    %170 = arith.index_cast %169 : i32 to index
    %c2_125 = arith.constant 2 : index
    %171 = memref.load %arg1[%170, %c2_125] : memref<16x8xi32, #tpu.memory_space<smem>>
    %c21_i32 = arith.constant 21 : i32
    %c0_i32_126 = arith.constant 0 : i32
    %172 = tpu.memref_slice %arg2[%171, %c0_i32_126] : memref<30x32xf32, #tpu.memory_space<any>> -> memref<1x32xf32, #tpu.memory_space<any>>
    %c21_i32_127 = arith.constant 21 : i32
    %c0_i32_128 = arith.constant 0 : i32
    %173 = tpu.memref_slice %arg6[%c21_i32_127, %c0_i32_128] : memref<64x32xf32, #tpu.memory_space<vmem>> -> memref<1x32xf32, #tpu.memory_space<vmem>>
    %174 = tpu.memref_slice %arg7[%c21_i32] : memref<64x!tpu.dma_semaphore, #tpu.memory_space<semaphore_mem>> -> memref<1x!tpu.dma_semaphore, #tpu.memory_space<semaphore_mem>>
    %175 = tpu.memref_squeeze %174 : memref<1x!tpu.dma_semaphore, #tpu.memory_space<semaphore_mem>> -> memref<!tpu.dma_semaphore, #tpu.memory_space<semaphore_mem>>
    tpu.enqueue_dma source(%172 : memref<1x32xf32, #tpu.memory_space<any>>) target(%173 : memref<1x32xf32, #tpu.memory_space<vmem>>) target_semaphore(%175 : memref<!tpu.dma_semaphore, #tpu.memory_space<semaphore_mem>>)
    %c8_i32_129 = arith.constant 8 : i32
    %176 = arith.muli %arg0, %c8_i32_129 : i32
    %c6_i32_130 = arith.constant 6 : i32
    %177 = arith.addi %176, %c6_i32_130 : i32
    %178 = arith.index_cast %177 : i32 to index
    %c2_131 = arith.constant 2 : index
    %179 = memref.load %arg1[%178, %c2_131] : memref<16x8xi32, #tpu.memory_space<smem>>
    %c22_i32 = arith.constant 22 : i32
    %c0_i32_132 = arith.constant 0 : i32
    %180 = tpu.memref_slice %arg2[%179, %c0_i32_132] : memref<30x32xf32, #tpu.memory_space<any>> -> memref<1x32xf32, #tpu.memory_space<any>>
    %c22_i32_133 = arith.constant 22 : i32
    %c0_i32_134 = arith.constant 0 : i32
    %181 = tpu.memref_slice %arg6[%c22_i32_133, %c0_i32_134] : memref<64x32xf32, #tpu.memory_space<vmem>> -> memref<1x32xf32, #tpu.memory_space<vmem>>
    %182 = tpu.memref_slice %arg7[%c22_i32] : memref<64x!tpu.dma_semaphore, #tpu.memory_space<semaphore_mem>> -> memref<1x!tpu.dma_semaphore, #tpu.memory_space<semaphore_mem>>
    %183 = tpu.memref_squeeze %182 : memref<1x!tpu.dma_semaphore, #tpu.memory_space<semaphore_mem>> -> memref<!tpu.dma_semaphore, #tpu.memory_space<semaphore_mem>>
    tpu.enqueue_dma source(%180 : memref<1x32xf32, #tpu.memory_space<any>>) target(%181 : memref<1x32xf32, #tpu.memory_space<vmem>>) target_semaphore(%183 : memref<!tpu.dma_semaphore, #tpu.memory_space<semaphore_mem>>)
    %c8_i32_135 = arith.constant 8 : i32
    %184 = arith.muli %arg0, %c8_i32_135 : i32
    %c7_i32_136 = arith.constant 7 : i32
    %185 = arith.addi %184, %c7_i32_136 : i32
    %186 = arith.index_cast %185 : i32 to index
    %c2_137 = arith.constant 2 : index
    %187 = memref.load %arg1[%186, %c2_137] : memref<16x8xi32, #tpu.memory_space<smem>>
    %c23_i32 = arith.constant 23 : i32
    %c0_i32_138 = arith.constant 0 : i32
    %188 = tpu.memref_slice %arg2[%187, %c0_i32_138] : memref<30x32xf32, #tpu.memory_space<any>> -> memref<1x32xf32, #tpu.memory_space<any>>
    %c23_i32_139 = arith.constant 23 : i32
    %c0_i32_140 = arith.constant 0 : i32
    %189 = tpu.memref_slice %arg6[%c23_i32_139, %c0_i32_140] : memref<64x32xf32, #tpu.memory_space<vmem>> -> memref<1x32xf32, #tpu.memory_space<vmem>>
    %190 = tpu.memref_slice %arg7[%c23_i32] : memref<64x!tpu.dma_semaphore, #tpu.memory_space<semaphore_mem>> -> memref<1x!tpu.dma_semaphore, #tpu.memory_space<semaphore_mem>>
    %191 = tpu.memref_squeeze %190 : memref<1x!tpu.dma_semaphore, #tpu.memory_space<semaphore_mem>> -> memref<!tpu.dma_semaphore, #tpu.memory_space<semaphore_mem>>
    tpu.enqueue_dma source(%188 : memref<1x32xf32, #tpu.memory_space<any>>) target(%189 : memref<1x32xf32, #tpu.memory_space<vmem>>) target_semaphore(%191 : memref<!tpu.dma_semaphore, #tpu.memory_space<semaphore_mem>>)
    %c8_i32_141 = arith.constant 8 : i32
    %192 = arith.muli %arg0, %c8_i32_141 : i32
    %c0_i32_142 = arith.constant 0 : i32
    %193 = arith.addi %192, %c0_i32_142 : i32
    %194 = arith.index_cast %193 : i32 to index
    %c3 = arith.constant 3 : index
    %195 = memref.load %arg1[%194, %c3] : memref<16x8xi32, #tpu.memory_space<smem>>
    %c24_i32 = arith.constant 24 : i32
    %c0_i32_143 = arith.constant 0 : i32
    %196 = tpu.memref_slice %arg2[%195, %c0_i32_143] : memref<30x32xf32, #tpu.memory_space<any>> -> memref<1x32xf32, #tpu.memory_space<any>>
    %c24_i32_144 = arith.constant 24 : i32
    %c0_i32_145 = arith.constant 0 : i32
    %197 = tpu.memref_slice %arg6[%c24_i32_144, %c0_i32_145] : memref<64x32xf32, #tpu.memory_space<vmem>> -> memref<1x32xf32, #tpu.memory_space<vmem>>
    %198 = tpu.memref_slice %arg7[%c24_i32] : memref<64x!tpu.dma_semaphore, #tpu.memory_space<semaphore_mem>> -> memref<1x!tpu.dma_semaphore, #tpu.memory_space<semaphore_mem>>
    %199 = tpu.memref_squeeze %198 : memref<1x!tpu.dma_semaphore, #tpu.memory_space<semaphore_mem>> -> memref<!tpu.dma_semaphore, #tpu.memory_space<semaphore_mem>>
    tpu.enqueue_dma source(%196 : memref<1x32xf32, #tpu.memory_space<any>>) target(%197 : memref<1x32xf32, #tpu.memory_space<vmem>>) target_semaphore(%199 : memref<!tpu.dma_semaphore, #tpu.memory_space<semaphore_mem>>)
    %c8_i32_146 = arith.constant 8 : i32
    %200 = arith.muli %arg0, %c8_i32_146 : i32
    %c1_i32_147 = arith.constant 1 : i32
    %201 = arith.addi %200, %c1_i32_147 : i32
    %202 = arith.index_cast %201 : i32 to index
    %c3_148 = arith.constant 3 : index
    %203 = memref.load %arg1[%202, %c3_148] : memref<16x8xi32, #tpu.memory_space<smem>>
    %c25_i32 = arith.constant 25 : i32
    %c0_i32_149 = arith.constant 0 : i32
    %204 = tpu.memref_slice %arg2[%203, %c0_i32_149] : memref<30x32xf32, #tpu.memory_space<any>> -> memref<1x32xf32, #tpu.memory_space<any>>
    %c25_i32_150 = arith.constant 25 : i32
    %c0_i32_151 = arith.constant 0 : i32
    %205 = tpu.memref_slice %arg6[%c25_i32_150, %c0_i32_151] : memref<64x32xf32, #tpu.memory_space<vmem>> -> memref<1x32xf32, #tpu.memory_space<vmem>>
    %206 = tpu.memref_slice %arg7[%c25_i32] : memref<64x!tpu.dma_semaphore, #tpu.memory_space<semaphore_mem>> -> memref<1x!tpu.dma_semaphore, #tpu.memory_space<semaphore_mem>>
    %207 = tpu.memref_squeeze %206 : memref<1x!tpu.dma_semaphore, #tpu.memory_space<semaphore_mem>> -> memref<!tpu.dma_semaphore, #tpu.memory_space<semaphore_mem>>
    tpu.enqueue_dma source(%204 : memref<1x32xf32, #tpu.memory_space<any>>) target(%205 : memref<1x32xf32, #tpu.memory_space<vmem>>) target_semaphore(%207 : memref<!tpu.dma_semaphore, #tpu.memory_space<semaphore_mem>>)
    %c8_i32_152 = arith.constant 8 : i32
    %208 = arith.muli %arg0, %c8_i32_152 : i32
    %c2_i32_153 = arith.constant 2 : i32
    %209 = arith.addi %208, %c2_i32_153 : i32
    %210 = arith.index_cast %209 : i32 to index
    %c3_154 = arith.constant 3 : index
    %211 = memref.load %arg1[%210, %c3_154] : memref<16x8xi32, #tpu.memory_space<smem>>
    %c26_i32 = arith.constant 26 : i32
    %c0_i32_155 = arith.constant 0 : i32
    %212 = tpu.memref_slice %arg2[%211, %c0_i32_155] : memref<30x32xf32, #tpu.memory_space<any>> -> memref<1x32xf32, #tpu.memory_space<any>>
    %c26_i32_156 = arith.constant 26 : i32
    %c0_i32_157 = arith.constant 0 : i32
    %213 = tpu.memref_slice %arg6[%c26_i32_156, %c0_i32_157] : memref<64x32xf32, #tpu.memory_space<vmem>> -> memref<1x32xf32, #tpu.memory_space<vmem>>
    %214 = tpu.memref_slice %arg7[%c26_i32] : memref<64x!tpu.dma_semaphore, #tpu.memory_space<semaphore_mem>> -> memref<1x!tpu.dma_semaphore, #tpu.memory_space<semaphore_mem>>
    %215 = tpu.memref_squeeze %214 : memref<1x!tpu.dma_semaphore, #tpu.memory_space<semaphore_mem>> -> memref<!tpu.dma_semaphore, #tpu.memory_space<semaphore_mem>>
    tpu.enqueue_dma source(%212 : memref<1x32xf32, #tpu.memory_space<any>>) target(%213 : memref<1x32xf32, #tpu.memory_space<vmem>>) target_semaphore(%215 : memref<!tpu.dma_semaphore, #tpu.memory_space<semaphore_mem>>)
    %c8_i32_158 = arith.constant 8 : i32
    %216 = arith.muli %arg0, %c8_i32_158 : i32
    %c3_i32_159 = arith.constant 3 : i32
    %217 = arith.addi %216, %c3_i32_159 : i32
    %218 = arith.index_cast %217 : i32 to index
    %c3_160 = arith.constant 3 : index
    %219 = memref.load %arg1[%218, %c3_160] : memref<16x8xi32, #tpu.memory_space<smem>>
    %c27_i32 = arith.constant 27 : i32
    %c0_i32_161 = arith.constant 0 : i32
    %220 = tpu.memref_slice %arg2[%219, %c0_i32_161] : memref<30x32xf32, #tpu.memory_space<any>> -> memref<1x32xf32, #tpu.memory_space<any>>
    %c27_i32_162 = arith.constant 27 : i32
    %c0_i32_163 = arith.constant 0 : i32
    %221 = tpu.memref_slice %arg6[%c27_i32_162, %c0_i32_163] : memref<64x32xf32, #tpu.memory_space<vmem>> -> memref<1x32xf32, #tpu.memory_space<vmem>>
    %222 = tpu.memref_slice %arg7[%c27_i32] : memref<64x!tpu.dma_semaphore, #tpu.memory_space<semaphore_mem>> -> memref<1x!tpu.dma_semaphore, #tpu.memory_space<semaphore_mem>>
    %223 = tpu.memref_squeeze %222 : memref<1x!tpu.dma_semaphore, #tpu.memory_space<semaphore_mem>> -> memref<!tpu.dma_semaphore, #tpu.memory_space<semaphore_mem>>
    tpu.enqueue_dma source(%220 : memref<1x32xf32, #tpu.memory_space<any>>) target(%221 : memref<1x32xf32, #tpu.memory_space<vmem>>) target_semaphore(%223 : memref<!tpu.dma_semaphore, #tpu.memory_space<semaphore_mem>>)
    %c8_i32_164 = arith.constant 8 : i32
    %224 = arith.muli %arg0, %c8_i32_164 : i32
    %c4_i32_165 = arith.constant 4 : i32
    %225 = arith.addi %224, %c4_i32_165 : i32
    %226 = arith.index_cast %225 : i32 to index
    %c3_166 = arith.constant 3 : index
    %227 = memref.load %arg1[%226, %c3_166] : memref<16x8xi32, #tpu.memory_space<smem>>
    %c28_i32 = arith.constant 28 : i32
    %c0_i32_167 = arith.constant 0 : i32
    %228 = tpu.memref_slice %arg2[%227, %c0_i32_167] : memref<30x32xf32, #tpu.memory_space<any>> -> memref<1x32xf32, #tpu.memory_space<any>>
    %c28_i32_168 = arith.constant 28 : i32
    %c0_i32_169 = arith.constant 0 : i32
    %229 = tpu.memref_slice %arg6[%c28_i32_168, %c0_i32_169] : memref<64x32xf32, #tpu.memory_space<vmem>> -> memref<1x32xf32, #tpu.memory_space<vmem>>
    %230 = tpu.memref_slice %arg7[%c28_i32] : memref<64x!tpu.dma_semaphore, #tpu.memory_space<semaphore_mem>> -> memref<1x!tpu.dma_semaphore, #tpu.memory_space<semaphore_mem>>
    %231 = tpu.memref_squeeze %230 : memref<1x!tpu.dma_semaphore, #tpu.memory_space<semaphore_mem>> -> memref<!tpu.dma_semaphore, #tpu.memory_space<semaphore_mem>>
    tpu.enqueue_dma source(%228 : memref<1x32xf32, #tpu.memory_space<any>>) target(%229 : memref<1x32xf32, #tpu.memory_space<vmem>>) target_semaphore(%231 : memref<!tpu.dma_semaphore, #tpu.memory_space<semaphore_mem>>)
    %c8_i32_170 = arith.constant 8 : i32
    %232 = arith.muli %arg0, %c8_i32_170 : i32
    %c5_i32_171 = arith.constant 5 : i32
    %233 = arith.addi %232, %c5_i32_171 : i32
    %234 = arith.index_cast %233 : i32 to index
    %c3_172 = arith.constant 3 : index
    %235 = memref.load %arg1[%234, %c3_172] : memref<16x8xi32, #tpu.memory_space<smem>>
    %c29_i32 = arith.constant 29 : i32
    %c0_i32_173 = arith.constant 0 : i32
    %236 = tpu.memref_slice %arg2[%235, %c0_i32_173] : memref<30x32xf32, #tpu.memory_space<any>> -> memref<1x32xf32, #tpu.memory_space<any>>
    %c29_i32_174 = arith.constant 29 : i32
    %c0_i32_175 = arith.constant 0 : i32
    %237 = tpu.memref_slice %arg6[%c29_i32_174, %c0_i32_175] : memref<64x32xf32, #tpu.memory_space<vmem>> -> memref<1x32xf32, #tpu.memory_space<vmem>>
    %238 = tpu.memref_slice %arg7[%c29_i32] : memref<64x!tpu.dma_semaphore, #tpu.memory_space<semaphore_mem>> -> memref<1x!tpu.dma_semaphore, #tpu.memory_space<semaphore_mem>>
    %239 = tpu.memref_squeeze %238 : memref<1x!tpu.dma_semaphore, #tpu.memory_space<semaphore_mem>> -> memref<!tpu.dma_semaphore, #tpu.memory_space<semaphore_mem>>
    tpu.enqueue_dma source(%236 : memref<1x32xf32, #tpu.memory_space<any>>) target(%237 : memref<1x32xf32, #tpu.memory_space<vmem>>) target_semaphore(%239 : memref<!tpu.dma_semaphore, #tpu.memory_space<semaphore_mem>>)
    %c8_i32_176 = arith.constant 8 : i32
    %240 = arith.muli %arg0, %c8_i32_176 : i32
    %c6_i32_177 = arith.constant 6 : i32
    %241 = arith.addi %240, %c6_i32_177 : i32
    %242 = arith.index_cast %241 : i32 to index
    %c3_178 = arith.constant 3 : index
    %243 = memref.load %arg1[%242, %c3_178] : memref<16x8xi32, #tpu.memory_space<smem>>
    %c30_i32 = arith.constant 30 : i32
    %c0_i32_179 = arith.constant 0 : i32
    %244 = tpu.memref_slice %arg2[%243, %c0_i32_179] : memref<30x32xf32, #tpu.memory_space<any>> -> memref<1x32xf32, #tpu.memory_space<any>>
    %c30_i32_180 = arith.constant 30 : i32
    %c0_i32_181 = arith.constant 0 : i32
    %245 = tpu.memref_slice %arg6[%c30_i32_180, %c0_i32_181] : memref<64x32xf32, #tpu.memory_space<vmem>> -> memref<1x32xf32, #tpu.memory_space<vmem>>
    %246 = tpu.memref_slice %arg7[%c30_i32] : memref<64x!tpu.dma_semaphore, #tpu.memory_space<semaphore_mem>> -> memref<1x!tpu.dma_semaphore, #tpu.memory_space<semaphore_mem>>
    %247 = tpu.memref_squeeze %246 : memref<1x!tpu.dma_semaphore, #tpu.memory_space<semaphore_mem>> -> memref<!tpu.dma_semaphore, #tpu.memory_space<semaphore_mem>>
    tpu.enqueue_dma source(%244 : memref<1x32xf32, #tpu.memory_space<any>>) target(%245 : memref<1x32xf32, #tpu.memory_space<vmem>>) target_semaphore(%247 : memref<!tpu.dma_semaphore, #tpu.memory_space<semaphore_mem>>)
    %c8_i32_182 = arith.constant 8 : i32
    %248 = arith.muli %arg0, %c8_i32_182 : i32
    %c7_i32_183 = arith.constant 7 : i32
    %249 = arith.addi %248, %c7_i32_183 : i32
    %250 = arith.index_cast %249 : i32 to index
    %c3_184 = arith.constant 3 : index
    %251 = memref.load %arg1[%250, %c3_184] : memref<16x8xi32, #tpu.memory_space<smem>>
    %c31_i32 = arith.constant 31 : i32
    %c0_i32_185 = arith.constant 0 : i32
    %252 = tpu.memref_slice %arg2[%251, %c0_i32_185] : memref<30x32xf32, #tpu.memory_space<any>> -> memref<1x32xf32, #tpu.memory_space<any>>
    %c31_i32_186 = arith.constant 31 : i32
    %c0_i32_187 = arith.constant 0 : i32
    %253 = tpu.memref_slice %arg6[%c31_i32_186, %c0_i32_187] : memref<64x32xf32, #tpu.memory_space<vmem>> -> memref<1x32xf32, #tpu.memory_space<vmem>>
    %254 = tpu.memref_slice %arg7[%c31_i32] : memref<64x!tpu.dma_semaphore, #tpu.memory_space<semaphore_mem>> -> memref<1x!tpu.dma_semaphore, #tpu.memory_space<semaphore_mem>>
    %255 = tpu.memref_squeeze %254 : memref<1x!tpu.dma_semaphore, #tpu.memory_space<semaphore_mem>> -> memref<!tpu.dma_semaphore, #tpu.memory_space<semaphore_mem>>
    tpu.enqueue_dma source(%252 : memref<1x32xf32, #tpu.memory_space<any>>) target(%253 : memref<1x32xf32, #tpu.memory_space<vmem>>) target_semaphore(%255 : memref<!tpu.dma_semaphore, #tpu.memory_space<semaphore_mem>>)
    %c8_i32_188 = arith.constant 8 : i32
    %256 = arith.muli %arg0, %c8_i32_188 : i32
    %c0_i32_189 = arith.constant 0 : i32
    %257 = arith.addi %256, %c0_i32_189 : i32
    %258 = arith.index_cast %257 : i32 to index
    %c4 = arith.constant 4 : index
    %259 = memref.load %arg1[%258, %c4] : memref<16x8xi32, #tpu.memory_space<smem>>
    %c32_i32 = arith.constant 32 : i32
    %c0_i32_190 = arith.constant 0 : i32
    %260 = tpu.memref_slice %arg2[%259, %c0_i32_190] : memref<30x32xf32, #tpu.memory_space<any>> -> memref<1x32xf32, #tpu.memory_space<any>>
    %c32_i32_191 = arith.constant 32 : i32
    %c0_i32_192 = arith.constant 0 : i32
    %261 = tpu.memref_slice %arg6[%c32_i32_191, %c0_i32_192] : memref<64x32xf32, #tpu.memory_space<vmem>> -> memref<1x32xf32, #tpu.memory_space<vmem>>
    %262 = tpu.memref_slice %arg7[%c32_i32] : memref<64x!tpu.dma_semaphore, #tpu.memory_space<semaphore_mem>> -> memref<1x!tpu.dma_semaphore, #tpu.memory_space<semaphore_mem>>
    %263 = tpu.memref_squeeze %262 : memref<1x!tpu.dma_semaphore, #tpu.memory_space<semaphore_mem>> -> memref<!tpu.dma_semaphore, #tpu.memory_space<semaphore_mem>>
    tpu.enqueue_dma source(%260 : memref<1x32xf32, #tpu.memory_space<any>>) target(%261 : memref<1x32xf32, #tpu.memory_space<vmem>>) target_semaphore(%263 : memref<!tpu.dma_semaphore, #tpu.memory_space<semaphore_mem>>)
    %c8_i32_193 = arith.constant 8 : i32
    %264 = arith.muli %arg0, %c8_i32_193 : i32
    %c1_i32_194 = arith.constant 1 : i32
    %265 = arith.addi %264, %c1_i32_194 : i32
    %266 = arith.index_cast %265 : i32 to index
    %c4_195 = arith.constant 4 : index
    %267 = memref.load %arg1[%266, %c4_195] : memref<16x8xi32, #tpu.memory_space<smem>>
    %c33_i32 = arith.constant 33 : i32
    %c0_i32_196 = arith.constant 0 : i32
    %268 = tpu.memref_slice %arg2[%267, %c0_i32_196] : memref<30x32xf32, #tpu.memory_space<any>> -> memref<1x32xf32, #tpu.memory_space<any>>
    %c33_i32_197 = arith.constant 33 : i32
    %c0_i32_198 = arith.constant 0 : i32
    %269 = tpu.memref_slice %arg6[%c33_i32_197, %c0_i32_198] : memref<64x32xf32, #tpu.memory_space<vmem>> -> memref<1x32xf32, #tpu.memory_space<vmem>>
    %270 = tpu.memref_slice %arg7[%c33_i32] : memref<64x!tpu.dma_semaphore, #tpu.memory_space<semaphore_mem>> -> memref<1x!tpu.dma_semaphore, #tpu.memory_space<semaphore_mem>>
    %271 = tpu.memref_squeeze %270 : memref<1x!tpu.dma_semaphore, #tpu.memory_space<semaphore_mem>> -> memref<!tpu.dma_semaphore, #tpu.memory_space<semaphore_mem>>
    tpu.enqueue_dma source(%268 : memref<1x32xf32, #tpu.memory_space<any>>) target(%269 : memref<1x32xf32, #tpu.memory_space<vmem>>) target_semaphore(%271 : memref<!tpu.dma_semaphore, #tpu.memory_space<semaphore_mem>>)
    %c8_i32_199 = arith.constant 8 : i32
    %272 = arith.muli %arg0, %c8_i32_199 : i32
    %c2_i32_200 = arith.constant 2 : i32
    %273 = arith.addi %272, %c2_i32_200 : i32
    %274 = arith.index_cast %273 : i32 to index
    %c4_201 = arith.constant 4 : index
    %275 = memref.load %arg1[%274, %c4_201] : memref<16x8xi32, #tpu.memory_space<smem>>
    %c34_i32 = arith.constant 34 : i32
    %c0_i32_202 = arith.constant 0 : i32
    %276 = tpu.memref_slice %arg2[%275, %c0_i32_202] : memref<30x32xf32, #tpu.memory_space<any>> -> memref<1x32xf32, #tpu.memory_space<any>>
    %c34_i32_203 = arith.constant 34 : i32
    %c0_i32_204 = arith.constant 0 : i32
    %277 = tpu.memref_slice %arg6[%c34_i32_203, %c0_i32_204] : memref<64x32xf32, #tpu.memory_space<vmem>> -> memref<1x32xf32, #tpu.memory_space<vmem>>
    %278 = tpu.memref_slice %arg7[%c34_i32] : memref<64x!tpu.dma_semaphore, #tpu.memory_space<semaphore_mem>> -> memref<1x!tpu.dma_semaphore, #tpu.memory_space<semaphore_mem>>
    %279 = tpu.memref_squeeze %278 : memref<1x!tpu.dma_semaphore, #tpu.memory_space<semaphore_mem>> -> memref<!tpu.dma_semaphore, #tpu.memory_space<semaphore_mem>>
    tpu.enqueue_dma source(%276 : memref<1x32xf32, #tpu.memory_space<any>>) target(%277 : memref<1x32xf32, #tpu.memory_space<vmem>>) target_semaphore(%279 : memref<!tpu.dma_semaphore, #tpu.memory_space<semaphore_mem>>)
    %c8_i32_205 = arith.constant 8 : i32
    %280 = arith.muli %arg0, %c8_i32_205 : i32
    %c3_i32_206 = arith.constant 3 : i32
    %281 = arith.addi %280, %c3_i32_206 : i32
    %282 = arith.index_cast %281 : i32 to index
    %c4_207 = arith.constant 4 : index
    %283 = memref.load %arg1[%282, %c4_207] : memref<16x8xi32, #tpu.memory_space<smem>>
    %c35_i32 = arith.constant 35 : i32
    %c0_i32_208 = arith.constant 0 : i32
    %284 = tpu.memref_slice %arg2[%283, %c0_i32_208] : memref<30x32xf32, #tpu.memory_space<any>> -> memref<1x32xf32, #tpu.memory_space<any>>
    %c35_i32_209 = arith.constant 35 : i32
    %c0_i32_210 = arith.constant 0 : i32
    %285 = tpu.memref_slice %arg6[%c35_i32_209, %c0_i32_210] : memref<64x32xf32, #tpu.memory_space<vmem>> -> memref<1x32xf32, #tpu.memory_space<vmem>>
    %286 = tpu.memref_slice %arg7[%c35_i32] : memref<64x!tpu.dma_semaphore, #tpu.memory_space<semaphore_mem>> -> memref<1x!tpu.dma_semaphore, #tpu.memory_space<semaphore_mem>>
    %287 = tpu.memref_squeeze %286 : memref<1x!tpu.dma_semaphore, #tpu.memory_space<semaphore_mem>> -> memref<!tpu.dma_semaphore, #tpu.memory_space<semaphore_mem>>
    tpu.enqueue_dma source(%284 : memref<1x32xf32, #tpu.memory_space<any>>) target(%285 : memref<1x32xf32, #tpu.memory_space<vmem>>) target_semaphore(%287 : memref<!tpu.dma_semaphore, #tpu.memory_space<semaphore_mem>>)
    %c8_i32_211 = arith.constant 8 : i32
    %288 = arith.muli %arg0, %c8_i32_211 : i32
    %c4_i32_212 = arith.constant 4 : i32
    %289 = arith.addi %288, %c4_i32_212 : i32
    %290 = arith.index_cast %289 : i32 to index
    %c4_213 = arith.constant 4 : index
    %291 = memref.load %arg1[%290, %c4_213] : memref<16x8xi32, #tpu.memory_space<smem>>
    %c36_i32 = arith.constant 36 : i32
    %c0_i32_214 = arith.constant 0 : i32
    %292 = tpu.memref_slice %arg2[%291, %c0_i32_214] : memref<30x32xf32, #tpu.memory_space<any>> -> memref<1x32xf32, #tpu.memory_space<any>>
    %c36_i32_215 = arith.constant 36 : i32
    %c0_i32_216 = arith.constant 0 : i32
    %293 = tpu.memref_slice %arg6[%c36_i32_215, %c0_i32_216] : memref<64x32xf32, #tpu.memory_space<vmem>> -> memref<1x32xf32, #tpu.memory_space<vmem>>
    %294 = tpu.memref_slice %arg7[%c36_i32] : memref<64x!tpu.dma_semaphore, #tpu.memory_space<semaphore_mem>> -> memref<1x!tpu.dma_semaphore, #tpu.memory_space<semaphore_mem>>
    %295 = tpu.memref_squeeze %294 : memref<1x!tpu.dma_semaphore, #tpu.memory_space<semaphore_mem>> -> memref<!tpu.dma_semaphore, #tpu.memory_space<semaphore_mem>>
    tpu.enqueue_dma source(%292 : memref<1x32xf32, #tpu.memory_space<any>>) target(%293 : memref<1x32xf32, #tpu.memory_space<vmem>>) target_semaphore(%295 : memref<!tpu.dma_semaphore, #tpu.memory_space<semaphore_mem>>)
    %c8_i32_217 = arith.constant 8 : i32
    %296 = arith.muli %arg0, %c8_i32_217 : i32
    %c5_i32_218 = arith.constant 5 : i32
    %297 = arith.addi %296, %c5_i32_218 : i32
    %298 = arith.index_cast %297 : i32 to index
    %c4_219 = arith.constant 4 : index
    %299 = memref.load %arg1[%298, %c4_219] : memref<16x8xi32, #tpu.memory_space<smem>>
    %c37_i32 = arith.constant 37 : i32
    %c0_i32_220 = arith.constant 0 : i32
    %300 = tpu.memref_slice %arg2[%299, %c0_i32_220] : memref<30x32xf32, #tpu.memory_space<any>> -> memref<1x32xf32, #tpu.memory_space<any>>
    %c37_i32_221 = arith.constant 37 : i32
    %c0_i32_222 = arith.constant 0 : i32
    %301 = tpu.memref_slice %arg6[%c37_i32_221, %c0_i32_222] : memref<64x32xf32, #tpu.memory_space<vmem>> -> memref<1x32xf32, #tpu.memory_space<vmem>>
    %302 = tpu.memref_slice %arg7[%c37_i32] : memref<64x!tpu.dma_semaphore, #tpu.memory_space<semaphore_mem>> -> memref<1x!tpu.dma_semaphore, #tpu.memory_space<semaphore_mem>>
    %303 = tpu.memref_squeeze %302 : memref<1x!tpu.dma_semaphore, #tpu.memory_space<semaphore_mem>> -> memref<!tpu.dma_semaphore, #tpu.memory_space<semaphore_mem>>
    tpu.enqueue_dma source(%300 : memref<1x32xf32, #tpu.memory_space<any>>) target(%301 : memref<1x32xf32, #tpu.memory_space<vmem>>) target_semaphore(%303 : memref<!tpu.dma_semaphore, #tpu.memory_space<semaphore_mem>>)
    %c8_i32_223 = arith.constant 8 : i32
    %304 = arith.muli %arg0, %c8_i32_223 : i32
    %c6_i32_224 = arith.constant 6 : i32
    %305 = arith.addi %304, %c6_i32_224 : i32
    %306 = arith.index_cast %305 : i32 to index
    %c4_225 = arith.constant 4 : index
    %307 = memref.load %arg1[%306, %c4_225] : memref<16x8xi32, #tpu.memory_space<smem>>
    %c38_i32 = arith.constant 38 : i32
    %c0_i32_226 = arith.constant 0 : i32
    %308 = tpu.memref_slice %arg2[%307, %c0_i32_226] : memref<30x32xf32, #tpu.memory_space<any>> -> memref<1x32xf32, #tpu.memory_space<any>>
    %c38_i32_227 = arith.constant 38 : i32
    %c0_i32_228 = arith.constant 0 : i32
    %309 = tpu.memref_slice %arg6[%c38_i32_227, %c0_i32_228] : memref<64x32xf32, #tpu.memory_space<vmem>> -> memref<1x32xf32, #tpu.memory_space<vmem>>
    %310 = tpu.memref_slice %arg7[%c38_i32] : memref<64x!tpu.dma_semaphore, #tpu.memory_space<semaphore_mem>> -> memref<1x!tpu.dma_semaphore, #tpu.memory_space<semaphore_mem>>
    %311 = tpu.memref_squeeze %310 : memref<1x!tpu.dma_semaphore, #tpu.memory_space<semaphore_mem>> -> memref<!tpu.dma_semaphore, #tpu.memory_space<semaphore_mem>>
    tpu.enqueue_dma source(%308 : memref<1x32xf32, #tpu.memory_space<any>>) target(%309 : memref<1x32xf32, #tpu.memory_space<vmem>>) target_semaphore(%311 : memref<!tpu.dma_semaphore, #tpu.memory_space<semaphore_mem>>)
    %c8_i32_229 = arith.constant 8 : i32
    %312 = arith.muli %arg0, %c8_i32_229 : i32
    %c7_i32_230 = arith.constant 7 : i32
    %313 = arith.addi %312, %c7_i32_230 : i32
    %314 = arith.index_cast %313 : i32 to index
    %c4_231 = arith.constant 4 : index
    %315 = memref.load %arg1[%314, %c4_231] : memref<16x8xi32, #tpu.memory_space<smem>>
    %c39_i32 = arith.constant 39 : i32
    %c0_i32_232 = arith.constant 0 : i32
    %316 = tpu.memref_slice %arg2[%315, %c0_i32_232] : memref<30x32xf32, #tpu.memory_space<any>> -> memref<1x32xf32, #tpu.memory_space<any>>
    %c39_i32_233 = arith.constant 39 : i32
    %c0_i32_234 = arith.constant 0 : i32
    %317 = tpu.memref_slice %arg6[%c39_i32_233, %c0_i32_234] : memref<64x32xf32, #tpu.memory_space<vmem>> -> memref<1x32xf32, #tpu.memory_space<vmem>>
    %318 = tpu.memref_slice %arg7[%c39_i32] : memref<64x!tpu.dma_semaphore, #tpu.memory_space<semaphore_mem>> -> memref<1x!tpu.dma_semaphore, #tpu.memory_space<semaphore_mem>>
    %319 = tpu.memref_squeeze %318 : memref<1x!tpu.dma_semaphore, #tpu.memory_space<semaphore_mem>> -> memref<!tpu.dma_semaphore, #tpu.memory_space<semaphore_mem>>
    tpu.enqueue_dma source(%316 : memref<1x32xf32, #tpu.memory_space<any>>) target(%317 : memref<1x32xf32, #tpu.memory_space<vmem>>) target_semaphore(%319 : memref<!tpu.dma_semaphore, #tpu.memory_space<semaphore_mem>>)
    %c8_i32_235 = arith.constant 8 : i32
    %320 = arith.muli %arg0, %c8_i32_235 : i32
    %c0_i32_236 = arith.constant 0 : i32
    %321 = arith.addi %320, %c0_i32_236 : i32
    %322 = arith.index_cast %321 : i32 to index
    %c5 = arith.constant 5 : index
    %323 = memref.load %arg1[%322, %c5] : memref<16x8xi32, #tpu.memory_space<smem>>
    %c40_i32 = arith.constant 40 : i32
    %c0_i32_237 = arith.constant 0 : i32
    %324 = tpu.memref_slice %arg2[%323, %c0_i32_237] : memref<30x32xf32, #tpu.memory_space<any>> -> memref<1x32xf32, #tpu.memory_space<any>>
    %c40_i32_238 = arith.constant 40 : i32
    %c0_i32_239 = arith.constant 0 : i32
    %325 = tpu.memref_slice %arg6[%c40_i32_238, %c0_i32_239] : memref<64x32xf32, #tpu.memory_space<vmem>> -> memref<1x32xf32, #tpu.memory_space<vmem>>
    %326 = tpu.memref_slice %arg7[%c40_i32] : memref<64x!tpu.dma_semaphore, #tpu.memory_space<semaphore_mem>> -> memref<1x!tpu.dma_semaphore, #tpu.memory_space<semaphore_mem>>
    %327 = tpu.memref_squeeze %326 : memref<1x!tpu.dma_semaphore, #tpu.memory_space<semaphore_mem>> -> memref<!tpu.dma_semaphore, #tpu.memory_space<semaphore_mem>>
    tpu.enqueue_dma source(%324 : memref<1x32xf32, #tpu.memory_space<any>>) target(%325 : memref<1x32xf32, #tpu.memory_space<vmem>>) target_semaphore(%327 : memref<!tpu.dma_semaphore, #tpu.memory_space<semaphore_mem>>)
    %c8_i32_240 = arith.constant 8 : i32
    %328 = arith.muli %arg0, %c8_i32_240 : i32
    %c1_i32_241 = arith.constant 1 : i32
    %329 = arith.addi %328, %c1_i32_241 : i32
    %330 = arith.index_cast %329 : i32 to index
    %c5_242 = arith.constant 5 : index
    %331 = memref.load %arg1[%330, %c5_242] : memref<16x8xi32, #tpu.memory_space<smem>>
    %c41_i32 = arith.constant 41 : i32
    %c0_i32_243 = arith.constant 0 : i32
    %332 = tpu.memref_slice %arg2[%331, %c0_i32_243] : memref<30x32xf32, #tpu.memory_space<any>> -> memref<1x32xf32, #tpu.memory_space<any>>
    %c41_i32_244 = arith.constant 41 : i32
    %c0_i32_245 = arith.constant 0 : i32
    %333 = tpu.memref_slice %arg6[%c41_i32_244, %c0_i32_245] : memref<64x32xf32, #tpu.memory_space<vmem>> -> memref<1x32xf32, #tpu.memory_space<vmem>>
    %334 = tpu.memref_slice %arg7[%c41_i32] : memref<64x!tpu.dma_semaphore, #tpu.memory_space<semaphore_mem>> -> memref<1x!tpu.dma_semaphore, #tpu.memory_space<semaphore_mem>>
    %335 = tpu.memref_squeeze %334 : memref<1x!tpu.dma_semaphore, #tpu.memory_space<semaphore_mem>> -> memref<!tpu.dma_semaphore, #tpu.memory_space<semaphore_mem>>
    tpu.enqueue_dma source(%332 : memref<1x32xf32, #tpu.memory_space<any>>) target(%333 : memref<1x32xf32, #tpu.memory_space<vmem>>) target_semaphore(%335 : memref<!tpu.dma_semaphore, #tpu.memory_space<semaphore_mem>>)
    %c8_i32_246 = arith.constant 8 : i32
    %336 = arith.muli %arg0, %c8_i32_246 : i32
    %c2_i32_247 = arith.constant 2 : i32
    %337 = arith.addi %336, %c2_i32_247 : i32
    %338 = arith.index_cast %337 : i32 to index
    %c5_248 = arith.constant 5 : index
    %339 = memref.load %arg1[%338, %c5_248] : memref<16x8xi32, #tpu.memory_space<smem>>
    %c42_i32 = arith.constant 42 : i32
    %c0_i32_249 = arith.constant 0 : i32
    %340 = tpu.memref_slice %arg2[%339, %c0_i32_249] : memref<30x32xf32, #tpu.memory_space<any>> -> memref<1x32xf32, #tpu.memory_space<any>>
    %c42_i32_250 = arith.constant 42 : i32
    %c0_i32_251 = arith.constant 0 : i32
    %341 = tpu.memref_slice %arg6[%c42_i32_250, %c0_i32_251] : memref<64x32xf32, #tpu.memory_space<vmem>> -> memref<1x32xf32, #tpu.memory_space<vmem>>
    %342 = tpu.memref_slice %arg7[%c42_i32] : memref<64x!tpu.dma_semaphore, #tpu.memory_space<semaphore_mem>> -> memref<1x!tpu.dma_semaphore, #tpu.memory_space<semaphore_mem>>
    %343 = tpu.memref_squeeze %342 : memref<1x!tpu.dma_semaphore, #tpu.memory_space<semaphore_mem>> -> memref<!tpu.dma_semaphore, #tpu.memory_space<semaphore_mem>>
    tpu.enqueue_dma source(%340 : memref<1x32xf32, #tpu.memory_space<any>>) target(%341 : memref<1x32xf32, #tpu.memory_space<vmem>>) target_semaphore(%343 : memref<!tpu.dma_semaphore, #tpu.memory_space<semaphore_mem>>)
    %c8_i32_252 = arith.constant 8 : i32
    %344 = arith.muli %arg0, %c8_i32_252 : i32
    %c3_i32_253 = arith.constant 3 : i32
    %345 = arith.addi %344, %c3_i32_253 : i32
    %346 = arith.index_cast %345 : i32 to index
    %c5_254 = arith.constant 5 : index
    %347 = memref.load %arg1[%346, %c5_254] : memref<16x8xi32, #tpu.memory_space<smem>>
    %c43_i32 = arith.constant 43 : i32
    %c0_i32_255 = arith.constant 0 : i32
    %348 = tpu.memref_slice %arg2[%347, %c0_i32_255] : memref<30x32xf32, #tpu.memory_space<any>> -> memref<1x32xf32, #tpu.memory_space<any>>
    %c43_i32_256 = arith.constant 43 : i32
    %c0_i32_257 = arith.constant 0 : i32
    %349 = tpu.memref_slice %arg6[%c43_i32_256, %c0_i32_257] : memref<64x32xf32, #tpu.memory_space<vmem>> -> memref<1x32xf32, #tpu.memory_space<vmem>>
    %350 = tpu.memref_slice %arg7[%c43_i32] : memref<64x!tpu.dma_semaphore, #tpu.memory_space<semaphore_mem>> -> memref<1x!tpu.dma_semaphore, #tpu.memory_space<semaphore_mem>>
    %351 = tpu.memref_squeeze %350 : memref<1x!tpu.dma_semaphore, #tpu.memory_space<semaphore_mem>> -> memref<!tpu.dma_semaphore, #tpu.memory_space<semaphore_mem>>
    tpu.enqueue_dma source(%348 : memref<1x32xf32, #tpu.memory_space<any>>) target(%349 : memref<1x32xf32, #tpu.memory_space<vmem>>) target_semaphore(%351 : memref<!tpu.dma_semaphore, #tpu.memory_space<semaphore_mem>>)
    %c8_i32_258 = arith.constant 8 : i32
    %352 = arith.muli %arg0, %c8_i32_258 : i32
    %c4_i32_259 = arith.constant 4 : i32
    %353 = arith.addi %352, %c4_i32_259 : i32
    %354 = arith.index_cast %353 : i32 to index
    %c5_260 = arith.constant 5 : index
    %355 = memref.load %arg1[%354, %c5_260] : memref<16x8xi32, #tpu.memory_space<smem>>
    %c44_i32 = arith.constant 44 : i32
    %c0_i32_261 = arith.constant 0 : i32
    %356 = tpu.memref_slice %arg2[%355, %c0_i32_261] : memref<30x32xf32, #tpu.memory_space<any>> -> memref<1x32xf32, #tpu.memory_space<any>>
    %c44_i32_262 = arith.constant 44 : i32
    %c0_i32_263 = arith.constant 0 : i32
    %357 = tpu.memref_slice %arg6[%c44_i32_262, %c0_i32_263] : memref<64x32xf32, #tpu.memory_space<vmem>> -> memref<1x32xf32, #tpu.memory_space<vmem>>
    %358 = tpu.memref_slice %arg7[%c44_i32] : memref<64x!tpu.dma_semaphore, #tpu.memory_space<semaphore_mem>> -> memref<1x!tpu.dma_semaphore, #tpu.memory_space<semaphore_mem>>
    %359 = tpu.memref_squeeze %358 : memref<1x!tpu.dma_semaphore, #tpu.memory_space<semaphore_mem>> -> memref<!tpu.dma_semaphore, #tpu.memory_space<semaphore_mem>>
    tpu.enqueue_dma source(%356 : memref<1x32xf32, #tpu.memory_space<any>>) target(%357 : memref<1x32xf32, #tpu.memory_space<vmem>>) target_semaphore(%359 : memref<!tpu.dma_semaphore, #tpu.memory_space<semaphore_mem>>)
    %c8_i32_264 = arith.constant 8 : i32
    %360 = arith.muli %arg0, %c8_i32_264 : i32
    %c5_i32_265 = arith.constant 5 : i32
    %361 = arith.addi %360, %c5_i32_265 : i32
    %362 = arith.index_cast %361 : i32 to index
    %c5_266 = arith.constant 5 : index
    %363 = memref.load %arg1[%362, %c5_266] : memref<16x8xi32, #tpu.memory_space<smem>>
    %c45_i32 = arith.constant 45 : i32
    %c0_i32_267 = arith.constant 0 : i32
    %364 = tpu.memref_slice %arg2[%363, %c0_i32_267] : memref<30x32xf32, #tpu.memory_space<any>> -> memref<1x32xf32, #tpu.memory_space<any>>
    %c45_i32_268 = arith.constant 45 : i32
    %c0_i32_269 = arith.constant 0 : i32
    %365 = tpu.memref_slice %arg6[%c45_i32_268, %c0_i32_269] : memref<64x32xf32, #tpu.memory_space<vmem>> -> memref<1x32xf32, #tpu.memory_space<vmem>>
    %366 = tpu.memref_slice %arg7[%c45_i32] : memref<64x!tpu.dma_semaphore, #tpu.memory_space<semaphore_mem>> -> memref<1x!tpu.dma_semaphore, #tpu.memory_space<semaphore_mem>>
    %367 = tpu.memref_squeeze %366 : memref<1x!tpu.dma_semaphore, #tpu.memory_space<semaphore_mem>> -> memref<!tpu.dma_semaphore, #tpu.memory_space<semaphore_mem>>
    tpu.enqueue_dma source(%364 : memref<1x32xf32, #tpu.memory_space<any>>) target(%365 : memref<1x32xf32, #tpu.memory_space<vmem>>) target_semaphore(%367 : memref<!tpu.dma_semaphore, #tpu.memory_space<semaphore_mem>>)
    %c8_i32_270 = arith.constant 8 : i32
    %368 = arith.muli %arg0, %c8_i32_270 : i32
    %c6_i32_271 = arith.constant 6 : i32
    %369 = arith.addi %368, %c6_i32_271 : i32
    %370 = arith.index_cast %369 : i32 to index
    %c5_272 = arith.constant 5 : index
    %371 = memref.load %arg1[%370, %c5_272] : memref<16x8xi32, #tpu.memory_space<smem>>
    %c46_i32 = arith.constant 46 : i32
    %c0_i32_273 = arith.constant 0 : i32
    %372 = tpu.memref_slice %arg2[%371, %c0_i32_273] : memref<30x32xf32, #tpu.memory_space<any>> -> memref<1x32xf32, #tpu.memory_space<any>>
    %c46_i32_274 = arith.constant 46 : i32
    %c0_i32_275 = arith.constant 0 : i32
    %373 = tpu.memref_slice %arg6[%c46_i32_274, %c0_i32_275] : memref<64x32xf32, #tpu.memory_space<vmem>> -> memref<1x32xf32, #tpu.memory_space<vmem>>
    %374 = tpu.memref_slice %arg7[%c46_i32] : memref<64x!tpu.dma_semaphore, #tpu.memory_space<semaphore_mem>> -> memref<1x!tpu.dma_semaphore, #tpu.memory_space<semaphore_mem>>
    %375 = tpu.memref_squeeze %374 : memref<1x!tpu.dma_semaphore, #tpu.memory_space<semaphore_mem>> -> memref<!tpu.dma_semaphore, #tpu.memory_space<semaphore_mem>>
    tpu.enqueue_dma source(%372 : memref<1x32xf32, #tpu.memory_space<any>>) target(%373 : memref<1x32xf32, #tpu.memory_space<vmem>>) target_semaphore(%375 : memref<!tpu.dma_semaphore, #tpu.memory_space<semaphore_mem>>)
    %c8_i32_276 = arith.constant 8 : i32
    %376 = arith.muli %arg0, %c8_i32_276 : i32
    %c7_i32_277 = arith.constant 7 : i32
    %377 = arith.addi %376, %c7_i32_277 : i32
    %378 = arith.index_cast %377 : i32 to index
    %c5_278 = arith.constant 5 : index
    %379 = memref.load %arg1[%378, %c5_278] : memref<16x8xi32, #tpu.memory_space<smem>>
    %c47_i32 = arith.constant 47 : i32
    %c0_i32_279 = arith.constant 0 : i32
    %380 = tpu.memref_slice %arg2[%379, %c0_i32_279] : memref<30x32xf32, #tpu.memory_space<any>> -> memref<1x32xf32, #tpu.memory_space<any>>
    %c47_i32_280 = arith.constant 47 : i32
    %c0_i32_281 = arith.constant 0 : i32
    %381 = tpu.memref_slice %arg6[%c47_i32_280, %c0_i32_281] : memref<64x32xf32, #tpu.memory_space<vmem>> -> memref<1x32xf32, #tpu.memory_space<vmem>>
    %382 = tpu.memref_slice %arg7[%c47_i32] : memref<64x!tpu.dma_semaphore, #tpu.memory_space<semaphore_mem>> -> memref<1x!tpu.dma_semaphore, #tpu.memory_space<semaphore_mem>>
    %383 = tpu.memref_squeeze %382 : memref<1x!tpu.dma_semaphore, #tpu.memory_space<semaphore_mem>> -> memref<!tpu.dma_semaphore, #tpu.memory_space<semaphore_mem>>
    tpu.enqueue_dma source(%380 : memref<1x32xf32, #tpu.memory_space<any>>) target(%381 : memref<1x32xf32, #tpu.memory_space<vmem>>) target_semaphore(%383 : memref<!tpu.dma_semaphore, #tpu.memory_space<semaphore_mem>>)
    %c8_i32_282 = arith.constant 8 : i32
    %384 = arith.muli %arg0, %c8_i32_282 : i32
    %c0_i32_283 = arith.constant 0 : i32
    %385 = arith.addi %384, %c0_i32_283 : i32
    %386 = arith.index_cast %385 : i32 to index
    %c6 = arith.constant 6 : index
    %387 = memref.load %arg1[%386, %c6] : memref<16x8xi32, #tpu.memory_space<smem>>
    %c48_i32 = arith.constant 48 : i32
    %c0_i32_284 = arith.constant 0 : i32
    %388 = tpu.memref_slice %arg2[%387, %c0_i32_284] : memref<30x32xf32, #tpu.memory_space<any>> -> memref<1x32xf32, #tpu.memory_space<any>>
    %c48_i32_285 = arith.constant 48 : i32
    %c0_i32_286 = arith.constant 0 : i32
    %389 = tpu.memref_slice %arg6[%c48_i32_285, %c0_i32_286] : memref<64x32xf32, #tpu.memory_space<vmem>> -> memref<1x32xf32, #tpu.memory_space<vmem>>
    %390 = tpu.memref_slice %arg7[%c48_i32] : memref<64x!tpu.dma_semaphore, #tpu.memory_space<semaphore_mem>> -> memref<1x!tpu.dma_semaphore, #tpu.memory_space<semaphore_mem>>
    %391 = tpu.memref_squeeze %390 : memref<1x!tpu.dma_semaphore, #tpu.memory_space<semaphore_mem>> -> memref<!tpu.dma_semaphore, #tpu.memory_space<semaphore_mem>>
    tpu.enqueue_dma source(%388 : memref<1x32xf32, #tpu.memory_space<any>>) target(%389 : memref<1x32xf32, #tpu.memory_space<vmem>>) target_semaphore(%391 : memref<!tpu.dma_semaphore, #tpu.memory_space<semaphore_mem>>)
    %c8_i32_287 = arith.constant 8 : i32
    %392 = arith.muli %arg0, %c8_i32_287 : i32
    %c1_i32_288 = arith.constant 1 : i32
    %393 = arith.addi %392, %c1_i32_288 : i32
    %394 = arith.index_cast %393 : i32 to index
    %c6_289 = arith.constant 6 : index
    %395 = memref.load %arg1[%394, %c6_289] : memref<16x8xi32, #tpu.memory_space<smem>>
    %c49_i32 = arith.constant 49 : i32
    %c0_i32_290 = arith.constant 0 : i32
    %396 = tpu.memref_slice %arg2[%395, %c0_i32_290] : memref<30x32xf32, #tpu.memory_space<any>> -> memref<1x32xf32, #tpu.memory_space<any>>
    %c49_i32_291 = arith.constant 49 : i32
    %c0_i32_292 = arith.constant 0 : i32
    %397 = tpu.memref_slice %arg6[%c49_i32_291, %c0_i32_292] : memref<64x32xf32, #tpu.memory_space<vmem>> -> memref<1x32xf32, #tpu.memory_space<vmem>>
    %398 = tpu.memref_slice %arg7[%c49_i32] : memref<64x!tpu.dma_semaphore, #tpu.memory_space<semaphore_mem>> -> memref<1x!tpu.dma_semaphore, #tpu.memory_space<semaphore_mem>>
    %399 = tpu.memref_squeeze %398 : memref<1x!tpu.dma_semaphore, #tpu.memory_space<semaphore_mem>> -> memref<!tpu.dma_semaphore, #tpu.memory_space<semaphore_mem>>
    tpu.enqueue_dma source(%396 : memref<1x32xf32, #tpu.memory_space<any>>) target(%397 : memref<1x32xf32, #tpu.memory_space<vmem>>) target_semaphore(%399 : memref<!tpu.dma_semaphore, #tpu.memory_space<semaphore_mem>>)
    %c8_i32_293 = arith.constant 8 : i32
    %400 = arith.muli %arg0, %c8_i32_293 : i32
    %c2_i32_294 = arith.constant 2 : i32
    %401 = arith.addi %400, %c2_i32_294 : i32
    %402 = arith.index_cast %401 : i32 to index
    %c6_295 = arith.constant 6 : index
    %403 = memref.load %arg1[%402, %c6_295] : memref<16x8xi32, #tpu.memory_space<smem>>
    %c50_i32 = arith.constant 50 : i32
    %c0_i32_296 = arith.constant 0 : i32
    %404 = tpu.memref_slice %arg2[%403, %c0_i32_296] : memref<30x32xf32, #tpu.memory_space<any>> -> memref<1x32xf32, #tpu.memory_space<any>>
    %c50_i32_297 = arith.constant 50 : i32
    %c0_i32_298 = arith.constant 0 : i32
    %405 = tpu.memref_slice %arg6[%c50_i32_297, %c0_i32_298] : memref<64x32xf32, #tpu.memory_space<vmem>> -> memref<1x32xf32, #tpu.memory_space<vmem>>
    %406 = tpu.memref_slice %arg7[%c50_i32] : memref<64x!tpu.dma_semaphore, #tpu.memory_space<semaphore_mem>> -> memref<1x!tpu.dma_semaphore, #tpu.memory_space<semaphore_mem>>
    %407 = tpu.memref_squeeze %406 : memref<1x!tpu.dma_semaphore, #tpu.memory_space<semaphore_mem>> -> memref<!tpu.dma_semaphore, #tpu.memory_space<semaphore_mem>>
    tpu.enqueue_dma source(%404 : memref<1x32xf32, #tpu.memory_space<any>>) target(%405 : memref<1x32xf32, #tpu.memory_space<vmem>>) target_semaphore(%407 : memref<!tpu.dma_semaphore, #tpu.memory_space<semaphore_mem>>)
    %c8_i32_299 = arith.constant 8 : i32
    %408 = arith.muli %arg0, %c8_i32_299 : i32
    %c3_i32_300 = arith.constant 3 : i32
    %409 = arith.addi %408, %c3_i32_300 : i32
    %410 = arith.index_cast %409 : i32 to index
    %c6_301 = arith.constant 6 : index
    %411 = memref.load %arg1[%410, %c6_301] : memref<16x8xi32, #tpu.memory_space<smem>>
    %c51_i32 = arith.constant 51 : i32
    %c0_i32_302 = arith.constant 0 : i32
    %412 = tpu.memref_slice %arg2[%411, %c0_i32_302] : memref<30x32xf32, #tpu.memory_space<any>> -> memref<1x32xf32, #tpu.memory_space<any>>
    %c51_i32_303 = arith.constant 51 : i32
    %c0_i32_304 = arith.constant 0 : i32
    %413 = tpu.memref_slice %arg6[%c51_i32_303, %c0_i32_304] : memref<64x32xf32, #tpu.memory_space<vmem>> -> memref<1x32xf32, #tpu.memory_space<vmem>>
    %414 = tpu.memref_slice %arg7[%c51_i32] : memref<64x!tpu.dma_semaphore, #tpu.memory_space<semaphore_mem>> -> memref<1x!tpu.dma_semaphore, #tpu.memory_space<semaphore_mem>>
    %415 = tpu.memref_squeeze %414 : memref<1x!tpu.dma_semaphore, #tpu.memory_space<semaphore_mem>> -> memref<!tpu.dma_semaphore, #tpu.memory_space<semaphore_mem>>
    tpu.enqueue_dma source(%412 : memref<1x32xf32, #tpu.memory_space<any>>) target(%413 : memref<1x32xf32, #tpu.memory_space<vmem>>) target_semaphore(%415 : memref<!tpu.dma_semaphore, #tpu.memory_space<semaphore_mem>>)
    %c8_i32_305 = arith.constant 8 : i32
    %416 = arith.muli %arg0, %c8_i32_305 : i32
    %c4_i32_306 = arith.constant 4 : i32
    %417 = arith.addi %416, %c4_i32_306 : i32
    %418 = arith.index_cast %417 : i32 to index
    %c6_307 = arith.constant 6 : index
    %419 = memref.load %arg1[%418, %c6_307] : memref<16x8xi32, #tpu.memory_space<smem>>
    %c52_i32 = arith.constant 52 : i32
    %c0_i32_308 = arith.constant 0 : i32
    %420 = tpu.memref_slice %arg2[%419, %c0_i32_308] : memref<30x32xf32, #tpu.memory_space<any>> -> memref<1x32xf32, #tpu.memory_space<any>>
    %c52_i32_309 = arith.constant 52 : i32
    %c0_i32_310 = arith.constant 0 : i32
    %421 = tpu.memref_slice %arg6[%c52_i32_309, %c0_i32_310] : memref<64x32xf32, #tpu.memory_space<vmem>> -> memref<1x32xf32, #tpu.memory_space<vmem>>
    %422 = tpu.memref_slice %arg7[%c52_i32] : memref<64x!tpu.dma_semaphore, #tpu.memory_space<semaphore_mem>> -> memref<1x!tpu.dma_semaphore, #tpu.memory_space<semaphore_mem>>
    %423 = tpu.memref_squeeze %422 : memref<1x!tpu.dma_semaphore, #tpu.memory_space<semaphore_mem>> -> memref<!tpu.dma_semaphore, #tpu.memory_space<semaphore_mem>>
    tpu.enqueue_dma source(%420 : memref<1x32xf32, #tpu.memory_space<any>>) target(%421 : memref<1x32xf32, #tpu.memory_space<vmem>>) target_semaphore(%423 : memref<!tpu.dma_semaphore, #tpu.memory_space<semaphore_mem>>)
    %c8_i32_311 = arith.constant 8 : i32
    %424 = arith.muli %arg0, %c8_i32_311 : i32
    %c5_i32_312 = arith.constant 5 : i32
    %425 = arith.addi %424, %c5_i32_312 : i32
    %426 = arith.index_cast %425 : i32 to index
    %c6_313 = arith.constant 6 : index
    %427 = memref.load %arg1[%426, %c6_313] : memref<16x8xi32, #tpu.memory_space<smem>>
    %c53_i32 = arith.constant 53 : i32
    %c0_i32_314 = arith.constant 0 : i32
    %428 = tpu.memref_slice %arg2[%427, %c0_i32_314] : memref<30x32xf32, #tpu.memory_space<any>> -> memref<1x32xf32, #tpu.memory_space<any>>
    %c53_i32_315 = arith.constant 53 : i32
    %c0_i32_316 = arith.constant 0 : i32
    %429 = tpu.memref_slice %arg6[%c53_i32_315, %c0_i32_316] : memref<64x32xf32, #tpu.memory_space<vmem>> -> memref<1x32xf32, #tpu.memory_space<vmem>>
    %430 = tpu.memref_slice %arg7[%c53_i32] : memref<64x!tpu.dma_semaphore, #tpu.memory_space<semaphore_mem>> -> memref<1x!tpu.dma_semaphore, #tpu.memory_space<semaphore_mem>>
    %431 = tpu.memref_squeeze %430 : memref<1x!tpu.dma_semaphore, #tpu.memory_space<semaphore_mem>> -> memref<!tpu.dma_semaphore, #tpu.memory_space<semaphore_mem>>
    tpu.enqueue_dma source(%428 : memref<1x32xf32, #tpu.memory_space<any>>) target(%429 : memref<1x32xf32, #tpu.memory_space<vmem>>) target_semaphore(%431 : memref<!tpu.dma_semaphore, #tpu.memory_space<semaphore_mem>>)
    %c8_i32_317 = arith.constant 8 : i32
    %432 = arith.muli %arg0, %c8_i32_317 : i32
    %c6_i32_318 = arith.constant 6 : i32
    %433 = arith.addi %432, %c6_i32_318 : i32
    %434 = arith.index_cast %433 : i32 to index
    %c6_319 = arith.constant 6 : index
    %435 = memref.load %arg1[%434, %c6_319] : memref<16x8xi32, #tpu.memory_space<smem>>
    %c54_i32 = arith.constant 54 : i32
    %c0_i32_320 = arith.constant 0 : i32
    %436 = tpu.memref_slice %arg2[%435, %c0_i32_320] : memref<30x32xf32, #tpu.memory_space<any>> -> memref<1x32xf32, #tpu.memory_space<any>>
    %c54_i32_321 = arith.constant 54 : i32
    %c0_i32_322 = arith.constant 0 : i32
    %437 = tpu.memref_slice %arg6[%c54_i32_321, %c0_i32_322] : memref<64x32xf32, #tpu.memory_space<vmem>> -> memref<1x32xf32, #tpu.memory_space<vmem>>
    %438 = tpu.memref_slice %arg7[%c54_i32] : memref<64x!tpu.dma_semaphore, #tpu.memory_space<semaphore_mem>> -> memref<1x!tpu.dma_semaphore, #tpu.memory_space<semaphore_mem>>
    %439 = tpu.memref_squeeze %438 : memref<1x!tpu.dma_semaphore, #tpu.memory_space<semaphore_mem>> -> memref<!tpu.dma_semaphore, #tpu.memory_space<semaphore_mem>>
    tpu.enqueue_dma source(%436 : memref<1x32xf32, #tpu.memory_space<any>>) target(%437 : memref<1x32xf32, #tpu.memory_space<vmem>>) target_semaphore(%439 : memref<!tpu.dma_semaphore, #tpu.memory_space<semaphore_mem>>)
    %c8_i32_323 = arith.constant 8 : i32
    %440 = arith.muli %arg0, %c8_i32_323 : i32
    %c7_i32_324 = arith.constant 7 : i32
    %441 = arith.addi %440, %c7_i32_324 : i32
    %442 = arith.index_cast %441 : i32 to index
    %c6_325 = arith.constant 6 : index
    %443 = memref.load %arg1[%442, %c6_325] : memref<16x8xi32, #tpu.memory_space<smem>>
    %c55_i32 = arith.constant 55 : i32
    %c0_i32_326 = arith.constant 0 : i32
    %444 = tpu.memref_slice %arg2[%443, %c0_i32_326] : memref<30x32xf32, #tpu.memory_space<any>> -> memref<1x32xf32, #tpu.memory_space<any>>
    %c55_i32_327 = arith.constant 55 : i32
    %c0_i32_328 = arith.constant 0 : i32
    %445 = tpu.memref_slice %arg6[%c55_i32_327, %c0_i32_328] : memref<64x32xf32, #tpu.memory_space<vmem>> -> memref<1x32xf32, #tpu.memory_space<vmem>>
    %446 = tpu.memref_slice %arg7[%c55_i32] : memref<64x!tpu.dma_semaphore, #tpu.memory_space<semaphore_mem>> -> memref<1x!tpu.dma_semaphore, #tpu.memory_space<semaphore_mem>>
    %447 = tpu.memref_squeeze %446 : memref<1x!tpu.dma_semaphore, #tpu.memory_space<semaphore_mem>> -> memref<!tpu.dma_semaphore, #tpu.memory_space<semaphore_mem>>
    tpu.enqueue_dma source(%444 : memref<1x32xf32, #tpu.memory_space<any>>) target(%445 : memref<1x32xf32, #tpu.memory_space<vmem>>) target_semaphore(%447 : memref<!tpu.dma_semaphore, #tpu.memory_space<semaphore_mem>>)
    %c8_i32_329 = arith.constant 8 : i32
    %448 = arith.muli %arg0, %c8_i32_329 : i32
    %c0_i32_330 = arith.constant 0 : i32
    %449 = arith.addi %448, %c0_i32_330 : i32
    %450 = arith.index_cast %449 : i32 to index
    %c7 = arith.constant 7 : index
    %451 = memref.load %arg1[%450, %c7] : memref<16x8xi32, #tpu.memory_space<smem>>
    %c56_i32 = arith.constant 56 : i32
    %c0_i32_331 = arith.constant 0 : i32
    %452 = tpu.memref_slice %arg2[%451, %c0_i32_331] : memref<30x32xf32, #tpu.memory_space<any>> -> memref<1x32xf32, #tpu.memory_space<any>>
    %c56_i32_332 = arith.constant 56 : i32
    %c0_i32_333 = arith.constant 0 : i32
    %453 = tpu.memref_slice %arg6[%c56_i32_332, %c0_i32_333] : memref<64x32xf32, #tpu.memory_space<vmem>> -> memref<1x32xf32, #tpu.memory_space<vmem>>
    %454 = tpu.memref_slice %arg7[%c56_i32] : memref<64x!tpu.dma_semaphore, #tpu.memory_space<semaphore_mem>> -> memref<1x!tpu.dma_semaphore, #tpu.memory_space<semaphore_mem>>
    %455 = tpu.memref_squeeze %454 : memref<1x!tpu.dma_semaphore, #tpu.memory_space<semaphore_mem>> -> memref<!tpu.dma_semaphore, #tpu.memory_space<semaphore_mem>>
    tpu.enqueue_dma source(%452 : memref<1x32xf32, #tpu.memory_space<any>>) target(%453 : memref<1x32xf32, #tpu.memory_space<vmem>>) target_semaphore(%455 : memref<!tpu.dma_semaphore, #tpu.memory_space<semaphore_mem>>)
    %c8_i32_334 = arith.constant 8 : i32
    %456 = arith.muli %arg0, %c8_i32_334 : i32
    %c1_i32_335 = arith.constant 1 : i32
    %457 = arith.addi %456, %c1_i32_335 : i32
    %458 = arith.index_cast %457 : i32 to index
    %c7_336 = arith.constant 7 : index
    %459 = memref.load %arg1[%458, %c7_336] : memref<16x8xi32, #tpu.memory_space<smem>>
    %c57_i32 = arith.constant 57 : i32
    %c0_i32_337 = arith.constant 0 : i32
    %460 = tpu.memref_slice %arg2[%459, %c0_i32_337] : memref<30x32xf32, #tpu.memory_space<any>> -> memref<1x32xf32, #tpu.memory_space<any>>
    %c57_i32_338 = arith.constant 57 : i32
    %c0_i32_339 = arith.constant 0 : i32
    %461 = tpu.memref_slice %arg6[%c57_i32_338, %c0_i32_339] : memref<64x32xf32, #tpu.memory_space<vmem>> -> memref<1x32xf32, #tpu.memory_space<vmem>>
    %462 = tpu.memref_slice %arg7[%c57_i32] : memref<64x!tpu.dma_semaphore, #tpu.memory_space<semaphore_mem>> -> memref<1x!tpu.dma_semaphore, #tpu.memory_space<semaphore_mem>>
    %463 = tpu.memref_squeeze %462 : memref<1x!tpu.dma_semaphore, #tpu.memory_space<semaphore_mem>> -> memref<!tpu.dma_semaphore, #tpu.memory_space<semaphore_mem>>
    tpu.enqueue_dma source(%460 : memref<1x32xf32, #tpu.memory_space<any>>) target(%461 : memref<1x32xf32, #tpu.memory_space<vmem>>) target_semaphore(%463 : memref<!tpu.dma_semaphore, #tpu.memory_space<semaphore_mem>>)
    %c8_i32_340 = arith.constant 8 : i32
    %464 = arith.muli %arg0, %c8_i32_340 : i32
    %c2_i32_341 = arith.constant 2 : i32
    %465 = arith.addi %464, %c2_i32_341 : i32
    %466 = arith.index_cast %465 : i32 to index
    %c7_342 = arith.constant 7 : index
    %467 = memref.load %arg1[%466, %c7_342] : memref<16x8xi32, #tpu.memory_space<smem>>
    %c58_i32 = arith.constant 58 : i32
    %c0_i32_343 = arith.constant 0 : i32
    %468 = tpu.memref_slice %arg2[%467, %c0_i32_343] : memref<30x32xf32, #tpu.memory_space<any>> -> memref<1x32xf32, #tpu.memory_space<any>>
    %c58_i32_344 = arith.constant 58 : i32
    %c0_i32_345 = arith.constant 0 : i32
    %469 = tpu.memref_slice %arg6[%c58_i32_344, %c0_i32_345] : memref<64x32xf32, #tpu.memory_space<vmem>> -> memref<1x32xf32, #tpu.memory_space<vmem>>
    %470 = tpu.memref_slice %arg7[%c58_i32] : memref<64x!tpu.dma_semaphore, #tpu.memory_space<semaphore_mem>> -> memref<1x!tpu.dma_semaphore, #tpu.memory_space<semaphore_mem>>
    %471 = tpu.memref_squeeze %470 : memref<1x!tpu.dma_semaphore, #tpu.memory_space<semaphore_mem>> -> memref<!tpu.dma_semaphore, #tpu.memory_space<semaphore_mem>>
    tpu.enqueue_dma source(%468 : memref<1x32xf32, #tpu.memory_space<any>>) target(%469 : memref<1x32xf32, #tpu.memory_space<vmem>>) target_semaphore(%471 : memref<!tpu.dma_semaphore, #tpu.memory_space<semaphore_mem>>)
    %c8_i32_346 = arith.constant 8 : i32
    %472 = arith.muli %arg0, %c8_i32_346 : i32
    %c3_i32_347 = arith.constant 3 : i32
    %473 = arith.addi %472, %c3_i32_347 : i32
    %474 = arith.index_cast %473 : i32 to index
    %c7_348 = arith.constant 7 : index
    %475 = memref.load %arg1[%474, %c7_348] : memref<16x8xi32, #tpu.memory_space<smem>>
    %c59_i32 = arith.constant 59 : i32
    %c0_i32_349 = arith.constant 0 : i32
    %476 = tpu.memref_slice %arg2[%475, %c0_i32_349] : memref<30x32xf32, #tpu.memory_space<any>> -> memref<1x32xf32, #tpu.memory_space<any>>
    %c59_i32_350 = arith.constant 59 : i32
    %c0_i32_351 = arith.constant 0 : i32
    %477 = tpu.memref_slice %arg6[%c59_i32_350, %c0_i32_351] : memref<64x32xf32, #tpu.memory_space<vmem>> -> memref<1x32xf32, #tpu.memory_space<vmem>>
    %478 = tpu.memref_slice %arg7[%c59_i32] : memref<64x!tpu.dma_semaphore, #tpu.memory_space<semaphore_mem>> -> memref<1x!tpu.dma_semaphore, #tpu.memory_space<semaphore_mem>>
    %479 = tpu.memref_squeeze %478 : memref<1x!tpu.dma_semaphore, #tpu.memory_space<semaphore_mem>> -> memref<!tpu.dma_semaphore, #tpu.memory_space<semaphore_mem>>
    tpu.enqueue_dma source(%476 : memref<1x32xf32, #tpu.memory_space<any>>) target(%477 : memref<1x32xf32, #tpu.memory_space<vmem>>) target_semaphore(%479 : memref<!tpu.dma_semaphore, #tpu.memory_space<semaphore_mem>>)
    %c8_i32_352 = arith.constant 8 : i32
    %480 = arith.muli %arg0, %c8_i32_352 : i32
    %c4_i32_353 = arith.constant 4 : i32
    %481 = arith.addi %480, %c4_i32_353 : i32
    %482 = arith.index_cast %481 : i32 to index
    %c7_354 = arith.constant 7 : index
    %483 = memref.load %arg1[%482, %c7_354] : memref<16x8xi32, #tpu.memory_space<smem>>
    %c60_i32 = arith.constant 60 : i32
    %c0_i32_355 = arith.constant 0 : i32
    %484 = tpu.memref_slice %arg2[%483, %c0_i32_355] : memref<30x32xf32, #tpu.memory_space<any>> -> memref<1x32xf32, #tpu.memory_space<any>>
    %c60_i32_356 = arith.constant 60 : i32
    %c0_i32_357 = arith.constant 0 : i32
    %485 = tpu.memref_slice %arg6[%c60_i32_356, %c0_i32_357] : memref<64x32xf32, #tpu.memory_space<vmem>> -> memref<1x32xf32, #tpu.memory_space<vmem>>
    %486 = tpu.memref_slice %arg7[%c60_i32] : memref<64x!tpu.dma_semaphore, #tpu.memory_space<semaphore_mem>> -> memref<1x!tpu.dma_semaphore, #tpu.memory_space<semaphore_mem>>
    %487 = tpu.memref_squeeze %486 : memref<1x!tpu.dma_semaphore, #tpu.memory_space<semaphore_mem>> -> memref<!tpu.dma_semaphore, #tpu.memory_space<semaphore_mem>>
    tpu.enqueue_dma source(%484 : memref<1x32xf32, #tpu.memory_space<any>>) target(%485 : memref<1x32xf32, #tpu.memory_space<vmem>>) target_semaphore(%487 : memref<!tpu.dma_semaphore, #tpu.memory_space<semaphore_mem>>)
    %c8_i32_358 = arith.constant 8 : i32
    %488 = arith.muli %arg0, %c8_i32_358 : i32
    %c5_i32_359 = arith.constant 5 : i32
    %489 = arith.addi %488, %c5_i32_359 : i32
    %490 = arith.index_cast %489 : i32 to index
    %c7_360 = arith.constant 7 : index
    %491 = memref.load %arg1[%490, %c7_360] : memref<16x8xi32, #tpu.memory_space<smem>>
    %c61_i32 = arith.constant 61 : i32
    %c0_i32_361 = arith.constant 0 : i32
    %492 = tpu.memref_slice %arg2[%491, %c0_i32_361] : memref<30x32xf32, #tpu.memory_space<any>> -> memref<1x32xf32, #tpu.memory_space<any>>
    %c61_i32_362 = arith.constant 61 : i32
    %c0_i32_363 = arith.constant 0 : i32
    %493 = tpu.memref_slice %arg6[%c61_i32_362, %c0_i32_363] : memref<64x32xf32, #tpu.memory_space<vmem>> -> memref<1x32xf32, #tpu.memory_space<vmem>>
    %494 = tpu.memref_slice %arg7[%c61_i32] : memref<64x!tpu.dma_semaphore, #tpu.memory_space<semaphore_mem>> -> memref<1x!tpu.dma_semaphore, #tpu.memory_space<semaphore_mem>>
    %495 = tpu.memref_squeeze %494 : memref<1x!tpu.dma_semaphore, #tpu.memory_space<semaphore_mem>> -> memref<!tpu.dma_semaphore, #tpu.memory_space<semaphore_mem>>
    tpu.enqueue_dma source(%492 : memref<1x32xf32, #tpu.memory_space<any>>) target(%493 : memref<1x32xf32, #tpu.memory_space<vmem>>) target_semaphore(%495 : memref<!tpu.dma_semaphore, #tpu.memory_space<semaphore_mem>>)
    %c8_i32_364 = arith.constant 8 : i32
    %496 = arith.muli %arg0, %c8_i32_364 : i32
    %c6_i32_365 = arith.constant 6 : i32
    %497 = arith.addi %496, %c6_i32_365 : i32
    %498 = arith.index_cast %497 : i32 to index
    %c7_366 = arith.constant 7 : index
    %499 = memref.load %arg1[%498, %c7_366] : memref<16x8xi32, #tpu.memory_space<smem>>
    %c62_i32 = arith.constant 62 : i32
    %c0_i32_367 = arith.constant 0 : i32
    %500 = tpu.memref_slice %arg2[%499, %c0_i32_367] : memref<30x32xf32, #tpu.memory_space<any>> -> memref<1x32xf32, #tpu.memory_space<any>>
    %c62_i32_368 = arith.constant 62 : i32
    %c0_i32_369 = arith.constant 0 : i32
    %501 = tpu.memref_slice %arg6[%c62_i32_368, %c0_i32_369] : memref<64x32xf32, #tpu.memory_space<vmem>> -> memref<1x32xf32, #tpu.memory_space<vmem>>
    %502 = tpu.memref_slice %arg7[%c62_i32] : memref<64x!tpu.dma_semaphore, #tpu.memory_space<semaphore_mem>> -> memref<1x!tpu.dma_semaphore, #tpu.memory_space<semaphore_mem>>
    %503 = tpu.memref_squeeze %502 : memref<1x!tpu.dma_semaphore, #tpu.memory_space<semaphore_mem>> -> memref<!tpu.dma_semaphore, #tpu.memory_space<semaphore_mem>>
    tpu.enqueue_dma source(%500 : memref<1x32xf32, #tpu.memory_space<any>>) target(%501 : memref<1x32xf32, #tpu.memory_space<vmem>>) target_semaphore(%503 : memref<!tpu.dma_semaphore, #tpu.memory_space<semaphore_mem>>)
    %c8_i32_370 = arith.constant 8 : i32
    %504 = arith.muli %arg0, %c8_i32_370 : i32
    %c7_i32_371 = arith.constant 7 : i32
    %505 = arith.addi %504, %c7_i32_371 : i32
    %506 = arith.index_cast %505 : i32 to index
    %c7_372 = arith.constant 7 : index
    %507 = memref.load %arg1[%506, %c7_372] : memref<16x8xi32, #tpu.memory_space<smem>>
    %c63_i32 = arith.constant 63 : i32
    %c0_i32_373 = arith.constant 0 : i32
    %508 = tpu.memref_slice %arg2[%507, %c0_i32_373] : memref<30x32xf32, #tpu.memory_space<any>> -> memref<1x32xf32, #tpu.memory_space<any>>
    %c63_i32_374 = arith.constant 63 : i32
    %c0_i32_375 = arith.constant 0 : i32
    %509 = tpu.memref_slice %arg6[%c63_i32_374, %c0_i32_375] : memref<64x32xf32, #tpu.memory_space<vmem>> -> memref<1x32xf32, #tpu.memory_space<vmem>>
    %510 = tpu.memref_slice %arg7[%c63_i32] : memref<64x!tpu.dma_semaphore, #tpu.memory_space<semaphore_mem>> -> memref<1x!tpu.dma_semaphore, #tpu.memory_space<semaphore_mem>>
    %511 = tpu.memref_squeeze %510 : memref<1x!tpu.dma_semaphore, #tpu.memory_space<semaphore_mem>> -> memref<!tpu.dma_semaphore, #tpu.memory_space<semaphore_mem>>
    tpu.enqueue_dma source(%508 : memref<1x32xf32, #tpu.memory_space<any>>) target(%509 : memref<1x32xf32, #tpu.memory_space<vmem>>) target_semaphore(%511 : memref<!tpu.dma_semaphore, #tpu.memory_space<semaphore_mem>>)
    %c0_i32_376 = arith.constant 0 : i32
    %c0_i32_377 = arith.constant 0 : i32
    %512 = tpu.memref_slice %arg2[%3, %c0_i32_377] : memref<30x32xf32, #tpu.memory_space<any>> -> memref<1x32xf32, #tpu.memory_space<any>>
    %c0_i32_378 = arith.constant 0 : i32
    %c0_i32_379 = arith.constant 0 : i32
    %513 = tpu.memref_slice %arg6[%c0_i32_378, %c0_i32_379] : memref<64x32xf32, #tpu.memory_space<vmem>> -> memref<1x32xf32, #tpu.memory_space<vmem>>
    %514 = tpu.memref_slice %arg7[%c0_i32_376] : memref<64x!tpu.dma_semaphore, #tpu.memory_space<semaphore_mem>> -> memref<1x!tpu.dma_semaphore, #tpu.memory_space<semaphore_mem>>
    %515 = tpu.memref_squeeze %514 : memref<1x!tpu.dma_semaphore, #tpu.memory_space<semaphore_mem>> -> memref<!tpu.dma_semaphore, #tpu.memory_space<semaphore_mem>>
    tpu.wait_dma2 semaphore(%515 : memref<!tpu.dma_semaphore, #tpu.memory_space<semaphore_mem>>) src(%512 : memref<1x32xf32, #tpu.memory_space<any>>) dst(%513 : memref<1x32xf32, #tpu.memory_space<vmem>>)
    %c1_i32_380 = arith.constant 1 : i32
    %c0_i32_381 = arith.constant 0 : i32
    %516 = tpu.memref_slice %arg2[%11, %c0_i32_381] : memref<30x32xf32, #tpu.memory_space<any>> -> memref<1x32xf32, #tpu.memory_space<any>>
    %c1_i32_382 = arith.constant 1 : i32
    %c0_i32_383 = arith.constant 0 : i32
    %517 = tpu.memref_slice %arg6[%c1_i32_382, %c0_i32_383] : memref<64x32xf32, #tpu.memory_space<vmem>> -> memref<1x32xf32, #tpu.memory_space<vmem>>
    %518 = tpu.memref_slice %arg7[%c1_i32_380] : memref<64x!tpu.dma_semaphore, #tpu.memory_space<semaphore_mem>> -> memref<1x!tpu.dma_semaphore, #tpu.memory_space<semaphore_mem>>
    %519 = tpu.memref_squeeze %518 : memref<1x!tpu.dma_semaphore, #tpu.memory_space<semaphore_mem>> -> memref<!tpu.dma_semaphore, #tpu.memory_space<semaphore_mem>>
    tpu.wait_dma2 semaphore(%519 : memref<!tpu.dma_semaphore, #tpu.memory_space<semaphore_mem>>) src(%516 : memref<1x32xf32, #tpu.memory_space<any>>) dst(%517 : memref<1x32xf32, #tpu.memory_space<vmem>>)
    %c2_i32_384 = arith.constant 2 : i32
    %c0_i32_385 = arith.constant 0 : i32
    %520 = tpu.memref_slice %arg2[%19, %c0_i32_385] : memref<30x32xf32, #tpu.memory_space<any>> -> memref<1x32xf32, #tpu.memory_space<any>>
    %c2_i32_386 = arith.constant 2 : i32
    %c0_i32_387 = arith.constant 0 : i32
    %521 = tpu.memref_slice %arg6[%c2_i32_386, %c0_i32_387] : memref<64x32xf32, #tpu.memory_space<vmem>> -> memref<1x32xf32, #tpu.memory_space<vmem>>
    %522 = tpu.memref_slice %arg7[%c2_i32_384] : memref<64x!tpu.dma_semaphore, #tpu.memory_space<semaphore_mem>> -> memref<1x!tpu.dma_semaphore, #tpu.memory_space<semaphore_mem>>
    %523 = tpu.memref_squeeze %522 : memref<1x!tpu.dma_semaphore, #tpu.memory_space<semaphore_mem>> -> memref<!tpu.dma_semaphore, #tpu.memory_space<semaphore_mem>>
    tpu.wait_dma2 semaphore(%523 : memref<!tpu.dma_semaphore, #tpu.memory_space<semaphore_mem>>) src(%520 : memref<1x32xf32, #tpu.memory_space<any>>) dst(%521 : memref<1x32xf32, #tpu.memory_space<vmem>>)
    %c3_i32_388 = arith.constant 3 : i32
    %c0_i32_389 = arith.constant 0 : i32
    %524 = tpu.memref_slice %arg2[%27, %c0_i32_389] : memref<30x32xf32, #tpu.memory_space<any>> -> memref<1x32xf32, #tpu.memory_space<any>>
    %c3_i32_390 = arith.constant 3 : i32
    %c0_i32_391 = arith.constant 0 : i32
    %525 = tpu.memref_slice %arg6[%c3_i32_390, %c0_i32_391] : memref<64x32xf32, #tpu.memory_space<vmem>> -> memref<1x32xf32, #tpu.memory_space<vmem>>
    %526 = tpu.memref_slice %arg7[%c3_i32_388] : memref<64x!tpu.dma_semaphore, #tpu.memory_space<semaphore_mem>> -> memref<1x!tpu.dma_semaphore, #tpu.memory_space<semaphore_mem>>
    %527 = tpu.memref_squeeze %526 : memref<1x!tpu.dma_semaphore, #tpu.memory_space<semaphore_mem>> -> memref<!tpu.dma_semaphore, #tpu.memory_space<semaphore_mem>>
    tpu.wait_dma2 semaphore(%527 : memref<!tpu.dma_semaphore, #tpu.memory_space<semaphore_mem>>) src(%524 : memref<1x32xf32, #tpu.memory_space<any>>) dst(%525 : memref<1x32xf32, #tpu.memory_space<vmem>>)
    %c4_i32_392 = arith.constant 4 : i32
    %c0_i32_393 = arith.constant 0 : i32
    %528 = tpu.memref_slice %arg2[%35, %c0_i32_393] : memref<30x32xf32, #tpu.memory_space<any>> -> memref<1x32xf32, #tpu.memory_space<any>>
    %c4_i32_394 = arith.constant 4 : i32
    %c0_i32_395 = arith.constant 0 : i32
    %529 = tpu.memref_slice %arg6[%c4_i32_394, %c0_i32_395] : memref<64x32xf32, #tpu.memory_space<vmem>> -> memref<1x32xf32, #tpu.memory_space<vmem>>
    %530 = tpu.memref_slice %arg7[%c4_i32_392] : memref<64x!tpu.dma_semaphore, #tpu.memory_space<semaphore_mem>> -> memref<1x!tpu.dma_semaphore, #tpu.memory_space<semaphore_mem>>
    %531 = tpu.memref_squeeze %530 : memref<1x!tpu.dma_semaphore, #tpu.memory_space<semaphore_mem>> -> memref<!tpu.dma_semaphore, #tpu.memory_space<semaphore_mem>>
    tpu.wait_dma2 semaphore(%531 : memref<!tpu.dma_semaphore, #tpu.memory_space<semaphore_mem>>) src(%528 : memref<1x32xf32, #tpu.memory_space<any>>) dst(%529 : memref<1x32xf32, #tpu.memory_space<vmem>>)
    %c5_i32_396 = arith.constant 5 : i32
    %c0_i32_397 = arith.constant 0 : i32
    %532 = tpu.memref_slice %arg2[%43, %c0_i32_397] : memref<30x32xf32, #tpu.memory_space<any>> -> memref<1x32xf32, #tpu.memory_space<any>>
    %c5_i32_398 = arith.constant 5 : i32
    %c0_i32_399 = arith.constant 0 : i32
    %533 = tpu.memref_slice %arg6[%c5_i32_398, %c0_i32_399] : memref<64x32xf32, #tpu.memory_space<vmem>> -> memref<1x32xf32, #tpu.memory_space<vmem>>
    %534 = tpu.memref_slice %arg7[%c5_i32_396] : memref<64x!tpu.dma_semaphore, #tpu.memory_space<semaphore_mem>> -> memref<1x!tpu.dma_semaphore, #tpu.memory_space<semaphore_mem>>
    %535 = tpu.memref_squeeze %534 : memref<1x!tpu.dma_semaphore, #tpu.memory_space<semaphore_mem>> -> memref<!tpu.dma_semaphore, #tpu.memory_space<semaphore_mem>>
    tpu.wait_dma2 semaphore(%535 : memref<!tpu.dma_semaphore, #tpu.memory_space<semaphore_mem>>) src(%532 : memref<1x32xf32, #tpu.memory_space<any>>) dst(%533 : memref<1x32xf32, #tpu.memory_space<vmem>>)
    %c6_i32_400 = arith.constant 6 : i32
    %c0_i32_401 = arith.constant 0 : i32
    %536 = tpu.memref_slice %arg2[%51, %c0_i32_401] : memref<30x32xf32, #tpu.memory_space<any>> -> memref<1x32xf32, #tpu.memory_space<any>>
    %c6_i32_402 = arith.constant 6 : i32
    %c0_i32_403 = arith.constant 0 : i32
    %537 = tpu.memref_slice %arg6[%c6_i32_402, %c0_i32_403] : memref<64x32xf32, #tpu.memory_space<vmem>> -> memref<1x32xf32, #tpu.memory_space<vmem>>
    %538 = tpu.memref_slice %arg7[%c6_i32_400] : memref<64x!tpu.dma_semaphore, #tpu.memory_space<semaphore_mem>> -> memref<1x!tpu.dma_semaphore, #tpu.memory_space<semaphore_mem>>
    %539 = tpu.memref_squeeze %538 : memref<1x!tpu.dma_semaphore, #tpu.memory_space<semaphore_mem>> -> memref<!tpu.dma_semaphore, #tpu.memory_space<semaphore_mem>>
    tpu.wait_dma2 semaphore(%539 : memref<!tpu.dma_semaphore, #tpu.memory_space<semaphore_mem>>) src(%536 : memref<1x32xf32, #tpu.memory_space<any>>) dst(%537 : memref<1x32xf32, #tpu.memory_space<vmem>>)
    %c7_i32_404 = arith.constant 7 : i32
    %c0_i32_405 = arith.constant 0 : i32
    %540 = tpu.memref_slice %arg2[%59, %c0_i32_405] : memref<30x32xf32, #tpu.memory_space<any>> -> memref<1x32xf32, #tpu.memory_space<any>>
    %c7_i32_406 = arith.constant 7 : i32
    %c0_i32_407 = arith.constant 0 : i32
    %541 = tpu.memref_slice %arg6[%c7_i32_406, %c0_i32_407] : memref<64x32xf32, #tpu.memory_space<vmem>> -> memref<1x32xf32, #tpu.memory_space<vmem>>
    %542 = tpu.memref_slice %arg7[%c7_i32_404] : memref<64x!tpu.dma_semaphore, #tpu.memory_space<semaphore_mem>> -> memref<1x!tpu.dma_semaphore, #tpu.memory_space<semaphore_mem>>
    %543 = tpu.memref_squeeze %542 : memref<1x!tpu.dma_semaphore, #tpu.memory_space<semaphore_mem>> -> memref<!tpu.dma_semaphore, #tpu.memory_space<semaphore_mem>>
    tpu.wait_dma2 semaphore(%543 : memref<!tpu.dma_semaphore, #tpu.memory_space<semaphore_mem>>) src(%540 : memref<1x32xf32, #tpu.memory_space<any>>) dst(%541 : memref<1x32xf32, #tpu.memory_space<vmem>>)
    %c8_i32_408 = arith.constant 8 : i32
    %c0_i32_409 = arith.constant 0 : i32
    %544 = tpu.memref_slice %arg2[%67, %c0_i32_409] : memref<30x32xf32, #tpu.memory_space<any>> -> memref<1x32xf32, #tpu.memory_space<any>>
    %c8_i32_410 = arith.constant 8 : i32
    %c0_i32_411 = arith.constant 0 : i32
    %545 = tpu.memref_slice %arg6[%c8_i32_410, %c0_i32_411] : memref<64x32xf32, #tpu.memory_space<vmem>> -> memref<1x32xf32, #tpu.memory_space<vmem>>
    %546 = tpu.memref_slice %arg7[%c8_i32_408] : memref<64x!tpu.dma_semaphore, #tpu.memory_space<semaphore_mem>> -> memref<1x!tpu.dma_semaphore, #tpu.memory_space<semaphore_mem>>
    %547 = tpu.memref_squeeze %546 : memref<1x!tpu.dma_semaphore, #tpu.memory_space<semaphore_mem>> -> memref<!tpu.dma_semaphore, #tpu.memory_space<semaphore_mem>>
    tpu.wait_dma2 semaphore(%547 : memref<!tpu.dma_semaphore, #tpu.memory_space<semaphore_mem>>) src(%544 : memref<1x32xf32, #tpu.memory_space<any>>) dst(%545 : memref<1x32xf32, #tpu.memory_space<vmem>>)
    %c9_i32_412 = arith.constant 9 : i32
    %c0_i32_413 = arith.constant 0 : i32
    %548 = tpu.memref_slice %arg2[%75, %c0_i32_413] : memref<30x32xf32, #tpu.memory_space<any>> -> memref<1x32xf32, #tpu.memory_space<any>>
    %c9_i32_414 = arith.constant 9 : i32
    %c0_i32_415 = arith.constant 0 : i32
    %549 = tpu.memref_slice %arg6[%c9_i32_414, %c0_i32_415] : memref<64x32xf32, #tpu.memory_space<vmem>> -> memref<1x32xf32, #tpu.memory_space<vmem>>
    %550 = tpu.memref_slice %arg7[%c9_i32_412] : memref<64x!tpu.dma_semaphore, #tpu.memory_space<semaphore_mem>> -> memref<1x!tpu.dma_semaphore, #tpu.memory_space<semaphore_mem>>
    %551 = tpu.memref_squeeze %550 : memref<1x!tpu.dma_semaphore, #tpu.memory_space<semaphore_mem>> -> memref<!tpu.dma_semaphore, #tpu.memory_space<semaphore_mem>>
    tpu.wait_dma2 semaphore(%551 : memref<!tpu.dma_semaphore, #tpu.memory_space<semaphore_mem>>) src(%548 : memref<1x32xf32, #tpu.memory_space<any>>) dst(%549 : memref<1x32xf32, #tpu.memory_space<vmem>>)
    %c10_i32_416 = arith.constant 10 : i32
    %c0_i32_417 = arith.constant 0 : i32
    %552 = tpu.memref_slice %arg2[%83, %c0_i32_417] : memref<30x32xf32, #tpu.memory_space<any>> -> memref<1x32xf32, #tpu.memory_space<any>>
    %c10_i32_418 = arith.constant 10 : i32
    %c0_i32_419 = arith.constant 0 : i32
    %553 = tpu.memref_slice %arg6[%c10_i32_418, %c0_i32_419] : memref<64x32xf32, #tpu.memory_space<vmem>> -> memref<1x32xf32, #tpu.memory_space<vmem>>
    %554 = tpu.memref_slice %arg7[%c10_i32_416] : memref<64x!tpu.dma_semaphore, #tpu.memory_space<semaphore_mem>> -> memref<1x!tpu.dma_semaphore, #tpu.memory_space<semaphore_mem>>
    %555 = tpu.memref_squeeze %554 : memref<1x!tpu.dma_semaphore, #tpu.memory_space<semaphore_mem>> -> memref<!tpu.dma_semaphore, #tpu.memory_space<semaphore_mem>>
    tpu.wait_dma2 semaphore(%555 : memref<!tpu.dma_semaphore, #tpu.memory_space<semaphore_mem>>) src(%552 : memref<1x32xf32, #tpu.memory_space<any>>) dst(%553 : memref<1x32xf32, #tpu.memory_space<vmem>>)
    %c11_i32_420 = arith.constant 11 : i32
    %c0_i32_421 = arith.constant 0 : i32
    %556 = tpu.memref_slice %arg2[%91, %c0_i32_421] : memref<30x32xf32, #tpu.memory_space<any>> -> memref<1x32xf32, #tpu.memory_space<any>>
    %c11_i32_422 = arith.constant 11 : i32
    %c0_i32_423 = arith.constant 0 : i32
    %557 = tpu.memref_slice %arg6[%c11_i32_422, %c0_i32_423] : memref<64x32xf32, #tpu.memory_space<vmem>> -> memref<1x32xf32, #tpu.memory_space<vmem>>
    %558 = tpu.memref_slice %arg7[%c11_i32_420] : memref<64x!tpu.dma_semaphore, #tpu.memory_space<semaphore_mem>> -> memref<1x!tpu.dma_semaphore, #tpu.memory_space<semaphore_mem>>
    %559 = tpu.memref_squeeze %558 : memref<1x!tpu.dma_semaphore, #tpu.memory_space<semaphore_mem>> -> memref<!tpu.dma_semaphore, #tpu.memory_space<semaphore_mem>>
    tpu.wait_dma2 semaphore(%559 : memref<!tpu.dma_semaphore, #tpu.memory_space<semaphore_mem>>) src(%556 : memref<1x32xf32, #tpu.memory_space<any>>) dst(%557 : memref<1x32xf32, #tpu.memory_space<vmem>>)
    %c12_i32_424 = arith.constant 12 : i32
    %c0_i32_425 = arith.constant 0 : i32
    %560 = tpu.memref_slice %arg2[%99, %c0_i32_425] : memref<30x32xf32, #tpu.memory_space<any>> -> memref<1x32xf32, #tpu.memory_space<any>>
    %c12_i32_426 = arith.constant 12 : i32
    %c0_i32_427 = arith.constant 0 : i32
    %561 = tpu.memref_slice %arg6[%c12_i32_426, %c0_i32_427] : memref<64x32xf32, #tpu.memory_space<vmem>> -> memref<1x32xf32, #tpu.memory_space<vmem>>
    %562 = tpu.memref_slice %arg7[%c12_i32_424] : memref<64x!tpu.dma_semaphore, #tpu.memory_space<semaphore_mem>> -> memref<1x!tpu.dma_semaphore, #tpu.memory_space<semaphore_mem>>
    %563 = tpu.memref_squeeze %562 : memref<1x!tpu.dma_semaphore, #tpu.memory_space<semaphore_mem>> -> memref<!tpu.dma_semaphore, #tpu.memory_space<semaphore_mem>>
    tpu.wait_dma2 semaphore(%563 : memref<!tpu.dma_semaphore, #tpu.memory_space<semaphore_mem>>) src(%560 : memref<1x32xf32, #tpu.memory_space<any>>) dst(%561 : memref<1x32xf32, #tpu.memory_space<vmem>>)
    %c13_i32_428 = arith.constant 13 : i32
    %c0_i32_429 = arith.constant 0 : i32
    %564 = tpu.memref_slice %arg2[%107, %c0_i32_429] : memref<30x32xf32, #tpu.memory_space<any>> -> memref<1x32xf32, #tpu.memory_space<any>>
    %c13_i32_430 = arith.constant 13 : i32
    %c0_i32_431 = arith.constant 0 : i32
    %565 = tpu.memref_slice %arg6[%c13_i32_430, %c0_i32_431] : memref<64x32xf32, #tpu.memory_space<vmem>> -> memref<1x32xf32, #tpu.memory_space<vmem>>
    %566 = tpu.memref_slice %arg7[%c13_i32_428] : memref<64x!tpu.dma_semaphore, #tpu.memory_space<semaphore_mem>> -> memref<1x!tpu.dma_semaphore, #tpu.memory_space<semaphore_mem>>
    %567 = tpu.memref_squeeze %566 : memref<1x!tpu.dma_semaphore, #tpu.memory_space<semaphore_mem>> -> memref<!tpu.dma_semaphore, #tpu.memory_space<semaphore_mem>>
    tpu.wait_dma2 semaphore(%567 : memref<!tpu.dma_semaphore, #tpu.memory_space<semaphore_mem>>) src(%564 : memref<1x32xf32, #tpu.memory_space<any>>) dst(%565 : memref<1x32xf32, #tpu.memory_space<vmem>>)
    %c14_i32_432 = arith.constant 14 : i32
    %c0_i32_433 = arith.constant 0 : i32
    %568 = tpu.memref_slice %arg2[%115, %c0_i32_433] : memref<30x32xf32, #tpu.memory_space<any>> -> memref<1x32xf32, #tpu.memory_space<any>>
    %c14_i32_434 = arith.constant 14 : i32
    %c0_i32_435 = arith.constant 0 : i32
    %569 = tpu.memref_slice %arg6[%c14_i32_434, %c0_i32_435] : memref<64x32xf32, #tpu.memory_space<vmem>> -> memref<1x32xf32, #tpu.memory_space<vmem>>
    %570 = tpu.memref_slice %arg7[%c14_i32_432] : memref<64x!tpu.dma_semaphore, #tpu.memory_space<semaphore_mem>> -> memref<1x!tpu.dma_semaphore, #tpu.memory_space<semaphore_mem>>
    %571 = tpu.memref_squeeze %570 : memref<1x!tpu.dma_semaphore, #tpu.memory_space<semaphore_mem>> -> memref<!tpu.dma_semaphore, #tpu.memory_space<semaphore_mem>>
    tpu.wait_dma2 semaphore(%571 : memref<!tpu.dma_semaphore, #tpu.memory_space<semaphore_mem>>) src(%568 : memref<1x32xf32, #tpu.memory_space<any>>) dst(%569 : memref<1x32xf32, #tpu.memory_space<vmem>>)
    %c15_i32_436 = arith.constant 15 : i32
    %c0_i32_437 = arith.constant 0 : i32
    %572 = tpu.memref_slice %arg2[%123, %c0_i32_437] : memref<30x32xf32, #tpu.memory_space<any>> -> memref<1x32xf32, #tpu.memory_space<any>>
    %c15_i32_438 = arith.constant 15 : i32
    %c0_i32_439 = arith.constant 0 : i32
    %573 = tpu.memref_slice %arg6[%c15_i32_438, %c0_i32_439] : memref<64x32xf32, #tpu.memory_space<vmem>> -> memref<1x32xf32, #tpu.memory_space<vmem>>
    %574 = tpu.memref_slice %arg7[%c15_i32_436] : memref<64x!tpu.dma_semaphore, #tpu.memory_space<semaphore_mem>> -> memref<1x!tpu.dma_semaphore, #tpu.memory_space<semaphore_mem>>
    %575 = tpu.memref_squeeze %574 : memref<1x!tpu.dma_semaphore, #tpu.memory_space<semaphore_mem>> -> memref<!tpu.dma_semaphore, #tpu.memory_space<semaphore_mem>>
    tpu.wait_dma2 semaphore(%575 : memref<!tpu.dma_semaphore, #tpu.memory_space<semaphore_mem>>) src(%572 : memref<1x32xf32, #tpu.memory_space<any>>) dst(%573 : memref<1x32xf32, #tpu.memory_space<vmem>>)
    %c16_i32_440 = arith.constant 16 : i32
    %c0_i32_441 = arith.constant 0 : i32
    %576 = tpu.memref_slice %arg2[%131, %c0_i32_441] : memref<30x32xf32, #tpu.memory_space<any>> -> memref<1x32xf32, #tpu.memory_space<any>>
    %c16_i32_442 = arith.constant 16 : i32
    %c0_i32_443 = arith.constant 0 : i32
    %577 = tpu.memref_slice %arg6[%c16_i32_442, %c0_i32_443] : memref<64x32xf32, #tpu.memory_space<vmem>> -> memref<1x32xf32, #tpu.memory_space<vmem>>
    %578 = tpu.memref_slice %arg7[%c16_i32_440] : memref<64x!tpu.dma_semaphore, #tpu.memory_space<semaphore_mem>> -> memref<1x!tpu.dma_semaphore, #tpu.memory_space<semaphore_mem>>
    %579 = tpu.memref_squeeze %578 : memref<1x!tpu.dma_semaphore, #tpu.memory_space<semaphore_mem>> -> memref<!tpu.dma_semaphore, #tpu.memory_space<semaphore_mem>>
    tpu.wait_dma2 semaphore(%579 : memref<!tpu.dma_semaphore, #tpu.memory_space<semaphore_mem>>) src(%576 : memref<1x32xf32, #tpu.memory_space<any>>) dst(%577 : memref<1x32xf32, #tpu.memory_space<vmem>>)
    %c17_i32_444 = arith.constant 17 : i32
    %c0_i32_445 = arith.constant 0 : i32
    %580 = tpu.memref_slice %arg2[%139, %c0_i32_445] : memref<30x32xf32, #tpu.memory_space<any>> -> memref<1x32xf32, #tpu.memory_space<any>>
    %c17_i32_446 = arith.constant 17 : i32
    %c0_i32_447 = arith.constant 0 : i32
    %581 = tpu.memref_slice %arg6[%c17_i32_446, %c0_i32_447] : memref<64x32xf32, #tpu.memory_space<vmem>> -> memref<1x32xf32, #tpu.memory_space<vmem>>
    %582 = tpu.memref_slice %arg7[%c17_i32_444] : memref<64x!tpu.dma_semaphore, #tpu.memory_space<semaphore_mem>> -> memref<1x!tpu.dma_semaphore, #tpu.memory_space<semaphore_mem>>
    %583 = tpu.memref_squeeze %582 : memref<1x!tpu.dma_semaphore, #tpu.memory_space<semaphore_mem>> -> memref<!tpu.dma_semaphore, #tpu.memory_space<semaphore_mem>>
    tpu.wait_dma2 semaphore(%583 : memref<!tpu.dma_semaphore, #tpu.memory_space<semaphore_mem>>) src(%580 : memref<1x32xf32, #tpu.memory_space<any>>) dst(%581 : memref<1x32xf32, #tpu.memory_space<vmem>>)
    %c18_i32_448 = arith.constant 18 : i32
    %c0_i32_449 = arith.constant 0 : i32
    %584 = tpu.memref_slice %arg2[%147, %c0_i32_449] : memref<30x32xf32, #tpu.memory_space<any>> -> memref<1x32xf32, #tpu.memory_space<any>>
    %c18_i32_450 = arith.constant 18 : i32
    %c0_i32_451 = arith.constant 0 : i32
    %585 = tpu.memref_slice %arg6[%c18_i32_450, %c0_i32_451] : memref<64x32xf32, #tpu.memory_space<vmem>> -> memref<1x32xf32, #tpu.memory_space<vmem>>
    %586 = tpu.memref_slice %arg7[%c18_i32_448] : memref<64x!tpu.dma_semaphore, #tpu.memory_space<semaphore_mem>> -> memref<1x!tpu.dma_semaphore, #tpu.memory_space<semaphore_mem>>
    %587 = tpu.memref_squeeze %586 : memref<1x!tpu.dma_semaphore, #tpu.memory_space<semaphore_mem>> -> memref<!tpu.dma_semaphore, #tpu.memory_space<semaphore_mem>>
    tpu.wait_dma2 semaphore(%587 : memref<!tpu.dma_semaphore, #tpu.memory_space<semaphore_mem>>) src(%584 : memref<1x32xf32, #tpu.memory_space<any>>) dst(%585 : memref<1x32xf32, #tpu.memory_space<vmem>>)
    %c19_i32_452 = arith.constant 19 : i32
    %c0_i32_453 = arith.constant 0 : i32
    %588 = tpu.memref_slice %arg2[%155, %c0_i32_453] : memref<30x32xf32, #tpu.memory_space<any>> -> memref<1x32xf32, #tpu.memory_space<any>>
    %c19_i32_454 = arith.constant 19 : i32
    %c0_i32_455 = arith.constant 0 : i32
    %589 = tpu.memref_slice %arg6[%c19_i32_454, %c0_i32_455] : memref<64x32xf32, #tpu.memory_space<vmem>> -> memref<1x32xf32, #tpu.memory_space<vmem>>
    %590 = tpu.memref_slice %arg7[%c19_i32_452] : memref<64x!tpu.dma_semaphore, #tpu.memory_space<semaphore_mem>> -> memref<1x!tpu.dma_semaphore, #tpu.memory_space<semaphore_mem>>
    %591 = tpu.memref_squeeze %590 : memref<1x!tpu.dma_semaphore, #tpu.memory_space<semaphore_mem>> -> memref<!tpu.dma_semaphore, #tpu.memory_space<semaphore_mem>>
    tpu.wait_dma2 semaphore(%591 : memref<!tpu.dma_semaphore, #tpu.memory_space<semaphore_mem>>) src(%588 : memref<1x32xf32, #tpu.memory_space<any>>) dst(%589 : memref<1x32xf32, #tpu.memory_space<vmem>>)
    %c20_i32_456 = arith.constant 20 : i32
    %c0_i32_457 = arith.constant 0 : i32
    %592 = tpu.memref_slice %arg2[%163, %c0_i32_457] : memref<30x32xf32, #tpu.memory_space<any>> -> memref<1x32xf32, #tpu.memory_space<any>>
    %c20_i32_458 = arith.constant 20 : i32
    %c0_i32_459 = arith.constant 0 : i32
    %593 = tpu.memref_slice %arg6[%c20_i32_458, %c0_i32_459] : memref<64x32xf32, #tpu.memory_space<vmem>> -> memref<1x32xf32, #tpu.memory_space<vmem>>
    %594 = tpu.memref_slice %arg7[%c20_i32_456] : memref<64x!tpu.dma_semaphore, #tpu.memory_space<semaphore_mem>> -> memref<1x!tpu.dma_semaphore, #tpu.memory_space<semaphore_mem>>
    %595 = tpu.memref_squeeze %594 : memref<1x!tpu.dma_semaphore, #tpu.memory_space<semaphore_mem>> -> memref<!tpu.dma_semaphore, #tpu.memory_space<semaphore_mem>>
    tpu.wait_dma2 semaphore(%595 : memref<!tpu.dma_semaphore, #tpu.memory_space<semaphore_mem>>) src(%592 : memref<1x32xf32, #tpu.memory_space<any>>) dst(%593 : memref<1x32xf32, #tpu.memory_space<vmem>>)
    %c21_i32_460 = arith.constant 21 : i32
    %c0_i32_461 = arith.constant 0 : i32
    %596 = tpu.memref_slice %arg2[%171, %c0_i32_461] : memref<30x32xf32, #tpu.memory_space<any>> -> memref<1x32xf32, #tpu.memory_space<any>>
    %c21_i32_462 = arith.constant 21 : i32
    %c0_i32_463 = arith.constant 0 : i32
    %597 = tpu.memref_slice %arg6[%c21_i32_462, %c0_i32_463] : memref<64x32xf32, #tpu.memory_space<vmem>> -> memref<1x32xf32, #tpu.memory_space<vmem>>
    %598 = tpu.memref_slice %arg7[%c21_i32_460] : memref<64x!tpu.dma_semaphore, #tpu.memory_space<semaphore_mem>> -> memref<1x!tpu.dma_semaphore, #tpu.memory_space<semaphore_mem>>
    %599 = tpu.memref_squeeze %598 : memref<1x!tpu.dma_semaphore, #tpu.memory_space<semaphore_mem>> -> memref<!tpu.dma_semaphore, #tpu.memory_space<semaphore_mem>>
    tpu.wait_dma2 semaphore(%599 : memref<!tpu.dma_semaphore, #tpu.memory_space<semaphore_mem>>) src(%596 : memref<1x32xf32, #tpu.memory_space<any>>) dst(%597 : memref<1x32xf32, #tpu.memory_space<vmem>>)
    %c22_i32_464 = arith.constant 22 : i32
    %c0_i32_465 = arith.constant 0 : i32
    %600 = tpu.memref_slice %arg2[%179, %c0_i32_465] : memref<30x32xf32, #tpu.memory_space<any>> -> memref<1x32xf32, #tpu.memory_space<any>>
    %c22_i32_466 = arith.constant 22 : i32
    %c0_i32_467 = arith.constant 0 : i32
    %601 = tpu.memref_slice %arg6[%c22_i32_466, %c0_i32_467] : memref<64x32xf32, #tpu.memory_space<vmem>> -> memref<1x32xf32, #tpu.memory_space<vmem>>
    %602 = tpu.memref_slice %arg7[%c22_i32_464] : memref<64x!tpu.dma_semaphore, #tpu.memory_space<semaphore_mem>> -> memref<1x!tpu.dma_semaphore, #tpu.memory_space<semaphore_mem>>
    %603 = tpu.memref_squeeze %602 : memref<1x!tpu.dma_semaphore, #tpu.memory_space<semaphore_mem>> -> memref<!tpu.dma_semaphore, #tpu.memory_space<semaphore_mem>>
    tpu.wait_dma2 semaphore(%603 : memref<!tpu.dma_semaphore, #tpu.memory_space<semaphore_mem>>) src(%600 : memref<1x32xf32, #tpu.memory_space<any>>) dst(%601 : memref<1x32xf32, #tpu.memory_space<vmem>>)
    %c23_i32_468 = arith.constant 23 : i32
    %c0_i32_469 = arith.constant 0 : i32
    %604 = tpu.memref_slice %arg2[%187, %c0_i32_469] : memref<30x32xf32, #tpu.memory_space<any>> -> memref<1x32xf32, #tpu.memory_space<any>>
    %c23_i32_470 = arith.constant 23 : i32
    %c0_i32_471 = arith.constant 0 : i32
    %605 = tpu.memref_slice %arg6[%c23_i32_470, %c0_i32_471] : memref<64x32xf32, #tpu.memory_space<vmem>> -> memref<1x32xf32, #tpu.memory_space<vmem>>
    %606 = tpu.memref_slice %arg7[%c23_i32_468] : memref<64x!tpu.dma_semaphore, #tpu.memory_space<semaphore_mem>> -> memref<1x!tpu.dma_semaphore, #tpu.memory_space<semaphore_mem>>
    %607 = tpu.memref_squeeze %606 : memref<1x!tpu.dma_semaphore, #tpu.memory_space<semaphore_mem>> -> memref<!tpu.dma_semaphore, #tpu.memory_space<semaphore_mem>>
    tpu.wait_dma2 semaphore(%607 : memref<!tpu.dma_semaphore, #tpu.memory_space<semaphore_mem>>) src(%604 : memref<1x32xf32, #tpu.memory_space<any>>) dst(%605 : memref<1x32xf32, #tpu.memory_space<vmem>>)
    %c24_i32_472 = arith.constant 24 : i32
    %c0_i32_473 = arith.constant 0 : i32
    %608 = tpu.memref_slice %arg2[%195, %c0_i32_473] : memref<30x32xf32, #tpu.memory_space<any>> -> memref<1x32xf32, #tpu.memory_space<any>>
    %c24_i32_474 = arith.constant 24 : i32
    %c0_i32_475 = arith.constant 0 : i32
    %609 = tpu.memref_slice %arg6[%c24_i32_474, %c0_i32_475] : memref<64x32xf32, #tpu.memory_space<vmem>> -> memref<1x32xf32, #tpu.memory_space<vmem>>
    %610 = tpu.memref_slice %arg7[%c24_i32_472] : memref<64x!tpu.dma_semaphore, #tpu.memory_space<semaphore_mem>> -> memref<1x!tpu.dma_semaphore, #tpu.memory_space<semaphore_mem>>
    %611 = tpu.memref_squeeze %610 : memref<1x!tpu.dma_semaphore, #tpu.memory_space<semaphore_mem>> -> memref<!tpu.dma_semaphore, #tpu.memory_space<semaphore_mem>>
    tpu.wait_dma2 semaphore(%611 : memref<!tpu.dma_semaphore, #tpu.memory_space<semaphore_mem>>) src(%608 : memref<1x32xf32, #tpu.memory_space<any>>) dst(%609 : memref<1x32xf32, #tpu.memory_space<vmem>>)
    %c25_i32_476 = arith.constant 25 : i32
    %c0_i32_477 = arith.constant 0 : i32
    %612 = tpu.memref_slice %arg2[%203, %c0_i32_477] : memref<30x32xf32, #tpu.memory_space<any>> -> memref<1x32xf32, #tpu.memory_space<any>>
    %c25_i32_478 = arith.constant 25 : i32
    %c0_i32_479 = arith.constant 0 : i32
    %613 = tpu.memref_slice %arg6[%c25_i32_478, %c0_i32_479] : memref<64x32xf32, #tpu.memory_space<vmem>> -> memref<1x32xf32, #tpu.memory_space<vmem>>
    %614 = tpu.memref_slice %arg7[%c25_i32_476] : memref<64x!tpu.dma_semaphore, #tpu.memory_space<semaphore_mem>> -> memref<1x!tpu.dma_semaphore, #tpu.memory_space<semaphore_mem>>
    %615 = tpu.memref_squeeze %614 : memref<1x!tpu.dma_semaphore, #tpu.memory_space<semaphore_mem>> -> memref<!tpu.dma_semaphore, #tpu.memory_space<semaphore_mem>>
    tpu.wait_dma2 semaphore(%615 : memref<!tpu.dma_semaphore, #tpu.memory_space<semaphore_mem>>) src(%612 : memref<1x32xf32, #tpu.memory_space<any>>) dst(%613 : memref<1x32xf32, #tpu.memory_space<vmem>>)
    %c26_i32_480 = arith.constant 26 : i32
    %c0_i32_481 = arith.constant 0 : i32
    %616 = tpu.memref_slice %arg2[%211, %c0_i32_481] : memref<30x32xf32, #tpu.memory_space<any>> -> memref<1x32xf32, #tpu.memory_space<any>>
    %c26_i32_482 = arith.constant 26 : i32
    %c0_i32_483 = arith.constant 0 : i32
    %617 = tpu.memref_slice %arg6[%c26_i32_482, %c0_i32_483] : memref<64x32xf32, #tpu.memory_space<vmem>> -> memref<1x32xf32, #tpu.memory_space<vmem>>
    %618 = tpu.memref_slice %arg7[%c26_i32_480] : memref<64x!tpu.dma_semaphore, #tpu.memory_space<semaphore_mem>> -> memref<1x!tpu.dma_semaphore, #tpu.memory_space<semaphore_mem>>
    %619 = tpu.memref_squeeze %618 : memref<1x!tpu.dma_semaphore, #tpu.memory_space<semaphore_mem>> -> memref<!tpu.dma_semaphore, #tpu.memory_space<semaphore_mem>>
    tpu.wait_dma2 semaphore(%619 : memref<!tpu.dma_semaphore, #tpu.memory_space<semaphore_mem>>) src(%616 : memref<1x32xf32, #tpu.memory_space<any>>) dst(%617 : memref<1x32xf32, #tpu.memory_space<vmem>>)
    %c27_i32_484 = arith.constant 27 : i32
    %c0_i32_485 = arith.constant 0 : i32
    %620 = tpu.memref_slice %arg2[%219, %c0_i32_485] : memref<30x32xf32, #tpu.memory_space<any>> -> memref<1x32xf32, #tpu.memory_space<any>>
    %c27_i32_486 = arith.constant 27 : i32
    %c0_i32_487 = arith.constant 0 : i32
    %621 = tpu.memref_slice %arg6[%c27_i32_486, %c0_i32_487] : memref<64x32xf32, #tpu.memory_space<vmem>> -> memref<1x32xf32, #tpu.memory_space<vmem>>
    %622 = tpu.memref_slice %arg7[%c27_i32_484] : memref<64x!tpu.dma_semaphore, #tpu.memory_space<semaphore_mem>> -> memref<1x!tpu.dma_semaphore, #tpu.memory_space<semaphore_mem>>
    %623 = tpu.memref_squeeze %622 : memref<1x!tpu.dma_semaphore, #tpu.memory_space<semaphore_mem>> -> memref<!tpu.dma_semaphore, #tpu.memory_space<semaphore_mem>>
    tpu.wait_dma2 semaphore(%623 : memref<!tpu.dma_semaphore, #tpu.memory_space<semaphore_mem>>) src(%620 : memref<1x32xf32, #tpu.memory_space<any>>) dst(%621 : memref<1x32xf32, #tpu.memory_space<vmem>>)
    %c28_i32_488 = arith.constant 28 : i32
    %c0_i32_489 = arith.constant 0 : i32
    %624 = tpu.memref_slice %arg2[%227, %c0_i32_489] : memref<30x32xf32, #tpu.memory_space<any>> -> memref<1x32xf32, #tpu.memory_space<any>>
    %c28_i32_490 = arith.constant 28 : i32
    %c0_i32_491 = arith.constant 0 : i32
    %625 = tpu.memref_slice %arg6[%c28_i32_490, %c0_i32_491] : memref<64x32xf32, #tpu.memory_space<vmem>> -> memref<1x32xf32, #tpu.memory_space<vmem>>
    %626 = tpu.memref_slice %arg7[%c28_i32_488] : memref<64x!tpu.dma_semaphore, #tpu.memory_space<semaphore_mem>> -> memref<1x!tpu.dma_semaphore, #tpu.memory_space<semaphore_mem>>
    %627 = tpu.memref_squeeze %626 : memref<1x!tpu.dma_semaphore, #tpu.memory_space<semaphore_mem>> -> memref<!tpu.dma_semaphore, #tpu.memory_space<semaphore_mem>>
    tpu.wait_dma2 semaphore(%627 : memref<!tpu.dma_semaphore, #tpu.memory_space<semaphore_mem>>) src(%624 : memref<1x32xf32, #tpu.memory_space<any>>) dst(%625 : memref<1x32xf32, #tpu.memory_space<vmem>>)
    %c29_i32_492 = arith.constant 29 : i32
    %c0_i32_493 = arith.constant 0 : i32
    %628 = tpu.memref_slice %arg2[%235, %c0_i32_493] : memref<30x32xf32, #tpu.memory_space<any>> -> memref<1x32xf32, #tpu.memory_space<any>>
    %c29_i32_494 = arith.constant 29 : i32
    %c0_i32_495 = arith.constant 0 : i32
    %629 = tpu.memref_slice %arg6[%c29_i32_494, %c0_i32_495] : memref<64x32xf32, #tpu.memory_space<vmem>> -> memref<1x32xf32, #tpu.memory_space<vmem>>
    %630 = tpu.memref_slice %arg7[%c29_i32_492] : memref<64x!tpu.dma_semaphore, #tpu.memory_space<semaphore_mem>> -> memref<1x!tpu.dma_semaphore, #tpu.memory_space<semaphore_mem>>
    %631 = tpu.memref_squeeze %630 : memref<1x!tpu.dma_semaphore, #tpu.memory_space<semaphore_mem>> -> memref<!tpu.dma_semaphore, #tpu.memory_space<semaphore_mem>>
    tpu.wait_dma2 semaphore(%631 : memref<!tpu.dma_semaphore, #tpu.memory_space<semaphore_mem>>) src(%628 : memref<1x32xf32, #tpu.memory_space<any>>) dst(%629 : memref<1x32xf32, #tpu.memory_space<vmem>>)
    %c30_i32_496 = arith.constant 30 : i32
    %c0_i32_497 = arith.constant 0 : i32
    %632 = tpu.memref_slice %arg2[%243, %c0_i32_497] : memref<30x32xf32, #tpu.memory_space<any>> -> memref<1x32xf32, #tpu.memory_space<any>>
    %c30_i32_498 = arith.constant 30 : i32
    %c0_i32_499 = arith.constant 0 : i32
    %633 = tpu.memref_slice %arg6[%c30_i32_498, %c0_i32_499] : memref<64x32xf32, #tpu.memory_space<vmem>> -> memref<1x32xf32, #tpu.memory_space<vmem>>
    %634 = tpu.memref_slice %arg7[%c30_i32_496] : memref<64x!tpu.dma_semaphore, #tpu.memory_space<semaphore_mem>> -> memref<1x!tpu.dma_semaphore, #tpu.memory_space<semaphore_mem>>
    %635 = tpu.memref_squeeze %634 : memref<1x!tpu.dma_semaphore, #tpu.memory_space<semaphore_mem>> -> memref<!tpu.dma_semaphore, #tpu.memory_space<semaphore_mem>>
    tpu.wait_dma2 semaphore(%635 : memref<!tpu.dma_semaphore, #tpu.memory_space<semaphore_mem>>) src(%632 : memref<1x32xf32, #tpu.memory_space<any>>) dst(%633 : memref<1x32xf32, #tpu.memory_space<vmem>>)
    %c31_i32_500 = arith.constant 31 : i32
    %c0_i32_501 = arith.constant 0 : i32
    %636 = tpu.memref_slice %arg2[%251, %c0_i32_501] : memref<30x32xf32, #tpu.memory_space<any>> -> memref<1x32xf32, #tpu.memory_space<any>>
    %c31_i32_502 = arith.constant 31 : i32
    %c0_i32_503 = arith.constant 0 : i32
    %637 = tpu.memref_slice %arg6[%c31_i32_502, %c0_i32_503] : memref<64x32xf32, #tpu.memory_space<vmem>> -> memref<1x32xf32, #tpu.memory_space<vmem>>
    %638 = tpu.memref_slice %arg7[%c31_i32_500] : memref<64x!tpu.dma_semaphore, #tpu.memory_space<semaphore_mem>> -> memref<1x!tpu.dma_semaphore, #tpu.memory_space<semaphore_mem>>
    %639 = tpu.memref_squeeze %638 : memref<1x!tpu.dma_semaphore, #tpu.memory_space<semaphore_mem>> -> memref<!tpu.dma_semaphore, #tpu.memory_space<semaphore_mem>>
    tpu.wait_dma2 semaphore(%639 : memref<!tpu.dma_semaphore, #tpu.memory_space<semaphore_mem>>) src(%636 : memref<1x32xf32, #tpu.memory_space<any>>) dst(%637 : memref<1x32xf32, #tpu.memory_space<vmem>>)
    %c32_i32_504 = arith.constant 32 : i32
    %c0_i32_505 = arith.constant 0 : i32
    %640 = tpu.memref_slice %arg2[%259, %c0_i32_505] : memref<30x32xf32, #tpu.memory_space<any>> -> memref<1x32xf32, #tpu.memory_space<any>>
    %c32_i32_506 = arith.constant 32 : i32
    %c0_i32_507 = arith.constant 0 : i32
    %641 = tpu.memref_slice %arg6[%c32_i32_506, %c0_i32_507] : memref<64x32xf32, #tpu.memory_space<vmem>> -> memref<1x32xf32, #tpu.memory_space<vmem>>
    %642 = tpu.memref_slice %arg7[%c32_i32_504] : memref<64x!tpu.dma_semaphore, #tpu.memory_space<semaphore_mem>> -> memref<1x!tpu.dma_semaphore, #tpu.memory_space<semaphore_mem>>
    %643 = tpu.memref_squeeze %642 : memref<1x!tpu.dma_semaphore, #tpu.memory_space<semaphore_mem>> -> memref<!tpu.dma_semaphore, #tpu.memory_space<semaphore_mem>>
    tpu.wait_dma2 semaphore(%643 : memref<!tpu.dma_semaphore, #tpu.memory_space<semaphore_mem>>) src(%640 : memref<1x32xf32, #tpu.memory_space<any>>) dst(%641 : memref<1x32xf32, #tpu.memory_space<vmem>>)
    %c33_i32_508 = arith.constant 33 : i32
    %c0_i32_509 = arith.constant 0 : i32
    %644 = tpu.memref_slice %arg2[%267, %c0_i32_509] : memref<30x32xf32, #tpu.memory_space<any>> -> memref<1x32xf32, #tpu.memory_space<any>>
    %c33_i32_510 = arith.constant 33 : i32
    %c0_i32_511 = arith.constant 0 : i32
    %645 = tpu.memref_slice %arg6[%c33_i32_510, %c0_i32_511] : memref<64x32xf32, #tpu.memory_space<vmem>> -> memref<1x32xf32, #tpu.memory_space<vmem>>
    %646 = tpu.memref_slice %arg7[%c33_i32_508] : memref<64x!tpu.dma_semaphore, #tpu.memory_space<semaphore_mem>> -> memref<1x!tpu.dma_semaphore, #tpu.memory_space<semaphore_mem>>
    %647 = tpu.memref_squeeze %646 : memref<1x!tpu.dma_semaphore, #tpu.memory_space<semaphore_mem>> -> memref<!tpu.dma_semaphore, #tpu.memory_space<semaphore_mem>>
    tpu.wait_dma2 semaphore(%647 : memref<!tpu.dma_semaphore, #tpu.memory_space<semaphore_mem>>) src(%644 : memref<1x32xf32, #tpu.memory_space<any>>) dst(%645 : memref<1x32xf32, #tpu.memory_space<vmem>>)
    %c34_i32_512 = arith.constant 34 : i32
    %c0_i32_513 = arith.constant 0 : i32
    %648 = tpu.memref_slice %arg2[%275, %c0_i32_513] : memref<30x32xf32, #tpu.memory_space<any>> -> memref<1x32xf32, #tpu.memory_space<any>>
    %c34_i32_514 = arith.constant 34 : i32
    %c0_i32_515 = arith.constant 0 : i32
    %649 = tpu.memref_slice %arg6[%c34_i32_514, %c0_i32_515] : memref<64x32xf32, #tpu.memory_space<vmem>> -> memref<1x32xf32, #tpu.memory_space<vmem>>
    %650 = tpu.memref_slice %arg7[%c34_i32_512] : memref<64x!tpu.dma_semaphore, #tpu.memory_space<semaphore_mem>> -> memref<1x!tpu.dma_semaphore, #tpu.memory_space<semaphore_mem>>
    %651 = tpu.memref_squeeze %650 : memref<1x!tpu.dma_semaphore, #tpu.memory_space<semaphore_mem>> -> memref<!tpu.dma_semaphore, #tpu.memory_space<semaphore_mem>>
    tpu.wait_dma2 semaphore(%651 : memref<!tpu.dma_semaphore, #tpu.memory_space<semaphore_mem>>) src(%648 : memref<1x32xf32, #tpu.memory_space<any>>) dst(%649 : memref<1x32xf32, #tpu.memory_space<vmem>>)
    %c35_i32_516 = arith.constant 35 : i32
    %c0_i32_517 = arith.constant 0 : i32
    %652 = tpu.memref_slice %arg2[%283, %c0_i32_517] : memref<30x32xf32, #tpu.memory_space<any>> -> memref<1x32xf32, #tpu.memory_space<any>>
    %c35_i32_518 = arith.constant 35 : i32
    %c0_i32_519 = arith.constant 0 : i32
    %653 = tpu.memref_slice %arg6[%c35_i32_518, %c0_i32_519] : memref<64x32xf32, #tpu.memory_space<vmem>> -> memref<1x32xf32, #tpu.memory_space<vmem>>
    %654 = tpu.memref_slice %arg7[%c35_i32_516] : memref<64x!tpu.dma_semaphore, #tpu.memory_space<semaphore_mem>> -> memref<1x!tpu.dma_semaphore, #tpu.memory_space<semaphore_mem>>
    %655 = tpu.memref_squeeze %654 : memref<1x!tpu.dma_semaphore, #tpu.memory_space<semaphore_mem>> -> memref<!tpu.dma_semaphore, #tpu.memory_space<semaphore_mem>>
    tpu.wait_dma2 semaphore(%655 : memref<!tpu.dma_semaphore, #tpu.memory_space<semaphore_mem>>) src(%652 : memref<1x32xf32, #tpu.memory_space<any>>) dst(%653 : memref<1x32xf32, #tpu.memory_space<vmem>>)
    %c36_i32_520 = arith.constant 36 : i32
    %c0_i32_521 = arith.constant 0 : i32
    %656 = tpu.memref_slice %arg2[%291, %c0_i32_521] : memref<30x32xf32, #tpu.memory_space<any>> -> memref<1x32xf32, #tpu.memory_space<any>>
    %c36_i32_522 = arith.constant 36 : i32
    %c0_i32_523 = arith.constant 0 : i32
    %657 = tpu.memref_slice %arg6[%c36_i32_522, %c0_i32_523] : memref<64x32xf32, #tpu.memory_space<vmem>> -> memref<1x32xf32, #tpu.memory_space<vmem>>
    %658 = tpu.memref_slice %arg7[%c36_i32_520] : memref<64x!tpu.dma_semaphore, #tpu.memory_space<semaphore_mem>> -> memref<1x!tpu.dma_semaphore, #tpu.memory_space<semaphore_mem>>
    %659 = tpu.memref_squeeze %658 : memref<1x!tpu.dma_semaphore, #tpu.memory_space<semaphore_mem>> -> memref<!tpu.dma_semaphore, #tpu.memory_space<semaphore_mem>>
    tpu.wait_dma2 semaphore(%659 : memref<!tpu.dma_semaphore, #tpu.memory_space<semaphore_mem>>) src(%656 : memref<1x32xf32, #tpu.memory_space<any>>) dst(%657 : memref<1x32xf32, #tpu.memory_space<vmem>>)
    %c37_i32_524 = arith.constant 37 : i32
    %c0_i32_525 = arith.constant 0 : i32
    %660 = tpu.memref_slice %arg2[%299, %c0_i32_525] : memref<30x32xf32, #tpu.memory_space<any>> -> memref<1x32xf32, #tpu.memory_space<any>>
    %c37_i32_526 = arith.constant 37 : i32
    %c0_i32_527 = arith.constant 0 : i32
    %661 = tpu.memref_slice %arg6[%c37_i32_526, %c0_i32_527] : memref<64x32xf32, #tpu.memory_space<vmem>> -> memref<1x32xf32, #tpu.memory_space<vmem>>
    %662 = tpu.memref_slice %arg7[%c37_i32_524] : memref<64x!tpu.dma_semaphore, #tpu.memory_space<semaphore_mem>> -> memref<1x!tpu.dma_semaphore, #tpu.memory_space<semaphore_mem>>
    %663 = tpu.memref_squeeze %662 : memref<1x!tpu.dma_semaphore, #tpu.memory_space<semaphore_mem>> -> memref<!tpu.dma_semaphore, #tpu.memory_space<semaphore_mem>>
    tpu.wait_dma2 semaphore(%663 : memref<!tpu.dma_semaphore, #tpu.memory_space<semaphore_mem>>) src(%660 : memref<1x32xf32, #tpu.memory_space<any>>) dst(%661 : memref<1x32xf32, #tpu.memory_space<vmem>>)
    %c38_i32_528 = arith.constant 38 : i32
    %c0_i32_529 = arith.constant 0 : i32
    %664 = tpu.memref_slice %arg2[%307, %c0_i32_529] : memref<30x32xf32, #tpu.memory_space<any>> -> memref<1x32xf32, #tpu.memory_space<any>>
    %c38_i32_530 = arith.constant 38 : i32
    %c0_i32_531 = arith.constant 0 : i32
    %665 = tpu.memref_slice %arg6[%c38_i32_530, %c0_i32_531] : memref<64x32xf32, #tpu.memory_space<vmem>> -> memref<1x32xf32, #tpu.memory_space<vmem>>
    %666 = tpu.memref_slice %arg7[%c38_i32_528] : memref<64x!tpu.dma_semaphore, #tpu.memory_space<semaphore_mem>> -> memref<1x!tpu.dma_semaphore, #tpu.memory_space<semaphore_mem>>
    %667 = tpu.memref_squeeze %666 : memref<1x!tpu.dma_semaphore, #tpu.memory_space<semaphore_mem>> -> memref<!tpu.dma_semaphore, #tpu.memory_space<semaphore_mem>>
    tpu.wait_dma2 semaphore(%667 : memref<!tpu.dma_semaphore, #tpu.memory_space<semaphore_mem>>) src(%664 : memref<1x32xf32, #tpu.memory_space<any>>) dst(%665 : memref<1x32xf32, #tpu.memory_space<vmem>>)
    %c39_i32_532 = arith.constant 39 : i32
    %c0_i32_533 = arith.constant 0 : i32
    %668 = tpu.memref_slice %arg2[%315, %c0_i32_533] : memref<30x32xf32, #tpu.memory_space<any>> -> memref<1x32xf32, #tpu.memory_space<any>>
    %c39_i32_534 = arith.constant 39 : i32
    %c0_i32_535 = arith.constant 0 : i32
    %669 = tpu.memref_slice %arg6[%c39_i32_534, %c0_i32_535] : memref<64x32xf32, #tpu.memory_space<vmem>> -> memref<1x32xf32, #tpu.memory_space<vmem>>
    %670 = tpu.memref_slice %arg7[%c39_i32_532] : memref<64x!tpu.dma_semaphore, #tpu.memory_space<semaphore_mem>> -> memref<1x!tpu.dma_semaphore, #tpu.memory_space<semaphore_mem>>
    %671 = tpu.memref_squeeze %670 : memref<1x!tpu.dma_semaphore, #tpu.memory_space<semaphore_mem>> -> memref<!tpu.dma_semaphore, #tpu.memory_space<semaphore_mem>>
    tpu.wait_dma2 semaphore(%671 : memref<!tpu.dma_semaphore, #tpu.memory_space<semaphore_mem>>) src(%668 : memref<1x32xf32, #tpu.memory_space<any>>) dst(%669 : memref<1x32xf32, #tpu.memory_space<vmem>>)
    %c40_i32_536 = arith.constant 40 : i32
    %c0_i32_537 = arith.constant 0 : i32
    %672 = tpu.memref_slice %arg2[%323, %c0_i32_537] : memref<30x32xf32, #tpu.memory_space<any>> -> memref<1x32xf32, #tpu.memory_space<any>>
    %c40_i32_538 = arith.constant 40 : i32
    %c0_i32_539 = arith.constant 0 : i32
    %673 = tpu.memref_slice %arg6[%c40_i32_538, %c0_i32_539] : memref<64x32xf32, #tpu.memory_space<vmem>> -> memref<1x32xf32, #tpu.memory_space<vmem>>
    %674 = tpu.memref_slice %arg7[%c40_i32_536] : memref<64x!tpu.dma_semaphore, #tpu.memory_space<semaphore_mem>> -> memref<1x!tpu.dma_semaphore, #tpu.memory_space<semaphore_mem>>
    %675 = tpu.memref_squeeze %674 : memref<1x!tpu.dma_semaphore, #tpu.memory_space<semaphore_mem>> -> memref<!tpu.dma_semaphore, #tpu.memory_space<semaphore_mem>>
    tpu.wait_dma2 semaphore(%675 : memref<!tpu.dma_semaphore, #tpu.memory_space<semaphore_mem>>) src(%672 : memref<1x32xf32, #tpu.memory_space<any>>) dst(%673 : memref<1x32xf32, #tpu.memory_space<vmem>>)
    %c41_i32_540 = arith.constant 41 : i32
    %c0_i32_541 = arith.constant 0 : i32
    %676 = tpu.memref_slice %arg2[%331, %c0_i32_541] : memref<30x32xf32, #tpu.memory_space<any>> -> memref<1x32xf32, #tpu.memory_space<any>>
    %c41_i32_542 = arith.constant 41 : i32
    %c0_i32_543 = arith.constant 0 : i32
    %677 = tpu.memref_slice %arg6[%c41_i32_542, %c0_i32_543] : memref<64x32xf32, #tpu.memory_space<vmem>> -> memref<1x32xf32, #tpu.memory_space<vmem>>
    %678 = tpu.memref_slice %arg7[%c41_i32_540] : memref<64x!tpu.dma_semaphore, #tpu.memory_space<semaphore_mem>> -> memref<1x!tpu.dma_semaphore, #tpu.memory_space<semaphore_mem>>
    %679 = tpu.memref_squeeze %678 : memref<1x!tpu.dma_semaphore, #tpu.memory_space<semaphore_mem>> -> memref<!tpu.dma_semaphore, #tpu.memory_space<semaphore_mem>>
    tpu.wait_dma2 semaphore(%679 : memref<!tpu.dma_semaphore, #tpu.memory_space<semaphore_mem>>) src(%676 : memref<1x32xf32, #tpu.memory_space<any>>) dst(%677 : memref<1x32xf32, #tpu.memory_space<vmem>>)
    %c42_i32_544 = arith.constant 42 : i32
    %c0_i32_545 = arith.constant 0 : i32
    %680 = tpu.memref_slice %arg2[%339, %c0_i32_545] : memref<30x32xf32, #tpu.memory_space<any>> -> memref<1x32xf32, #tpu.memory_space<any>>
    %c42_i32_546 = arith.constant 42 : i32
    %c0_i32_547 = arith.constant 0 : i32
    %681 = tpu.memref_slice %arg6[%c42_i32_546, %c0_i32_547] : memref<64x32xf32, #tpu.memory_space<vmem>> -> memref<1x32xf32, #tpu.memory_space<vmem>>
    %682 = tpu.memref_slice %arg7[%c42_i32_544] : memref<64x!tpu.dma_semaphore, #tpu.memory_space<semaphore_mem>> -> memref<1x!tpu.dma_semaphore, #tpu.memory_space<semaphore_mem>>
    %683 = tpu.memref_squeeze %682 : memref<1x!tpu.dma_semaphore, #tpu.memory_space<semaphore_mem>> -> memref<!tpu.dma_semaphore, #tpu.memory_space<semaphore_mem>>
    tpu.wait_dma2 semaphore(%683 : memref<!tpu.dma_semaphore, #tpu.memory_space<semaphore_mem>>) src(%680 : memref<1x32xf32, #tpu.memory_space<any>>) dst(%681 : memref<1x32xf32, #tpu.memory_space<vmem>>)
    %c43_i32_548 = arith.constant 43 : i32
    %c0_i32_549 = arith.constant 0 : i32
    %684 = tpu.memref_slice %arg2[%347, %c0_i32_549] : memref<30x32xf32, #tpu.memory_space<any>> -> memref<1x32xf32, #tpu.memory_space<any>>
    %c43_i32_550 = arith.constant 43 : i32
    %c0_i32_551 = arith.constant 0 : i32
    %685 = tpu.memref_slice %arg6[%c43_i32_550, %c0_i32_551] : memref<64x32xf32, #tpu.memory_space<vmem>> -> memref<1x32xf32, #tpu.memory_space<vmem>>
    %686 = tpu.memref_slice %arg7[%c43_i32_548] : memref<64x!tpu.dma_semaphore, #tpu.memory_space<semaphore_mem>> -> memref<1x!tpu.dma_semaphore, #tpu.memory_space<semaphore_mem>>
    %687 = tpu.memref_squeeze %686 : memref<1x!tpu.dma_semaphore, #tpu.memory_space<semaphore_mem>> -> memref<!tpu.dma_semaphore, #tpu.memory_space<semaphore_mem>>
    tpu.wait_dma2 semaphore(%687 : memref<!tpu.dma_semaphore, #tpu.memory_space<semaphore_mem>>) src(%684 : memref<1x32xf32, #tpu.memory_space<any>>) dst(%685 : memref<1x32xf32, #tpu.memory_space<vmem>>)
    %c44_i32_552 = arith.constant 44 : i32
    %c0_i32_553 = arith.constant 0 : i32
    %688 = tpu.memref_slice %arg2[%355, %c0_i32_553] : memref<30x32xf32, #tpu.memory_space<any>> -> memref<1x32xf32, #tpu.memory_space<any>>
    %c44_i32_554 = arith.constant 44 : i32
    %c0_i32_555 = arith.constant 0 : i32
    %689 = tpu.memref_slice %arg6[%c44_i32_554, %c0_i32_555] : memref<64x32xf32, #tpu.memory_space<vmem>> -> memref<1x32xf32, #tpu.memory_space<vmem>>
    %690 = tpu.memref_slice %arg7[%c44_i32_552] : memref<64x!tpu.dma_semaphore, #tpu.memory_space<semaphore_mem>> -> memref<1x!tpu.dma_semaphore, #tpu.memory_space<semaphore_mem>>
    %691 = tpu.memref_squeeze %690 : memref<1x!tpu.dma_semaphore, #tpu.memory_space<semaphore_mem>> -> memref<!tpu.dma_semaphore, #tpu.memory_space<semaphore_mem>>
    tpu.wait_dma2 semaphore(%691 : memref<!tpu.dma_semaphore, #tpu.memory_space<semaphore_mem>>) src(%688 : memref<1x32xf32, #tpu.memory_space<any>>) dst(%689 : memref<1x32xf32, #tpu.memory_space<vmem>>)
    %c45_i32_556 = arith.constant 45 : i32
    %c0_i32_557 = arith.constant 0 : i32
    %692 = tpu.memref_slice %arg2[%363, %c0_i32_557] : memref<30x32xf32, #tpu.memory_space<any>> -> memref<1x32xf32, #tpu.memory_space<any>>
    %c45_i32_558 = arith.constant 45 : i32
    %c0_i32_559 = arith.constant 0 : i32
    %693 = tpu.memref_slice %arg6[%c45_i32_558, %c0_i32_559] : memref<64x32xf32, #tpu.memory_space<vmem>> -> memref<1x32xf32, #tpu.memory_space<vmem>>
    %694 = tpu.memref_slice %arg7[%c45_i32_556] : memref<64x!tpu.dma_semaphore, #tpu.memory_space<semaphore_mem>> -> memref<1x!tpu.dma_semaphore, #tpu.memory_space<semaphore_mem>>
    %695 = tpu.memref_squeeze %694 : memref<1x!tpu.dma_semaphore, #tpu.memory_space<semaphore_mem>> -> memref<!tpu.dma_semaphore, #tpu.memory_space<semaphore_mem>>
    tpu.wait_dma2 semaphore(%695 : memref<!tpu.dma_semaphore, #tpu.memory_space<semaphore_mem>>) src(%692 : memref<1x32xf32, #tpu.memory_space<any>>) dst(%693 : memref<1x32xf32, #tpu.memory_space<vmem>>)
    %c46_i32_560 = arith.constant 46 : i32
    %c0_i32_561 = arith.constant 0 : i32
    %696 = tpu.memref_slice %arg2[%371, %c0_i32_561] : memref<30x32xf32, #tpu.memory_space<any>> -> memref<1x32xf32, #tpu.memory_space<any>>
    %c46_i32_562 = arith.constant 46 : i32
    %c0_i32_563 = arith.constant 0 : i32
    %697 = tpu.memref_slice %arg6[%c46_i32_562, %c0_i32_563] : memref<64x32xf32, #tpu.memory_space<vmem>> -> memref<1x32xf32, #tpu.memory_space<vmem>>
    %698 = tpu.memref_slice %arg7[%c46_i32_560] : memref<64x!tpu.dma_semaphore, #tpu.memory_space<semaphore_mem>> -> memref<1x!tpu.dma_semaphore, #tpu.memory_space<semaphore_mem>>
    %699 = tpu.memref_squeeze %698 : memref<1x!tpu.dma_semaphore, #tpu.memory_space<semaphore_mem>> -> memref<!tpu.dma_semaphore, #tpu.memory_space<semaphore_mem>>
    tpu.wait_dma2 semaphore(%699 : memref<!tpu.dma_semaphore, #tpu.memory_space<semaphore_mem>>) src(%696 : memref<1x32xf32, #tpu.memory_space<any>>) dst(%697 : memref<1x32xf32, #tpu.memory_space<vmem>>)
    %c47_i32_564 = arith.constant 47 : i32
    %c0_i32_565 = arith.constant 0 : i32
    %700 = tpu.memref_slice %arg2[%379, %c0_i32_565] : memref<30x32xf32, #tpu.memory_space<any>> -> memref<1x32xf32, #tpu.memory_space<any>>
    %c47_i32_566 = arith.constant 47 : i32
    %c0_i32_567 = arith.constant 0 : i32
    %701 = tpu.memref_slice %arg6[%c47_i32_566, %c0_i32_567] : memref<64x32xf32, #tpu.memory_space<vmem>> -> memref<1x32xf32, #tpu.memory_space<vmem>>
    %702 = tpu.memref_slice %arg7[%c47_i32_564] : memref<64x!tpu.dma_semaphore, #tpu.memory_space<semaphore_mem>> -> memref<1x!tpu.dma_semaphore, #tpu.memory_space<semaphore_mem>>
    %703 = tpu.memref_squeeze %702 : memref<1x!tpu.dma_semaphore, #tpu.memory_space<semaphore_mem>> -> memref<!tpu.dma_semaphore, #tpu.memory_space<semaphore_mem>>
    tpu.wait_dma2 semaphore(%703 : memref<!tpu.dma_semaphore, #tpu.memory_space<semaphore_mem>>) src(%700 : memref<1x32xf32, #tpu.memory_space<any>>) dst(%701 : memref<1x32xf32, #tpu.memory_space<vmem>>)
    %c48_i32_568 = arith.constant 48 : i32
    %c0_i32_569 = arith.constant 0 : i32
    %704 = tpu.memref_slice %arg2[%387, %c0_i32_569] : memref<30x32xf32, #tpu.memory_space<any>> -> memref<1x32xf32, #tpu.memory_space<any>>
    %c48_i32_570 = arith.constant 48 : i32
    %c0_i32_571 = arith.constant 0 : i32
    %705 = tpu.memref_slice %arg6[%c48_i32_570, %c0_i32_571] : memref<64x32xf32, #tpu.memory_space<vmem>> -> memref<1x32xf32, #tpu.memory_space<vmem>>
    %706 = tpu.memref_slice %arg7[%c48_i32_568] : memref<64x!tpu.dma_semaphore, #tpu.memory_space<semaphore_mem>> -> memref<1x!tpu.dma_semaphore, #tpu.memory_space<semaphore_mem>>
    %707 = tpu.memref_squeeze %706 : memref<1x!tpu.dma_semaphore, #tpu.memory_space<semaphore_mem>> -> memref<!tpu.dma_semaphore, #tpu.memory_space<semaphore_mem>>
    tpu.wait_dma2 semaphore(%707 : memref<!tpu.dma_semaphore, #tpu.memory_space<semaphore_mem>>) src(%704 : memref<1x32xf32, #tpu.memory_space<any>>) dst(%705 : memref<1x32xf32, #tpu.memory_space<vmem>>)
    %c49_i32_572 = arith.constant 49 : i32
    %c0_i32_573 = arith.constant 0 : i32
    %708 = tpu.memref_slice %arg2[%395, %c0_i32_573] : memref<30x32xf32, #tpu.memory_space<any>> -> memref<1x32xf32, #tpu.memory_space<any>>
    %c49_i32_574 = arith.constant 49 : i32
    %c0_i32_575 = arith.constant 0 : i32
    %709 = tpu.memref_slice %arg6[%c49_i32_574, %c0_i32_575] : memref<64x32xf32, #tpu.memory_space<vmem>> -> memref<1x32xf32, #tpu.memory_space<vmem>>
    %710 = tpu.memref_slice %arg7[%c49_i32_572] : memref<64x!tpu.dma_semaphore, #tpu.memory_space<semaphore_mem>> -> memref<1x!tpu.dma_semaphore, #tpu.memory_space<semaphore_mem>>
    %711 = tpu.memref_squeeze %710 : memref<1x!tpu.dma_semaphore, #tpu.memory_space<semaphore_mem>> -> memref<!tpu.dma_semaphore, #tpu.memory_space<semaphore_mem>>
    tpu.wait_dma2 semaphore(%711 : memref<!tpu.dma_semaphore, #tpu.memory_space<semaphore_mem>>) src(%708 : memref<1x32xf32, #tpu.memory_space<any>>) dst(%709 : memref<1x32xf32, #tpu.memory_space<vmem>>)
    %c50_i32_576 = arith.constant 50 : i32
    %c0_i32_577 = arith.constant 0 : i32
    %712 = tpu.memref_slice %arg2[%403, %c0_i32_577] : memref<30x32xf32, #tpu.memory_space<any>> -> memref<1x32xf32, #tpu.memory_space<any>>
    %c50_i32_578 = arith.constant 50 : i32
    %c0_i32_579 = arith.constant 0 : i32
    %713 = tpu.memref_slice %arg6[%c50_i32_578, %c0_i32_579] : memref<64x32xf32, #tpu.memory_space<vmem>> -> memref<1x32xf32, #tpu.memory_space<vmem>>
    %714 = tpu.memref_slice %arg7[%c50_i32_576] : memref<64x!tpu.dma_semaphore, #tpu.memory_space<semaphore_mem>> -> memref<1x!tpu.dma_semaphore, #tpu.memory_space<semaphore_mem>>
    %715 = tpu.memref_squeeze %714 : memref<1x!tpu.dma_semaphore, #tpu.memory_space<semaphore_mem>> -> memref<!tpu.dma_semaphore, #tpu.memory_space<semaphore_mem>>
    tpu.wait_dma2 semaphore(%715 : memref<!tpu.dma_semaphore, #tpu.memory_space<semaphore_mem>>) src(%712 : memref<1x32xf32, #tpu.memory_space<any>>) dst(%713 : memref<1x32xf32, #tpu.memory_space<vmem>>)
    %c51_i32_580 = arith.constant 51 : i32
    %c0_i32_581 = arith.constant 0 : i32
    %716 = tpu.memref_slice %arg2[%411, %c0_i32_581] : memref<30x32xf32, #tpu.memory_space<any>> -> memref<1x32xf32, #tpu.memory_space<any>>
    %c51_i32_582 = arith.constant 51 : i32
    %c0_i32_583 = arith.constant 0 : i32
    %717 = tpu.memref_slice %arg6[%c51_i32_582, %c0_i32_583] : memref<64x32xf32, #tpu.memory_space<vmem>> -> memref<1x32xf32, #tpu.memory_space<vmem>>
    %718 = tpu.memref_slice %arg7[%c51_i32_580] : memref<64x!tpu.dma_semaphore, #tpu.memory_space<semaphore_mem>> -> memref<1x!tpu.dma_semaphore, #tpu.memory_space<semaphore_mem>>
    %719 = tpu.memref_squeeze %718 : memref<1x!tpu.dma_semaphore, #tpu.memory_space<semaphore_mem>> -> memref<!tpu.dma_semaphore, #tpu.memory_space<semaphore_mem>>
    tpu.wait_dma2 semaphore(%719 : memref<!tpu.dma_semaphore, #tpu.memory_space<semaphore_mem>>) src(%716 : memref<1x32xf32, #tpu.memory_space<any>>) dst(%717 : memref<1x32xf32, #tpu.memory_space<vmem>>)
    %c52_i32_584 = arith.constant 52 : i32
    %c0_i32_585 = arith.constant 0 : i32
    %720 = tpu.memref_slice %arg2[%419, %c0_i32_585] : memref<30x32xf32, #tpu.memory_space<any>> -> memref<1x32xf32, #tpu.memory_space<any>>
    %c52_i32_586 = arith.constant 52 : i32
    %c0_i32_587 = arith.constant 0 : i32
    %721 = tpu.memref_slice %arg6[%c52_i32_586, %c0_i32_587] : memref<64x32xf32, #tpu.memory_space<vmem>> -> memref<1x32xf32, #tpu.memory_space<vmem>>
    %722 = tpu.memref_slice %arg7[%c52_i32_584] : memref<64x!tpu.dma_semaphore, #tpu.memory_space<semaphore_mem>> -> memref<1x!tpu.dma_semaphore, #tpu.memory_space<semaphore_mem>>
    %723 = tpu.memref_squeeze %722 : memref<1x!tpu.dma_semaphore, #tpu.memory_space<semaphore_mem>> -> memref<!tpu.dma_semaphore, #tpu.memory_space<semaphore_mem>>
    tpu.wait_dma2 semaphore(%723 : memref<!tpu.dma_semaphore, #tpu.memory_space<semaphore_mem>>) src(%720 : memref<1x32xf32, #tpu.memory_space<any>>) dst(%721 : memref<1x32xf32, #tpu.memory_space<vmem>>)
    %c53_i32_588 = arith.constant 53 : i32
    %c0_i32_589 = arith.constant 0 : i32
    %724 = tpu.memref_slice %arg2[%427, %c0_i32_589] : memref<30x32xf32, #tpu.memory_space<any>> -> memref<1x32xf32, #tpu.memory_space<any>>
    %c53_i32_590 = arith.constant 53 : i32
    %c0_i32_591 = arith.constant 0 : i32
    %725 = tpu.memref_slice %arg6[%c53_i32_590, %c0_i32_591] : memref<64x32xf32, #tpu.memory_space<vmem>> -> memref<1x32xf32, #tpu.memory_space<vmem>>
    %726 = tpu.memref_slice %arg7[%c53_i32_588] : memref<64x!tpu.dma_semaphore, #tpu.memory_space<semaphore_mem>> -> memref<1x!tpu.dma_semaphore, #tpu.memory_space<semaphore_mem>>
    %727 = tpu.memref_squeeze %726 : memref<1x!tpu.dma_semaphore, #tpu.memory_space<semaphore_mem>> -> memref<!tpu.dma_semaphore, #tpu.memory_space<semaphore_mem>>
    tpu.wait_dma2 semaphore(%727 : memref<!tpu.dma_semaphore, #tpu.memory_space<semaphore_mem>>) src(%724 : memref<1x32xf32, #tpu.memory_space<any>>) dst(%725 : memref<1x32xf32, #tpu.memory_space<vmem>>)
    %c54_i32_592 = arith.constant 54 : i32
    %c0_i32_593 = arith.constant 0 : i32
    %728 = tpu.memref_slice %arg2[%435, %c0_i32_593] : memref<30x32xf32, #tpu.memory_space<any>> -> memref<1x32xf32, #tpu.memory_space<any>>
    %c54_i32_594 = arith.constant 54 : i32
    %c0_i32_595 = arith.constant 0 : i32
    %729 = tpu.memref_slice %arg6[%c54_i32_594, %c0_i32_595] : memref<64x32xf32, #tpu.memory_space<vmem>> -> memref<1x32xf32, #tpu.memory_space<vmem>>
    %730 = tpu.memref_slice %arg7[%c54_i32_592] : memref<64x!tpu.dma_semaphore, #tpu.memory_space<semaphore_mem>> -> memref<1x!tpu.dma_semaphore, #tpu.memory_space<semaphore_mem>>
    %731 = tpu.memref_squeeze %730 : memref<1x!tpu.dma_semaphore, #tpu.memory_space<semaphore_mem>> -> memref<!tpu.dma_semaphore, #tpu.memory_space<semaphore_mem>>
    tpu.wait_dma2 semaphore(%731 : memref<!tpu.dma_semaphore, #tpu.memory_space<semaphore_mem>>) src(%728 : memref<1x32xf32, #tpu.memory_space<any>>) dst(%729 : memref<1x32xf32, #tpu.memory_space<vmem>>)
    %c55_i32_596 = arith.constant 55 : i32
    %c0_i32_597 = arith.constant 0 : i32
    %732 = tpu.memref_slice %arg2[%443, %c0_i32_597] : memref<30x32xf32, #tpu.memory_space<any>> -> memref<1x32xf32, #tpu.memory_space<any>>
    %c55_i32_598 = arith.constant 55 : i32
    %c0_i32_599 = arith.constant 0 : i32
    %733 = tpu.memref_slice %arg6[%c55_i32_598, %c0_i32_599] : memref<64x32xf32, #tpu.memory_space<vmem>> -> memref<1x32xf32, #tpu.memory_space<vmem>>
    %734 = tpu.memref_slice %arg7[%c55_i32_596] : memref<64x!tpu.dma_semaphore, #tpu.memory_space<semaphore_mem>> -> memref<1x!tpu.dma_semaphore, #tpu.memory_space<semaphore_mem>>
    %735 = tpu.memref_squeeze %734 : memref<1x!tpu.dma_semaphore, #tpu.memory_space<semaphore_mem>> -> memref<!tpu.dma_semaphore, #tpu.memory_space<semaphore_mem>>
    tpu.wait_dma2 semaphore(%735 : memref<!tpu.dma_semaphore, #tpu.memory_space<semaphore_mem>>) src(%732 : memref<1x32xf32, #tpu.memory_space<any>>) dst(%733 : memref<1x32xf32, #tpu.memory_space<vmem>>)
    %c56_i32_600 = arith.constant 56 : i32
    %c0_i32_601 = arith.constant 0 : i32
    %736 = tpu.memref_slice %arg2[%451, %c0_i32_601] : memref<30x32xf32, #tpu.memory_space<any>> -> memref<1x32xf32, #tpu.memory_space<any>>
    %c56_i32_602 = arith.constant 56 : i32
    %c0_i32_603 = arith.constant 0 : i32
    %737 = tpu.memref_slice %arg6[%c56_i32_602, %c0_i32_603] : memref<64x32xf32, #tpu.memory_space<vmem>> -> memref<1x32xf32, #tpu.memory_space<vmem>>
    %738 = tpu.memref_slice %arg7[%c56_i32_600] : memref<64x!tpu.dma_semaphore, #tpu.memory_space<semaphore_mem>> -> memref<1x!tpu.dma_semaphore, #tpu.memory_space<semaphore_mem>>
    %739 = tpu.memref_squeeze %738 : memref<1x!tpu.dma_semaphore, #tpu.memory_space<semaphore_mem>> -> memref<!tpu.dma_semaphore, #tpu.memory_space<semaphore_mem>>
    tpu.wait_dma2 semaphore(%739 : memref<!tpu.dma_semaphore, #tpu.memory_space<semaphore_mem>>) src(%736 : memref<1x32xf32, #tpu.memory_space<any>>) dst(%737 : memref<1x32xf32, #tpu.memory_space<vmem>>)
    %c57_i32_604 = arith.constant 57 : i32
    %c0_i32_605 = arith.constant 0 : i32
    %740 = tpu.memref_slice %arg2[%459, %c0_i32_605] : memref<30x32xf32, #tpu.memory_space<any>> -> memref<1x32xf32, #tpu.memory_space<any>>
    %c57_i32_606 = arith.constant 57 : i32
    %c0_i32_607 = arith.constant 0 : i32
    %741 = tpu.memref_slice %arg6[%c57_i32_606, %c0_i32_607] : memref<64x32xf32, #tpu.memory_space<vmem>> -> memref<1x32xf32, #tpu.memory_space<vmem>>
    %742 = tpu.memref_slice %arg7[%c57_i32_604] : memref<64x!tpu.dma_semaphore, #tpu.memory_space<semaphore_mem>> -> memref<1x!tpu.dma_semaphore, #tpu.memory_space<semaphore_mem>>
    %743 = tpu.memref_squeeze %742 : memref<1x!tpu.dma_semaphore, #tpu.memory_space<semaphore_mem>> -> memref<!tpu.dma_semaphore, #tpu.memory_space<semaphore_mem>>
    tpu.wait_dma2 semaphore(%743 : memref<!tpu.dma_semaphore, #tpu.memory_space<semaphore_mem>>) src(%740 : memref<1x32xf32, #tpu.memory_space<any>>) dst(%741 : memref<1x32xf32, #tpu.memory_space<vmem>>)
    %c58_i32_608 = arith.constant 58 : i32
    %c0_i32_609 = arith.constant 0 : i32
    %744 = tpu.memref_slice %arg2[%467, %c0_i32_609] : memref<30x32xf32, #tpu.memory_space<any>> -> memref<1x32xf32, #tpu.memory_space<any>>
    %c58_i32_610 = arith.constant 58 : i32
    %c0_i32_611 = arith.constant 0 : i32
    %745 = tpu.memref_slice %arg6[%c58_i32_610, %c0_i32_611] : memref<64x32xf32, #tpu.memory_space<vmem>> -> memref<1x32xf32, #tpu.memory_space<vmem>>
    %746 = tpu.memref_slice %arg7[%c58_i32_608] : memref<64x!tpu.dma_semaphore, #tpu.memory_space<semaphore_mem>> -> memref<1x!tpu.dma_semaphore, #tpu.memory_space<semaphore_mem>>
    %747 = tpu.memref_squeeze %746 : memref<1x!tpu.dma_semaphore, #tpu.memory_space<semaphore_mem>> -> memref<!tpu.dma_semaphore, #tpu.memory_space<semaphore_mem>>
    tpu.wait_dma2 semaphore(%747 : memref<!tpu.dma_semaphore, #tpu.memory_space<semaphore_mem>>) src(%744 : memref<1x32xf32, #tpu.memory_space<any>>) dst(%745 : memref<1x32xf32, #tpu.memory_space<vmem>>)
    %c59_i32_612 = arith.constant 59 : i32
    %c0_i32_613 = arith.constant 0 : i32
    %748 = tpu.memref_slice %arg2[%475, %c0_i32_613] : memref<30x32xf32, #tpu.memory_space<any>> -> memref<1x32xf32, #tpu.memory_space<any>>
    %c59_i32_614 = arith.constant 59 : i32
    %c0_i32_615 = arith.constant 0 : i32
    %749 = tpu.memref_slice %arg6[%c59_i32_614, %c0_i32_615] : memref<64x32xf32, #tpu.memory_space<vmem>> -> memref<1x32xf32, #tpu.memory_space<vmem>>
    %750 = tpu.memref_slice %arg7[%c59_i32_612] : memref<64x!tpu.dma_semaphore, #tpu.memory_space<semaphore_mem>> -> memref<1x!tpu.dma_semaphore, #tpu.memory_space<semaphore_mem>>
    %751 = tpu.memref_squeeze %750 : memref<1x!tpu.dma_semaphore, #tpu.memory_space<semaphore_mem>> -> memref<!tpu.dma_semaphore, #tpu.memory_space<semaphore_mem>>
    tpu.wait_dma2 semaphore(%751 : memref<!tpu.dma_semaphore, #tpu.memory_space<semaphore_mem>>) src(%748 : memref<1x32xf32, #tpu.memory_space<any>>) dst(%749 : memref<1x32xf32, #tpu.memory_space<vmem>>)
    %c60_i32_616 = arith.constant 60 : i32
    %c0_i32_617 = arith.constant 0 : i32
    %752 = tpu.memref_slice %arg2[%483, %c0_i32_617] : memref<30x32xf32, #tpu.memory_space<any>> -> memref<1x32xf32, #tpu.memory_space<any>>
    %c60_i32_618 = arith.constant 60 : i32
    %c0_i32_619 = arith.constant 0 : i32
    %753 = tpu.memref_slice %arg6[%c60_i32_618, %c0_i32_619] : memref<64x32xf32, #tpu.memory_space<vmem>> -> memref<1x32xf32, #tpu.memory_space<vmem>>
    %754 = tpu.memref_slice %arg7[%c60_i32_616] : memref<64x!tpu.dma_semaphore, #tpu.memory_space<semaphore_mem>> -> memref<1x!tpu.dma_semaphore, #tpu.memory_space<semaphore_mem>>
    %755 = tpu.memref_squeeze %754 : memref<1x!tpu.dma_semaphore, #tpu.memory_space<semaphore_mem>> -> memref<!tpu.dma_semaphore, #tpu.memory_space<semaphore_mem>>
    tpu.wait_dma2 semaphore(%755 : memref<!tpu.dma_semaphore, #tpu.memory_space<semaphore_mem>>) src(%752 : memref<1x32xf32, #tpu.memory_space<any>>) dst(%753 : memref<1x32xf32, #tpu.memory_space<vmem>>)
    %c61_i32_620 = arith.constant 61 : i32
    %c0_i32_621 = arith.constant 0 : i32
    %756 = tpu.memref_slice %arg2[%491, %c0_i32_621] : memref<30x32xf32, #tpu.memory_space<any>> -> memref<1x32xf32, #tpu.memory_space<any>>
    %c61_i32_622 = arith.constant 61 : i32
    %c0_i32_623 = arith.constant 0 : i32
    %757 = tpu.memref_slice %arg6[%c61_i32_622, %c0_i32_623] : memref<64x32xf32, #tpu.memory_space<vmem>> -> memref<1x32xf32, #tpu.memory_space<vmem>>
    %758 = tpu.memref_slice %arg7[%c61_i32_620] : memref<64x!tpu.dma_semaphore, #tpu.memory_space<semaphore_mem>> -> memref<1x!tpu.dma_semaphore, #tpu.memory_space<semaphore_mem>>
    %759 = tpu.memref_squeeze %758 : memref<1x!tpu.dma_semaphore, #tpu.memory_space<semaphore_mem>> -> memref<!tpu.dma_semaphore, #tpu.memory_space<semaphore_mem>>
    tpu.wait_dma2 semaphore(%759 : memref<!tpu.dma_semaphore, #tpu.memory_space<semaphore_mem>>) src(%756 : memref<1x32xf32, #tpu.memory_space<any>>) dst(%757 : memref<1x32xf32, #tpu.memory_space<vmem>>)
    %c62_i32_624 = arith.constant 62 : i32
    %c0_i32_625 = arith.constant 0 : i32
    %760 = tpu.memref_slice %arg2[%499, %c0_i32_625] : memref<30x32xf32, #tpu.memory_space<any>> -> memref<1x32xf32, #tpu.memory_space<any>>
    %c62_i32_626 = arith.constant 62 : i32
    %c0_i32_627 = arith.constant 0 : i32
    %761 = tpu.memref_slice %arg6[%c62_i32_626, %c0_i32_627] : memref<64x32xf32, #tpu.memory_space<vmem>> -> memref<1x32xf32, #tpu.memory_space<vmem>>
    %762 = tpu.memref_slice %arg7[%c62_i32_624] : memref<64x!tpu.dma_semaphore, #tpu.memory_space<semaphore_mem>> -> memref<1x!tpu.dma_semaphore, #tpu.memory_space<semaphore_mem>>
    %763 = tpu.memref_squeeze %762 : memref<1x!tpu.dma_semaphore, #tpu.memory_space<semaphore_mem>> -> memref<!tpu.dma_semaphore, #tpu.memory_space<semaphore_mem>>
    tpu.wait_dma2 semaphore(%763 : memref<!tpu.dma_semaphore, #tpu.memory_space<semaphore_mem>>) src(%760 : memref<1x32xf32, #tpu.memory_space<any>>) dst(%761 : memref<1x32xf32, #tpu.memory_space<vmem>>)
    %c63_i32_628 = arith.constant 63 : i32
    %c0_i32_629 = arith.constant 0 : i32
    %764 = tpu.memref_slice %arg2[%507, %c0_i32_629] : memref<30x32xf32, #tpu.memory_space<any>> -> memref<1x32xf32, #tpu.memory_space<any>>
    %c63_i32_630 = arith.constant 63 : i32
    %c0_i32_631 = arith.constant 0 : i32
    %765 = tpu.memref_slice %arg6[%c63_i32_630, %c0_i32_631] : memref<64x32xf32, #tpu.memory_space<vmem>> -> memref<1x32xf32, #tpu.memory_space<vmem>>
    %766 = tpu.memref_slice %arg7[%c63_i32_628] : memref<64x!tpu.dma_semaphore, #tpu.memory_space<semaphore_mem>> -> memref<1x!tpu.dma_semaphore, #tpu.memory_space<semaphore_mem>>
    %767 = tpu.memref_squeeze %766 : memref<1x!tpu.dma_semaphore, #tpu.memory_space<semaphore_mem>> -> memref<!tpu.dma_semaphore, #tpu.memory_space<semaphore_mem>>
    tpu.wait_dma2 semaphore(%767 : memref<!tpu.dma_semaphore, #tpu.memory_space<semaphore_mem>>) src(%764 : memref<1x32xf32, #tpu.memory_space<any>>) dst(%765 : memref<1x32xf32, #tpu.memory_space<vmem>>)
    %c0_632 = arith.constant 0 : index
    %c0_633 = arith.constant 0 : index
    %768 = vector.load %arg6[%c0_632, %c0_633] : memref<64x32xf32, #tpu.memory_space<vmem>>, vector<8x32xf32>
    %c8 = arith.constant 8 : index
    %c0_634 = arith.constant 0 : index
    %769 = vector.load %arg6[%c8, %c0_634] : memref<64x32xf32, #tpu.memory_space<vmem>>, vector<8x32xf32>
    %770 = arith.addf %768, %769 : vector<8x32xf32>
    %c16 = arith.constant 16 : index
    %c0_635 = arith.constant 0 : index
    %771 = vector.load %arg6[%c16, %c0_635] : memref<64x32xf32, #tpu.memory_space<vmem>>, vector<8x32xf32>
    %772 = arith.addf %770, %771 : vector<8x32xf32>
    %c24 = arith.constant 24 : index
    %c0_636 = arith.constant 0 : index
    %773 = vector.load %arg6[%c24, %c0_636] : memref<64x32xf32, #tpu.memory_space<vmem>>, vector<8x32xf32>
    %774 = arith.addf %772, %773 : vector<8x32xf32>
    %c32 = arith.constant 32 : index
    %c0_637 = arith.constant 0 : index
    %775 = vector.load %arg6[%c32, %c0_637] : memref<64x32xf32, #tpu.memory_space<vmem>>, vector<8x32xf32>
    %776 = arith.addf %774, %775 : vector<8x32xf32>
    %c40 = arith.constant 40 : index
    %c0_638 = arith.constant 0 : index
    %777 = vector.load %arg6[%c40, %c0_638] : memref<64x32xf32, #tpu.memory_space<vmem>>, vector<8x32xf32>
    %778 = arith.addf %776, %777 : vector<8x32xf32>
    %c48 = arith.constant 48 : index
    %c0_639 = arith.constant 0 : index
    %779 = vector.load %arg6[%c48, %c0_639] : memref<64x32xf32, #tpu.memory_space<vmem>>, vector<8x32xf32>
    %780 = arith.addf %778, %779 : vector<8x32xf32>
    %c56 = arith.constant 56 : index
    %c0_640 = arith.constant 0 : index
    %781 = vector.load %arg6[%c56, %c0_640] : memref<64x32xf32, #tpu.memory_space<vmem>>, vector<8x32xf32>
    %782 = arith.addf %780, %781 : vector<8x32xf32>
    %cst = arith.constant 1.250000e-01 : f32
    %783 = vector.broadcast %cst : f32 to vector<8x32xf32>
    %784 = arith.mulf %782, %783 : vector<8x32xf32>
    %785 = arith.truncf %784 : vector<8x32xf32> to vector<8x32xbf16>
    %c0_641 = arith.constant 0 : index
    %c0_642 = arith.constant 0 : index
    %786 = vector.load %arg3[%c0_641, %c0_642] : memref<32x8xf32, #tpu.memory_space<vmem>>, vector<32x8xf32>
    %787 = arith.truncf %786 : vector<32x8xf32> to vector<32x8xbf16>
    %cst_643 = arith.constant dense<0.000000e+00> : vector<8x8xf32>
    %788 = tpu.matmul %785, %787, %cst_643 {dimension_numbers = #tpu.dot_dimension_numbers<[1], [0], [0], [1], [0, 0, 1, 1], [], []>} : vector<8x32xbf16>, vector<32x8xbf16>, vector<8x8xf32> -> vector<8x8xf32>
    %c0_644 = arith.constant 0 : index
    %c0_645 = arith.constant 0 : index
    %789 = vector.load %arg4[%c0_644, %c0_645] : memref<1x8xf32, #tpu.memory_space<vmem>>, vector<1x8xf32>
    %790 = vector.broadcast %789 : vector<1x8xf32> to vector<8x8xf32>
    %791 = arith.addf %788, %790 : vector<8x8xf32>
    %792 = arith.negf %791 : vector<8x8xf32>
    %793 = math.exp %792 : vector<8x8xf32>
    %cst_646 = arith.constant 1.000000e+00 : f32
    %794 = vector.broadcast %cst_646 : f32 to vector<8x8xf32>
    %795 = arith.addf %794, %793 : vector<8x8xf32>
    %796 = arith.divf %794, %795 : vector<8x8xf32>
    %c0_647 = arith.constant 0 : index
    %c0_648 = arith.constant 0 : index
    %797 = vector.load %arg5[%c0_647, %c0_648] : memref<8x8xf32, #tpu.memory_space<vmem>>, vector<8x8xf32>
    tpu.vector_store %arg5[%c0_647, %c0_648], %796 {strides = array<i32>} : memref<8x8xf32, #tpu.memory_space<vmem>>, vector<8x8xf32>,
    return
  }
  func.func @transform_1(%arg0: i32, %arg1: memref<16x8xi32, #tpu.memory_space<smem>>) -> (i32, i32) {
    %c0_i32 = arith.constant 0 : i32
    %c0_i32_0 = arith.constant 0 : i32
    %c0_i32_1 = arith.constant 0 : i32
    return %c0_i32, %c0_i32_0 : i32, i32
  }
  func.func @transform_2(%arg0: i32, %arg1: memref<16x8xi32, #tpu.memory_space<smem>>) -> (i32, i32) {
    %c0_i32 = arith.constant 0 : i32
    %c0_i32_0 = arith.constant 0 : i32
    %c0_i32_1 = arith.constant 0 : i32
    return %c0_i32, %c0_i32_0 : i32, i32
  }
  func.func @transform_3(%arg0: i32, %arg1: memref<16x8xi32, #tpu.memory_space<smem>>) -> (i32, i32) {
    %c0_i32 = arith.constant 0 : i32
    %c0_i32_0 = arith.constant 0 : i32
    return %arg0, %c0_i32 : i32, i32
  }
}

</mosaic_0001>

<bundles_post_ra>
// kernel: tpu_custom_call.1
= control target key start
LH: loop header
LB: loop body
LE: loop exit
PB: predicated region body
PF: predicated region fallthrough
CT: control target
= control target key end

     0   :  { %s5362_s0 = inlined_call_operand.vmem [shape: s32[16,8], index: 0, kind: input, shape index: {}]   ;;  %s5363_s1 = inlined_call_operand.vmem [shape: f32[30,32], index: 1, kind: input, shape index: {}]   ;;  %s5364_s2 = inlined_call_operand.vmem [shape: f32[32,8], index: 2, kind: input, shape index: {}]   ;;  %s5365_s3 = inlined_call_operand.vmem [shape: f32[1,8], index: 3, kind: input, shape index: {}]   ;;  %s5366_s4 = inlined_call_operand.vmem [shape: f32[16,8], index: 4, kind: output, shape index: {}]  }
   0x1   :  { %s9_s17 = sshll.u32 %s5362_s0, 4  ;;  %s10_s17 = int_to_ptr.vmem [resolvable:$true] %s9_s17 }
   0x2   :  { %s4870_s18 = scalar_lea.vmem %s10_s17, 256  ;;  %p4875_p1 = scmp.lt.s32.totalorder %s10_s17, %s10_s17 }
   0x3   :  { %p4871_p0 = scmp.ne.s32.totalorder %s10_s17, %s4870_s18  ;;  %p4876_p2 = scmp.lt.s32.totalorder %s4870_s18, %s4870_s18 }
   0x5   :  { %p4877_p3 = por %p4876_p2, %p4875_p1 }
   0x7   :  { %p4878_p4 = pnand %p4877_p3, %p4871_p0 }
   0x9   :  { %4881 = shalt.err (!%p4878_p4)  }
   0xa   :  { %s5020_s19 = smov [#allocation5]  }
   0xb   :  { %12 = dma.vmem_to_smem %s10_s17, 256, %s5020_s19, [#allocation4] }
   0xc   :  { %4886 = dma.done.wait [#allocation4], 256 }
   0xd   :  { %4887 = vsyncadd [#allocation4], 4294967040 }
   0xe   :  { %14 = sfence }
   0xf   :  { %s5051_s20 = smov 0  }
  0x10 LB: > { %s4739_s0 = sadd.s32 4294967295, %s5018_s20   ;;  %p4742_p5 = scmp.ge.s32.totalorder %s5018_s20, 1  ;;  %s5018_s20 = sphi %s5051_s20, %s20_s20  }
  0x11   : > { %p110_p6 = scmp.lt.s32.totalorder %s5018_s20, 3 }
  0x13   : > { %p111_p7 = pnand %p4742_p5, %p110_p6 }
  0x14   : > { %p126_p8 = scmp.lt.s32.totalorder (!%p111_p7), %s4739_s0, 1  ;;  %s5059_s21 = sshll.u32 (!%p111_p7), %s4739_s0, 10 }
  0x15   : > { %114 = sbr.rel (%p111_p7) target bundleno = 1051 (0x41b), region = 28  ;;  %s133_s22 = sld [smem:[#allocation5 + %s5059_s21]] (!%p111_p7) }
  0x1b   : > { %s134_s29 = scalar_lea.vmem (!%p111_p7), %s5363_s1, %s133_s22 }
  0x1c   : > { %s5368_s0 = smov (!%p126_p8, %s4739_s0), 1  ;;  %v152_v0 = vld [vmem:[%s134_s29] sm:$0x1] }
  0x1d   : > { %s4743_s23 = sshll.u32 %s5368_s0, 3  ;;  %153 = vst [vmem:[#allocation2] sm:$0x1] %v152_v0 }
  0x1e   : > { %s5065_s26 = scalar_lea.vmem %s5366_s4, %s4743_s23 }
  0x1f   : > { %178 = vsyncadd [#allocation3], 16  ;;  %s5071_s30 = sadd.s32 128, %s5059_s21 }
  0x20   : > { %s181_s5 = sld [smem:[#allocation5 + %s5071_s30]] }
  0x26   : > { %s182_s8 = scalar_lea.vmem %s5363_s1, %s181_s5 }
  0x27   : > { %v202_v1 = vld [vmem:[%s182_s8] sm:$0x1] }
  0x28   : > { %203 = vst [vmem:[#allocation2 + $0x1] sm:$0x1] %v202_v1 }
  0x29   : > { %228 = vsyncadd [#allocation3 + $0x1], 16  ;;  %s5078_s9 = sadd.s32 256, %s5059_s21 }
  0x2a   : > { %s231_s10 = sld [smem:[#allocation5 + %s5078_s9]] }
  0x30   : > { %s232_s13 = scalar_lea.vmem %s5363_s1, %s231_s10 }
  0x31   : > { %v252_v2 = vld [vmem:[%s232_s13] sm:$0x1] }
  0x32   : > { %253 = vst [vmem:[#allocation2 + $0x2] sm:$0x1] %v252_v2 }
  0x33   : > { %278 = vsyncadd [#allocation3 + $0x2], 16  ;;  %s5085_s14 = sadd.s32 384, %s5059_s21 }
  0x34   : > { %s281_s15 = sld [smem:[#allocation5 + %s5085_s14]] }
  0x3a   : > { %s282_s18 = scalar_lea.vmem %s5363_s1, %s281_s15 }
  0x3b   : > { %v302_v3 = vld [vmem:[%s282_s18] sm:$0x1] }
  0x3c   : > { %303 = vst [vmem:[#allocation2 + $0x3] sm:$0x1] %v302_v3 }
  0x3d   : > { %328 = vsyncadd [#allocation3 + $0x3], 16  ;;  %s5092_s19 = sadd.s32 512, %s5059_s21 }
  0x3e   : > { %s331_s0 = sld [smem:[#allocation5 + %s5092_s19]] }
  0x44   : > { %s332_s24 = scalar_lea.vmem %s5363_s1, %s331_s0 }
  0x45   : > { %v352_v4 = vld [vmem:[%s332_s24] sm:$0x1] }
  0x46   : > { %353 = vst [vmem:[#allocation2 + $0x4] sm:$0x1] %v352_v4 }
  0x47   : > { %378 = vsyncadd [#allocation3 + $0x4], 16  ;;  %s5099_s25 = sadd.s32 640, %s5059_s21 }
  0x48   : > { %s381_s27 = sld [smem:[#allocation5 + %s5099_s25]] }
  0x4e   : > { %s382_s5 = scalar_lea.vmem %s5363_s1, %s381_s27 }
  0x4f   : > { %v402_v5 = vld [vmem:[%s382_s5] sm:$0x1] }
  0x50   : > { %403 = vst [vmem:[#allocation2 + $0x5] sm:$0x1] %v402_v5 }
  0x51   : > { %428 = vsyncadd [#allocation3 + $0x5], 16  ;;  %s5106_s6 = sadd.s32 768, %s5059_s21 }
  0x52   : > { %s431_s7 = sld [smem:[#allocation5 + %s5106_s6]] }
  0x58   : > { %s432_s11 = scalar_lea.vmem %s5363_s1, %s431_s7 }
  0x59   : > { %v452_v6 = vld [vmem:[%s432_s11] sm:$0x1] }
  0x5a   : > { %453 = vst [vmem:[#allocation2 + $0x6] sm:$0x1] %v452_v6 }
  0x5b   : > { %478 = vsyncadd [#allocation3 + $0x6], 16  ;;  %s5113_s12 = sadd.s32 896, %s5059_s21 }
  0x5c   : > { %s481_s13 = sld [smem:[#allocation5 + %s5113_s12]] }
  0x62   : > { %s482_s17 = scalar_lea.vmem %s5363_s1, %s481_s13 }
  0x63   : > { %v502_v7 = vld [vmem:[%s482_s17] sm:$0x1] }
  0x64   : > { %503 = vst [vmem:[#allocation2 + $0x7] sm:$0x1] %v502_v7 }
  0x65   : > { %528 = vsyncadd [#allocation3 + $0x7], 16  ;;  %s529_s18 = sadd.s32 1, %s5059_s21 }
  0x66   : > { %s530_s0 = sld [smem:[#allocation5 + %s529_s18]] }
  0x6c   : > { %s531_s24 = scalar_lea.vmem %s5363_s1, %s530_s0 }
  0x6d   : > { %v551_v8 = vld [vmem:[%s531_s24] sm:$0x1] }
  0x6e   : > { %552 = vst [vmem:[#allocation2 + $0x8] sm:$0x1] %v551_v8 }
  0x6f   : > { %577 = vsyncadd [#allocation3 + $0x8], 16  ;;  %s578_s27 = sadd.s32 1, %s5071_s30 }
  0x70   : > { %s579_s28 = sld [smem:[#allocation5 + %s578_s27]] }
  0x76   : > { %s580_s7 = scalar_lea.vmem %s5363_s1, %s579_s28 }
  0x77   : > { %v600_v9 = vld [vmem:[%s580_s7] sm:$0x1] }
  0x78   : > { %601 = vst [vmem:[#allocation2 + $0x9] sm:$0x1] %v600_v9 }
  0x79   : > { %626 = vsyncadd [#allocation3 + $0x9], 16  ;;  %s627_s8 = sadd.s32 1, %s5078_s9 }
  0x7a   : > { %s628_s10 = sld [smem:[#allocation5 + %s627_s8]] }
  0x80   : > { %s629_s15 = scalar_lea.vmem %s5363_s1, %s628_s10 }
  0x81   : > { %v649_v10 = vld [vmem:[%s629_s15] sm:$0x1] }
  0x82   : > { %650 = vst [vmem:[#allocation2 + $0xa] sm:$0x1] %v649_v10 }
  0x83   : > { %675 = vsyncadd [#allocation3 + $0xa], 16  ;;  %s676_s16 = sadd.s32 1, %s5085_s14 }
  0x84   : > { %s677_s17 = sld [smem:[#allocation5 + %s676_s16]] }
  0x8a   : > { %s678_s22 = scalar_lea.vmem %s5363_s1, %s677_s17 }
  0x8b   : > { %v698_v11 = vld [vmem:[%s678_s22] sm:$0x1] }
  0x8c   : > { %699 = vst [vmem:[#allocation2 + $0xb] sm:$0x1] %v698_v11 }
  0x8d   : > { %724 = vsyncadd [#allocation3 + $0xb], 16  ;;  %s725_s23 = sadd.s32 1, %s5092_s19 }
  0x8e   : > { %s726_s24 = sld [smem:[#allocation5 + %s725_s23]] }
  0x94   : > { %s727_s29 = scalar_lea.vmem %s5363_s1, %s726_s24 }
  0x95   : > { %v747_v12 = vld [vmem:[%s727_s29] sm:$0x1] }
  0x96   : > { %748 = vst [vmem:[#allocation2 + $0xc] sm:$0x1] %v747_v12 }
  0x97   : > { %773 = vsyncadd [#allocation3 + $0xc], 16  ;;  %s774_s5 = sadd.s32 1, %s5099_s25 }
  0x98   : > { %s775_s7 = sld [smem:[#allocation5 + %s774_s5]] }
  0x9e   : > { %s776_s11 = scalar_lea.vmem %s5363_s1, %s775_s7 }
  0x9f   : > { %v796_v13 = vld [vmem:[%s776_s11] sm:$0x1] }
  0xa0   : > { %797 = vst [vmem:[#allocation2 + $0xd] sm:$0x1] %v796_v13 }
  0xa1   : > { %822 = vsyncadd [#allocation3 + $0xd], 16  ;;  %s823_s13 = sadd.s32 1, %s5106_s6 }
  0xa2   : > { %s824_s15 = sld [smem:[#allocation5 + %s823_s13]] }
  0xa8   : > { %s825_s18 = scalar_lea.vmem %s5363_s1, %s824_s15 }
  0xa9   : > { %v845_v14 = vld [vmem:[%s825_s18] sm:$0x1] }
  0xaa   : > { %846 = vst [vmem:[#allocation2 + $0xe] sm:$0x1] %v845_v14 }
  0xab   : > { %871 = vsyncadd [#allocation3 + $0xe], 16  ;;  %s872_s0 = sadd.s32 1, %s5113_s12 }
  0xac   : > { %s873_s22 = sld [smem:[#allocation5 + %s872_s0]] }
  0xb2   : > { %s874_s27 = scalar_lea.vmem %s5363_s1, %s873_s22 }
  0xb3   : > { %v894_v15 = vld [vmem:[%s874_s27] sm:$0x1] }
  0xb4   : > { %895 = vst [vmem:[#allocation2 + $0xf] sm:$0x1] %v894_v15 }
  0xb5   : > { %920 = vsyncadd [#allocation3 + $0xf], 16  ;;  %s921_s28 = sadd.s32 2, %s5059_s21 }
  0xb6   : > { %s922_s29 = sld [smem:[#allocation5 + %s921_s28]] }
  0xbc   : > { %s923_s8 = scalar_lea.vmem %s5363_s1, %s922_s29 }
  0xbd   : > { %v943_v16 = vld [vmem:[%s923_s8] sm:$0x1] }
  0xbe   : > { %944 = vst [vmem:[#allocation2 + $0x10] sm:$0x1] %v943_v16 }
  0xbf   : > { %969 = vsyncadd [#allocation3 + $0x10], 16  ;;  %s970_s10 = sadd.s32 2, %s5071_s30 }
  0xc0   : > { %s971_s11 = sld [smem:[#allocation5 + %s970_s10]] }
  0xc6   : > { %s972_s16 = scalar_lea.vmem %s5363_s1, %s971_s11 }
  0xc7   : > { %v992_v17 = vld [vmem:[%s972_s16] sm:$0x1] }
  0xc8   : > { %993 = vst [vmem:[#allocation2 + $0x11] sm:$0x1] %v992_v17 }
  0xc9   : > { %1018 = vsyncadd [#allocation3 + $0x11], 16  ;;  %s1019_s17 = sadd.s32 2, %s5078_s9 }
  0xca   : > { %s1020_s18 = sld [smem:[#allocation5 + %s1019_s17]] }
  0xd0   : > { %s1021_s23 = scalar_lea.vmem %s5363_s1, %s1020_s18 }
  0xd1   : > { %v1041_v18 = vld [vmem:[%s1021_s23] sm:$0x1] }
  0xd2   : > { %1042 = vst [vmem:[#allocation2 + $0x12] sm:$0x1] %v1041_v18 }
  0xd3   : > { %1067 = vsyncadd [#allocation3 + $0x12], 16  ;;  %s1068_s24 = sadd.s32 2, %s5085_s14 }
  0xd4   : > { %s1069_s27 = sld [smem:[#allocation5 + %s1068_s24]] }
  0xda   : > { %s1070_s5 = scalar_lea.vmem %s5363_s1, %s1069_s27 }
  0xdb   : > { %v1090_v19 = vld [vmem:[%s1070_s5] sm:$0x1] }
  0xdc   : > { %1091 = vst [vmem:[#allocation2 + $0x13] sm:$0x1] %v1090_v19 }
  0xdd   : > { %1116 = vsyncadd [#allocation3 + $0x13], 16  ;;  %s1117_s7 = sadd.s32 2, %s5092_s19 }
  0xde   : > { %s1118_s8 = sld [smem:[#allocation5 + %s1117_s7]] }
  0xe4   : > { %s1119_s13 = scalar_lea.vmem %s5363_s1, %s1118_s8 }
  0xe5   : > { %v1139_v20 = vld [vmem:[%s1119_s13] sm:$0x1] }
  0xe6   : > { %1140 = vst [vmem:[#allocation2 + $0x14] sm:$0x1] %v1139_v20 }
  0xe7   : > { %1165 = vsyncadd [#allocation3 + $0x14], 16  ;;  %s1166_s15 = sadd.s32 2, %s5099_s25 }
  0xe8   : > { %s1167_s16 = sld [smem:[#allocation5 + %s1166_s15]] }
  0xee   : > { %s1168_s0 = scalar_lea.vmem %s5363_s1, %s1167_s16 }
  0xef   : > { %v1188_v21 = vld [vmem:[%s1168_s0] sm:$0x1] }
  0xf0   : > { %1189 = vst [vmem:[#allocation2 + $0x15] sm:$0x1] %v1188_v21 }
  0xf1   : > { %1214 = vsyncadd [#allocation3 + $0x15], 16  ;;  %s1215_s22 = sadd.s32 2, %s5106_s6 }
  0xf2   : > { %s1216_s23 = sld [smem:[#allocation5 + %s1215_s22]] }
  0xf8   : > { %s1217_s28 = scalar_lea.vmem %s5363_s1, %s1216_s23 }
  0xf9   : > { %v1237_v22 = vld [vmem:[%s1217_s28] sm:$0x1] }
  0xfa   : > { %1238 = vst [vmem:[#allocation2 + $0x16] sm:$0x1] %v1237_v22 }
  0xfb   : > { %1263 = vsyncadd [#allocation3 + $0x16], 16  ;;  %s1264_s29 = sadd.s32 2, %s5113_s12 }
  0xfc   : > { %s1265_s5 = sld [smem:[#allocation5 + %s1264_s29]] }
 0x102   : > { %s1266_s10 = scalar_lea.vmem %s5363_s1, %s1265_s5 }
 0x103   : > { %v1286_v23 = vld [vmem:[%s1266_s10] sm:$0x1] }
 0x104   : > { %1287 = vst [vmem:[#allocation2 + $0x17] sm:$0x1] %v1286_v23 }
 0x105   : > { %1312 = vsyncadd [#allocation3 + $0x17], 16  ;;  %s1313_s11 = sadd.s32 3, %s5059_s21 }
 0x106   : > { %s1314_s13 = sld [smem:[#allocation5 + %s1313_s11]] }
 0x10c   : > { %s1315_s17 = scalar_lea.vmem %s5363_s1, %s1314_s13 }
 0x10d   : > { %v1335_v24 = vld [vmem:[%s1315_s17] sm:$0x1] }
 0x10e   : > { %1336 = vst [vmem:[#allocation2 + $0x18] sm:$0x1] %v1335_v24 }
 0x10f   : > { %1361 = vsyncadd [#allocation3 + $0x18], 16  ;;  %s1362_s18 = sadd.s32 3, %s5071_s30 }
 0x110   : > { %s1363_s0 = sld [smem:[#allocation5 + %s1362_s18]] }
 0x116   : > { %s1364_s24 = scalar_lea.vmem %s5363_s1, %s1363_s0 }
 0x117   : > { %v1384_v25 = vld [vmem:[%s1364_s24] sm:$0x1] }
 0x118   : > { %1385 = vst [vmem:[#allocation2 + $0x19] sm:$0x1] %v1384_v25 }
 0x119   : > { %1410 = vsyncadd [#allocation3 + $0x19], 16  ;;  %s1411_s27 = sadd.s32 3, %s5078_s9 }
 0x11a   : > { %s1412_s28 = sld [smem:[#allocation5 + %s1411_s27]] }
 0x120   : > { %s1413_s7 = scalar_lea.vmem %s5363_s1, %s1412_s28 }
 0x121   : > { %v1433_v26 = vld [vmem:[%s1413_s7] sm:$0x1] }
 0x122   : > { %1434 = vst [vmem:[#allocation2 + $0x1a] sm:$0x1] %v1433_v26 }
 0x123   : > { %1459 = vsyncadd [#allocation3 + $0x1a], 16  ;;  %s1460_s8 = sadd.s32 3, %s5085_s14 }
 0x124   : > { %s1461_s10 = sld [smem:[#allocation5 + %s1460_s8]] }
 0x12a   : > { %s1462_s15 = scalar_lea.vmem %s5363_s1, %s1461_s10 }
 0x12b   : > { %v1482_v27 = vld [vmem:[%s1462_s15] sm:$0x1] }
 0x12c   : > { %1483 = vst [vmem:[#allocation2 + $0x1b] sm:$0x1] %v1482_v27 }
 0x12d   : > { %1508 = vsyncadd [#allocation3 + $0x1b], 16  ;;  %s1509_s16 = sadd.s32 3, %s5092_s19 }
 0x12e   : > { %s1510_s17 = sld [smem:[#allocation5 + %s1509_s16]] }
 0x134   : > { %s1511_s22 = scalar_lea.vmem %s5363_s1, %s1510_s17 }
 0x135   : > { %v1531_v28 = vld [vmem:[%s1511_s22] sm:$0x1] }
 0x136   : > { %1532 = vst [vmem:[#allocation2 + $0x1c] sm:$0x1] %v1531_v28 }
 0x137   : > { %1557 = vsyncadd [#allocation3 + $0x1c], 16  ;;  %s1558_s23 = sadd.s32 3, %s5099_s25 }
 0x138   : > { %s1559_s24 = sld [smem:[#allocation5 + %s1558_s23]] }
 0x13e   : > { %s1560_s29 = scalar_lea.vmem %s5363_s1, %s1559_s24 }
 0x13f   : > { %v1580_v29 = vld [vmem:[%s1560_s29] sm:$0x1] }
 0x140   : > { %1581 = vst [vmem:[#allocation2 + $0x1d] sm:$0x1] %v1580_v29 }
 0x141   : > { %1606 = vsyncadd [#allocation3 + $0x1d], 16  ;;  %s1607_s5 = sadd.s32 3, %s5106_s6 }
 0x142   : > { %s1608_s7 = sld [smem:[#allocation5 + %s1607_s5]] }
 0x148   : > { %s1609_s11 = scalar_lea.vmem %s5363_s1, %s1608_s7 }
 0x149   : > { %v1629_v30 = vld [vmem:[%s1609_s11] sm:$0x1] }
 0x14a   : > { %1630 = vst [vmem:[#allocation2 + $0x1e] sm:$0x1] %v1629_v30 }
 0x14b   : > { %1655 = vsyncadd [#allocation3 + $0x1e], 16  ;;  %s1656_s13 = sadd.s32 3, %s5113_s12 }
 0x14c   : > { %s1657_s15 = sld [smem:[#allocation5 + %s1656_s13]] }
 0x152   : > { %s1658_s18 = scalar_lea.vmem %s5363_s1, %s1657_s15 }
 0x153   : > { %v1678_v31 = vld [vmem:[%s1658_s18] sm:$0x1] }
 0x154   : > { %1679 = vst [vmem:[#allocation2 + $0x1f] sm:$0x1] %v1678_v31 }
 0x155   : > { %1704 = vsyncadd [#allocation3 + $0x1f], 16  ;;  %s1705_s0 = sadd.s32 4, %s5059_s21 }
 0x156   : > { %s1706_s22 = sld [smem:[#allocation5 + %s1705_s0]] }
 0x15c   : > { %s1707_s27 = scalar_lea.vmem %s5363_s1, %s1706_s22 }
 0x15d   : > { %v1727_v32 = vld [vmem:[%s1707_s27] sm:$0x1] }
 0x15e   : > { %1728 = vst [vmem:[#allocation2 + $0x20] sm:$0x1] %v1727_v32 }
 0x15f   : > { %1753 = vsyncadd [#allocation3 + $0x20], 16  ;;  %s1754_s28 = sadd.s32 4, %s5071_s30 }
 0x160   : > { %s1755_s29 = sld [smem:[#allocation5 + %s1754_s28]] }
 0x166   : > { %s1756_s8 = scalar_lea.vmem %s5363_s1, %s1755_s29 }
 0x167   : > { %v1776_v33 = vld [vmem:[%s1756_s8] sm:$0x1] }
 0x168   : > { %1777 = vst [vmem:[#allocation2 + $0x21] sm:$0x1] %v1776_v33 }
 0x169   : > { %1802 = vsyncadd [#allocation3 + $0x21], 16  ;;  %s1803_s10 = sadd.s32 4, %s5078_s9 }
 0x16a   : > { %s1804_s11 = sld [smem:[#allocation5 + %s1803_s10]] }
 0x170   : > { %s1805_s16 = scalar_lea.vmem %s5363_s1, %s1804_s11 }
 0x171   : > { %v1825_v34 = vld [vmem:[%s1805_s16] sm:$0x1] }
 0x172   : > { %1826 = vst [vmem:[#allocation2 + $0x22] sm:$0x1] %v1825_v34 }
 0x173   : > { %1851 = vsyncadd [#allocation3 + $0x22], 16  ;;  %s1852_s17 = sadd.s32 4, %s5085_s14 }
 0x174   : > { %s1853_s18 = sld [smem:[#allocation5 + %s1852_s17]] }
 0x17a   : > { %s1854_s23 = scalar_lea.vmem %s5363_s1, %s1853_s18 }
 0x17b   : > { %v1874_v35 = vld [vmem:[%s1854_s23] sm:$0x1] }
 0x17c   : > { %1875 = vst [vmem:[#allocation2 + $0x23] sm:$0x1] %v1874_v35 }
 0x17d   : > { %1900 = vsyncadd [#allocation3 + $0x23], 16  ;;  %s1901_s24 = sadd.s32 4, %s5092_s19 }
 0x17e   : > { %s1902_s27 = sld [smem:[#allocation5 + %s1901_s24]] }
 0x184   : > { %s1903_s5 = scalar_lea.vmem %s5363_s1, %s1902_s27 }
 0x185   : > { %v1923_v36 = vld [vmem:[%s1903_s5] sm:$0x1] }
 0x186   : > { %1924 = vst [vmem:[#allocation2 + $0x24] sm:$0x1] %v1923_v36 }
 0x187   : > { %1949 = vsyncadd [#allocation3 + $0x24], 16  ;;  %s1950_s7 = sadd.s32 4, %s5099_s25 }
 0x188   : > { %s1951_s8 = sld [smem:[#allocation5 + %s1950_s7]] }
 0x18e   : > { %s1952_s13 = scalar_lea.vmem %s5363_s1, %s1951_s8 }
 0x18f   : > { %v1972_v37 = vld [vmem:[%s1952_s13] sm:$0x1] }
 0x190   : > { %1973 = vst [vmem:[#allocation2 + $0x25] sm:$0x1] %v1972_v37 }
 0x191   : > { %1998 = vsyncadd [#allocation3 + $0x25], 16  ;;  %s1999_s15 = sadd.s32 4, %s5106_s6 }
 0x192   : > { %s2000_s16 = sld [smem:[#allocation5 + %s1999_s15]] }
 0x198   : > { %s2001_s0 = scalar_lea.vmem %s5363_s1, %s2000_s16 }
 0x199   : > { %v2021_v38 = vld [vmem:[%s2001_s0] sm:$0x1] }
 0x19a   : > { %2022 = vst [vmem:[#allocation2 + $0x26] sm:$0x1] %v2021_v38 }
 0x19b   : > { %2047 = vsyncadd [#allocation3 + $0x26], 16  ;;  %s2048_s22 = sadd.s32 4, %s5113_s12 }
 0x19c   : > { %s2049_s23 = sld [smem:[#allocation5 + %s2048_s22]] }
 0x1a2   : > { %s2050_s28 = scalar_lea.vmem %s5363_s1, %s2049_s23 }
 0x1a3   : > { %v2070_v39 = vld [vmem:[%s2050_s28] sm:$0x1] }
 0x1a4   : > { %2071 = vst [vmem:[#allocation2 + $0x27] sm:$0x1] %v2070_v39 }
 0x1a5   : > { %2096 = vsyncadd [#allocation3 + $0x27], 16  ;;  %s2097_s29 = sadd.s32 5, %s5059_s21 }
 0x1a6   : > { %s2098_s5 = sld [smem:[#allocation5 + %s2097_s29]] }
 0x1ac   : > { %s2099_s10 = scalar_lea.vmem %s5363_s1, %s2098_s5 }
 0x1ad   : > { %v2119_v40 = vld [vmem:[%s2099_s10] sm:$0x1] }
 0x1ae   : > { %2120 = vst [vmem:[#allocation2 + $0x28] sm:$0x1] %v2119_v40 }
 0x1af   : > { %2145 = vsyncadd [#allocation3 + $0x28], 16  ;;  %s2146_s11 = sadd.s32 5, %s5071_s30 }
 0x1b0   : > { %s2147_s13 = sld [smem:[#allocation5 + %s2146_s11]] }
 0x1b6   : > { %s2148_s17 = scalar_lea.vmem %s5363_s1, %s2147_s13 }
 0x1b7   : > { %v2168_v41 = vld [vmem:[%s2148_s17] sm:$0x1] }
 0x1b8   : > { %2169 = vst [vmem:[#allocation2 + $0x29] sm:$0x1] %v2168_v41 }
 0x1b9   : > { %2194 = vsyncadd [#allocation3 + $0x29], 16  ;;  %s2195_s18 = sadd.s32 5, %s5078_s9 }
 0x1ba   : > { %s2196_s0 = sld [smem:[#allocation5 + %s2195_s18]] }
 0x1c0   : > { %s2197_s24 = scalar_lea.vmem %s5363_s1, %s2196_s0 }
 0x1c1   : > { %v2217_v42 = vld [vmem:[%s2197_s24] sm:$0x1] }
 0x1c2   : > { %2218 = vst [vmem:[#allocation2 + $0x2a] sm:$0x1] %v2217_v42 }
 0x1c3   : > { %2243 = vsyncadd [#allocation3 + $0x2a], 16  ;;  %s2244_s27 = sadd.s32 5, %s5085_s14 }
 0x1c4   : > { %s2245_s28 = sld [smem:[#allocation5 + %s2244_s27]] }
 0x1ca   : > { %s2246_s7 = scalar_lea.vmem %s5363_s1, %s2245_s28 }
 0x1cb   : > { %v2266_v43 = vld [vmem:[%s2246_s7] sm:$0x1] }
 0x1cc   : > { %2267 = vst [vmem:[#allocation2 + $0x2b] sm:$0x1] %v2266_v43 }
 0x1cd   : > { %2292 = vsyncadd [#allocation3 + $0x2b], 16  ;;  %s2293_s8 = sadd.s32 5, %s5092_s19 }
 0x1ce   : > { %s2294_s10 = sld [smem:[#allocation5 + %s2293_s8]] }
 0x1d4   : > { %s2295_s15 = scalar_lea.vmem %s5363_s1, %s2294_s10 }
 0x1d5   : > { %v2315_v44 = vld [vmem:[%s2295_s15] sm:$0x1] }
 0x1d6   : > { %2316 = vst [vmem:[#allocation2 + $0x2c] sm:$0x1] %v2315_v44 }
 0x1d7   : > { %2341 = vsyncadd [#allocation3 + $0x2c], 16  ;;  %s2342_s16 = sadd.s32 5, %s5099_s25 }
 0x1d8   : > { %s2343_s17 = sld [smem:[#allocation5 + %s2342_s16]] }
 0x1de   : > { %s2344_s22 = scalar_lea.vmem %s5363_s1, %s2343_s17 }
 0x1df   : > { %v2364_v45 = vld [vmem:[%s2344_s22] sm:$0x1] }
 0x1e0   : > { %2365 = vst [vmem:[#allocation2 + $0x2d] sm:$0x1] %v2364_v45 }
 0x1e1   : > { %2390 = vsyncadd [#allocation3 + $0x2d], 16  ;;  %s2391_s23 = sadd.s32 5, %s5106_s6 }
 0x1e2   : > { %s2392_s24 = sld [smem:[#allocation5 + %s2391_s23]] }
 0x1e8   : > { %s2393_s29 = scalar_lea.vmem %s5363_s1, %s2392_s24 }
 0x1e9   : > { %v2413_v46 = vld [vmem:[%s2393_s29] sm:$0x1] }
 0x1ea   : > { %2414 = vst [vmem:[#allocation2 + $0x2e] sm:$0x1] %v2413_v46 }
 0x1eb   : > { %2439 = vsyncadd [#allocation3 + $0x2e], 16  ;;  %s2440_s5 = sadd.s32 5, %s5113_s12 }
 0x1ec   : > { %s2441_s7 = sld [smem:[#allocation5 + %s2440_s5]] }
 0x1f2   : > { %s2442_s11 = scalar_lea.vmem %s5363_s1, %s2441_s7 }
 0x1f3   : > { %v2462_v47 = vld [vmem:[%s2442_s11] sm:$0x1] }
 0x1f4   : > { %2463 = vst [vmem:[#allocation2 + $0x2f] sm:$0x1] %v2462_v47 }
 0x1f5   : > { %2488 = vsyncadd [#allocation3 + $0x2f], 16  ;;  %s2489_s13 = sadd.s32 6, %s5059_s21 }
 0x1f6   : > { %s2490_s15 = sld [smem:[#allocation5 + %s2489_s13]] }
 0x1fc   : > { %s2491_s18 = scalar_lea.vmem %s5363_s1, %s2490_s15 }
 0x1fd   : > { %v2511_v48 = vld [vmem:[%s2491_s18] sm:$0x1] }
 0x1fe   : > { %2512 = vst [vmem:[#allocation2 + $0x30] sm:$0x1] %v2511_v48 }
 0x1ff   : > { %2537 = vsyncadd [#allocation3 + $0x30], 16  ;;  %s2538_s0 = sadd.s32 6, %s5071_s30 }
 0x200   : > { %s2539_s22 = sld [smem:[#allocation5 + %s2538_s0]] }
 0x206   : > { %s2540_s27 = scalar_lea.vmem %s5363_s1, %s2539_s22 }
 0x207   : > { %v2560_v49 = vld [vmem:[%s2540_s27] sm:$0x1] }
 0x208   : > { %2561 = vst [vmem:[#allocation2 + $0x31] sm:$0x1] %v2560_v49 }
 0x209   : > { %2586 = vsyncadd [#allocation3 + $0x31], 16  ;;  %s2587_s28 = sadd.s32 6, %s5078_s9 }
 0x20a   : > { %s2588_s29 = sld [smem:[#allocation5 + %s2587_s28]] }
 0x210   : > { %s2589_s8 = scalar_lea.vmem %s5363_s1, %s2588_s29 }
 0x211   : > { %v2609_v50 = vld [vmem:[%s2589_s8] sm:$0x1] }
 0x212   : > { %2610 = vst [vmem:[#allocation2 + $0x32] sm:$0x1] %v2609_v50 }
 0x213   : > { %2635 = vsyncadd [#allocation3 + $0x32], 16  ;;  %s2636_s10 = sadd.s32 6, %s5085_s14 }
 0x214   : > { %s2637_s11 = sld [smem:[#allocation5 + %s2636_s10]] }
 0x21a   : > { %s2638_s16 = scalar_lea.vmem %s5363_s1, %s2637_s11 }
 0x21b   : > { %v2658_v51 = vld [vmem:[%s2638_s16] sm:$0x1] }
 0x21c   : > { %2659 = vst [vmem:[#allocation2 + $0x33] sm:$0x1] %v2658_v51 }
 0x21d   : > { %2684 = vsyncadd [#allocation3 + $0x33], 16  ;;  %s2685_s17 = sadd.s32 6, %s5092_s19 }
 0x21e   : > { %s2686_s18 = sld [smem:[#allocation5 + %s2685_s17]] }
 0x224   : > { %s2687_s23 = scalar_lea.vmem %s5363_s1, %s2686_s18 }
 0x225   : > { %v2707_v52 = vld [vmem:[%s2687_s23] sm:$0x1] }
 0x226   : > { %2708 = vst [vmem:[#allocation2 + $0x34] sm:$0x1] %v2707_v52 }
 0x227   : > { %2733 = vsyncadd [#allocation3 + $0x34], 16  ;;  %s2734_s24 = sadd.s32 6, %s5099_s25 }
 0x228   : > { %s2735_s27 = sld [smem:[#allocation5 + %s2734_s24]] }
 0x22e   : > { %s2736_s5 = scalar_lea.vmem %s5363_s1, %s2735_s27 }
 0x22f   : > { %v2756_v53 = vld [vmem:[%s2736_s5] sm:$0x1] }
 0x230   : > { %2757 = vst [vmem:[#allocation2 + $0x35] sm:$0x1] %v2756_v53 }
 0x231   : > { %2782 = vsyncadd [#allocation3 + $0x35], 16  ;;  %s2783_s7 = sadd.s32 6, %s5106_s6 }
 0x232   : > { %s2784_s8 = sld [smem:[#allocation5 + %s2783_s7]] }
 0x238   : > { %s2785_s13 = scalar_lea.vmem %s5363_s1, %s2784_s8 }
 0x239   : > { %v2805_v54 = vld [vmem:[%s2785_s13] sm:$0x1] }
 0x23a   : > { %2806 = vst [vmem:[#allocation2 + $0x36] sm:$0x1] %v2805_v54 }
 0x23b   : > { %2831 = vsyncadd [#allocation3 + $0x36], 16  ;;  %s2832_s15 = sadd.s32 6, %s5113_s12 }
 0x23c   : > { %s2833_s16 = sld [smem:[#allocation5 + %s2832_s15]] }
 0x242   : > { %s2834_s0 = scalar_lea.vmem %s5363_s1, %s2833_s16 }
 0x243   : > { %v2854_v55 = vld [vmem:[%s2834_s0] sm:$0x1] }
 0x244   : > { %2855 = vst [vmem:[#allocation2 + $0x37] sm:$0x1] %v2854_v55 }
 0x245   : > { %2880 = vsyncadd [#allocation3 + $0x37], 16  ;;  %s2881_s22 = sadd.s32 7, %s5059_s21 }
 0x246   : > { %s2882_s23 = sld [smem:[#allocation5 + %s2881_s22]] }
 0x24c   : > { %s2883_s28 = scalar_lea.vmem %s5363_s1, %s2882_s23 }
 0x24d   : > { %v2903_v56 = vld [vmem:[%s2883_s28] sm:$0x1] }
 0x24e   : > { %2904 = vst [vmem:[#allocation2 + $0x38] sm:$0x1] %v2903_v56 }
 0x24f   : > { %2929 = vsyncadd [#allocation3 + $0x38], 16  ;;  %s2930_s29 = sadd.s32 7, %s5071_s30 }
 0x250   : > { %s2931_s5 = sld [smem:[#allocation5 + %s2930_s29]] }
 0x256   : > { %s2932_s10 = scalar_lea.vmem %s5363_s1, %s2931_s5 }
 0x257   : > { %v2952_v57 = vld [vmem:[%s2932_s10] sm:$0x1] }
 0x258   : > { %2953 = vst [vmem:[#allocation2 + $0x39] sm:$0x1] %v2952_v57 }
 0x259   : > { %2978 = vsyncadd [#allocation3 + $0x39], 16  ;;  %s2979_s21 = sadd.s32 7, %s5078_s9 }
 0x25a   : > { %s2980_s11 = sld [smem:[#allocation5 + %s2979_s21]] }
 0x260   : > { %s2981_s16 = scalar_lea.vmem %s5363_s1, %s2980_s11 }
 0x261   : > { %v3001_v58 = vld [vmem:[%s2981_s16] sm:$0x1] }
 0x262   : > { %3002 = vst [vmem:[#allocation2 + $0x3a] sm:$0x1] %v3001_v58 }
 0x263   : > { %3027 = vsyncadd [#allocation3 + $0x3a], 16  ;;  %s3028_s30 = sadd.s32 7, %s5085_s14 }
 0x264   : > { %s3029_s17 = sld [smem:[#allocation5 + %s3028_s30]] }
 0x26a   : > { %s3030_s22 = scalar_lea.vmem %s5363_s1, %s3029_s17 }
 0x26b   : > { %v3050_v59 = vld [vmem:[%s3030_s22] sm:$0x1] }
 0x26c   : > { %3051 = vst [vmem:[#allocation2 + $0x3b] sm:$0x1] %v3050_v59 }
 0x26d   : > { %3076 = vsyncadd [#allocation3 + $0x3b], 16  ;;  %s3077_s9 = sadd.s32 7, %s5092_s19 }
 0x26e   : > { %s3078_s23 = sld [smem:[#allocation5 + %s3077_s9]] }
 0x274   : > { %s3079_s28 = scalar_lea.vmem %s5363_s1, %s3078_s23 }
 0x275   : > { %v3099_v60 = vld [vmem:[%s3079_s28] sm:$0x1] }
 0x276   : > { %3100 = vst [vmem:[#allocation2 + $0x3c] sm:$0x1] %v3099_v60 }
 0x277   : > { %3125 = vsyncadd [#allocation3 + $0x3c], 16  ;;  %s3126_s14 = sadd.s32 7, %s5099_s25 }
 0x278   : > { %s3127_s29 = sld [smem:[#allocation5 + %s3126_s14]] }
 0x27e   : > { %s3128_s8 = scalar_lea.vmem %s5363_s1, %s3127_s29 }
 0x27f   : > { %v3148_v61 = vld [vmem:[%s3128_s8] sm:$0x1] }
 0x280   : > { %3149 = vst [vmem:[#allocation2 + $0x3d] sm:$0x1] %v3148_v61 }
 0x281   : > { %3174 = vsyncadd [#allocation3 + $0x3d], 16  ;;  %s3175_s19 = sadd.s32 7, %s5106_s6 }
 0x282   : > { %s3176_s10 = sld [smem:[#allocation5 + %s3175_s19]] }
 0x288   : > { %s3177_s13 = scalar_lea.vmem %s5363_s1, %s3176_s10 }
 0x289   : > { %v3197_v62 = vld [vmem:[%s3177_s13] sm:$0x1] }
 0x28a   : > { %3198 = vst [vmem:[#allocation2 + $0x3e] sm:$0x1] %v3197_v62 }
 0x28b   : > { %3223 = vsyncadd [#allocation3 + $0x3e], 16  ;;  %s3224_s25 = sadd.s32 7, %s5113_s12 }
 0x28c   : > { %s3225_s15 = sld [smem:[#allocation5 + %s3224_s25]] }
 0x292   : > { %s3226_s17 = scalar_lea.vmem %s5363_s1, %s3225_s15 }
 0x293   : > { %v3246_v63 = vld [vmem:[%s3226_s17] sm:$0x1] }
 0x294   : > { %3247 = vst [vmem:[#allocation2 + $0x3f] sm:$0x1] %v3246_v63 }
 0x295   : > { %3272 = vsyncadd [#allocation3 + $0x3f], 16 }
 0x296   : > { %4888 = dma.done.wait [#allocation3], 16 }
 0x297   : > { %4889 = vsyncadd [#allocation3], 4294967280 }
 0x298   : > { %4890 = dma.done.wait [#allocation3 + $0x1], 16 }
 0x299   : > { %4891 = vsyncadd [#allocation3 + $0x1], 4294967280 }
 0x29a   : > { %4892 = dma.done.wait [#allocation3 + $0x2], 16 }
 0x29b   : > { %4893 = vsyncadd [#allocation3 + $0x2], 4294967280 }
 0x29c   : > { %4894 = dma.done.wait [#allocation3 + $0x3], 16 }
 0x29d   : > { %4895 = vsyncadd [#allocation3 + $0x3], 4294967280 }
 0x29e   : > { %4896 = dma.done.wait [#allocation3 + $0x4], 16 }
 0x29f   : > { %4897 = vsyncadd [#allocation3 + $0x4], 4294967280 }
 0x2a0   : > { %4898 = dma.done.wait [#allocation3 + $0x5], 16 }
 0x2a1   : > { %4899 = vsyncadd [#allocation3 + $0x5], 4294967280 }
 0x2a2   : > { %4900 = dma.done.wait [#allocation3 + $0x6], 16 }
 0x2a3   : > { %4901 = vsyncadd [#allocation3 + $0x6], 4294967280 }
 0x2a4   : > { %4902 = dma.done.wait [#allocation3 + $0x7], 16 }
 0x2a5   : > { %4903 = vsyncadd [#allocation3 + $0x7], 4294967280 }
 0x2a6   : > { %4904 = dma.done.wait [#allocation3 + $0x8], 16 }
 0x2a7   : > { %4905 = vsyncadd [#allocation3 + $0x8], 4294967280 }
 0x2a8   : > { %4906 = dma.done.wait [#allocation3 + $0x9], 16 }
 0x2a9   : > { %4907 = vsyncadd [#allocation3 + $0x9], 4294967280 }
 0x2aa   : > { %4908 = dma.done.wait [#allocation3 + $0xa], 16 }
 0x2ab   : > { %4909 = vsyncadd [#allocation3 + $0xa], 4294967280 }
 0x2ac   : > { %4910 = dma.done.wait [#allocation3 + $0xb], 16 }
 0x2ad   : > { %4911 = vsyncadd [#allocation3 + $0xb], 4294967280 }
 0x2ae   : > { %4912 = dma.done.wait [#allocation3 + $0xc], 16 }
 0x2af   : > { %4913 = vsyncadd [#allocation3 + $0xc], 4294967280 }
 0x2b0   : > { %4914 = dma.done.wait [#allocation3 + $0xd], 16 }
 0x2b1   : > { %4915 = vsyncadd [#allocation3 + $0xd], 4294967280 }
 0x2b2   : > { %4916 = dma.done.wait [#allocation3 + $0xe], 16 }
 0x2b3   : > { %4917 = vsyncadd [#allocation3 + $0xe], 4294967280 }
 0x2b4   : > { %4918 = dma.done.wait [#allocation3 + $0xf], 16 }
 0x2b5   : > { %4919 = vsyncadd [#allocation3 + $0xf], 4294967280 }
 0x2b6   : > { %4920 = dma.done.wait [#allocation3 + $0x10], 16 }
 0x2b7   : > { %4921 = vsyncadd [#allocation3 + $0x10], 4294967280 }
 0x2b8   : > { %4922 = dma.done.wait [#allocation3 + $0x11], 16 }
 0x2b9   : > { %4923 = vsyncadd [#allocation3 + $0x11], 4294967280 }
 0x2ba   : > { %4924 = dma.done.wait [#allocation3 + $0x12], 16 }
 0x2bb   : > { %4925 = vsyncadd [#allocation3 + $0x12], 4294967280 }
 0x2bc   : > { %4926 = dma.done.wait [#allocation3 + $0x13], 16 }
 0x2bd   : > { %4927 = vsyncadd [#allocation3 + $0x13], 4294967280 }
 0x2be   : > { %4928 = dma.done.wait [#allocation3 + $0x14], 16 }
 0x2bf   : > { %4929 = vsyncadd [#allocation3 + $0x14], 4294967280 }
 0x2c0   : > { %4930 = dma.done.wait [#allocation3 + $0x15], 16 }
 0x2c1   : > { %4931 = vsyncadd [#allocation3 + $0x15], 4294967280 }
 0x2c2   : > { %4932 = dma.done.wait [#allocation3 + $0x16], 16 }
 0x2c3   : > { %4933 = vsyncadd [#allocation3 + $0x16], 4294967280 }
 0x2c4   : > { %4934 = dma.done.wait [#allocation3 + $0x17], 16 }
 0x2c5   : > { %4935 = vsyncadd [#allocation3 + $0x17], 4294967280 }
 0x2c6   : > { %4936 = dma.done.wait [#allocation3 + $0x18], 16 }
 0x2c7   : > { %4937 = vsyncadd [#allocation3 + $0x18], 4294967280 }
 0x2c8   : > { %4938 = dma.done.wait [#allocation3 + $0x19], 16 }
 0x2c9   : > { %4939 = vsyncadd [#allocation3 + $0x19], 4294967280 }
 0x2ca   : > { %4940 = dma.done.wait [#allocation3 + $0x1a], 16 }
 0x2cb   : > { %4941 = vsyncadd [#allocation3 + $0x1a], 4294967280 }
 0x2cc   : > { %4942 = dma.done.wait [#allocation3 + $0x1b], 16 }
 0x2cd   : > { %4943 = vsyncadd [#allocation3 + $0x1b], 4294967280 }
 0x2ce   : > { %4944 = dma.done.wait [#allocation3 + $0x1c], 16 }
 0x2cf   : > { %4945 = vsyncadd [#allocation3 + $0x1c], 4294967280 }
 0x2d0   : > { %4946 = dma.done.wait [#allocation3 + $0x1d], 16 }
 0x2d1   : > { %4947 = vsyncadd [#allocation3 + $0x1d], 4294967280 }
 0x2d2   : > { %4948 = dma.done.wait [#allocation3 + $0x1e], 16 }
 0x2d3   : > { %4949 = vsyncadd [#allocation3 + $0x1e], 4294967280 }
 0x2d4   : > { %4950 = dma.done.wait [#allocation3 + $0x1f], 16 }
 0x2d5   : > { %4951 = vsyncadd [#allocation3 + $0x1f], 4294967280 }
 0x2d6   : > { %4952 = dma.done.wait [#allocation3 + $0x20], 16 }
 0x2d7   : > { %4953 = vsyncadd [#allocation3 + $0x20], 4294967280 }
 0x2d8   : > { %4954 = dma.done.wait [#allocation3 + $0x21], 16 }
 0x2d9   : > { %4955 = vsyncadd [#allocation3 + $0x21], 4294967280 }
 0x2da   : > { %4956 = dma.done.wait [#allocation3 + $0x22], 16 }
 0x2db   : > { %4957 = vsyncadd [#allocation3 + $0x22], 4294967280 }
 0x2dc   : > { %4958 = dma.done.wait [#allocation3 + $0x23], 16 }
 0x2dd   : > { %4959 = vsyncadd [#allocation3 + $0x23], 4294967280 }
 0x2de   : > { %4960 = dma.done.wait [#allocation3 + $0x24], 16 }
 0x2df   : > { %4961 = vsyncadd [#allocation3 + $0x24], 4294967280 }
 0x2e0   : > { %4962 = dma.done.wait [#allocation3 + $0x25], 16 }
 0x2e1   : > { %4963 = vsyncadd [#allocation3 + $0x25], 4294967280 }
 0x2e2   : > { %4964 = dma.done.wait [#allocation3 + $0x26], 16 }
 0x2e3   : > { %4965 = vsyncadd [#allocation3 + $0x26], 4294967280 }
 0x2e4   : > { %4966 = dma.done.wait [#allocation3 + $0x27], 16 }
 0x2e5   : > { %4967 = vsyncadd [#allocation3 + $0x27], 4294967280 }
 0x2e6   : > { %4968 = dma.done.wait [#allocation3 + $0x28], 16 }
 0x2e7   : > { %4969 = vsyncadd [#allocation3 + $0x28], 4294967280 }
 0x2e8   : > { %4970 = dma.done.wait [#allocation3 + $0x29], 16 }
 0x2e9   : > { %4971 = vsyncadd [#allocation3 + $0x29], 4294967280 }
 0x2ea   : > { %4972 = dma.done.wait [#allocation3 + $0x2a], 16 }
 0x2eb   : > { %4973 = vsyncadd [#allocation3 + $0x2a], 4294967280 }
 0x2ec   : > { %4974 = dma.done.wait [#allocation3 + $0x2b], 16 }
 0x2ed   : > { %4975 = vsyncadd [#allocation3 + $0x2b], 4294967280 }
 0x2ee   : > { %4976 = dma.done.wait [#allocation3 + $0x2c], 16 }
 0x2ef   : > { %4977 = vsyncadd [#allocation3 + $0x2c], 4294967280 }
 0x2f0   : > { %4978 = dma.done.wait [#allocation3 + $0x2d], 16 }
 0x2f1   : > { %4979 = vsyncadd [#allocation3 + $0x2d], 4294967280 }
 0x2f2   : > { %4980 = dma.done.wait [#allocation3 + $0x2e], 16 }
 0x2f3   : > { %4981 = vsyncadd [#allocation3 + $0x2e], 4294967280 }
 0x2f4   : > { %4982 = dma.done.wait [#allocation3 + $0x2f], 16 }
 0x2f5   : > { %4983 = vsyncadd [#allocation3 + $0x2f], 4294967280 }
 0x2f6   : > { %4984 = dma.done.wait [#allocation3 + $0x30], 16 }
 0x2f7   : > { %4985 = vsyncadd [#allocation3 + $0x30], 4294967280 }
 0x2f8   : > { %4986 = dma.done.wait [#allocation3 + $0x31], 16 }
 0x2f9   : > { %4987 = vsyncadd [#allocation3 + $0x31], 4294967280 }
 0x2fa   : > { %4988 = dma.done.wait [#allocation3 + $0x32], 16 }
 0x2fb   : > { %4989 = vsyncadd [#allocation3 + $0x32], 4294967280 }
 0x2fc   : > { %4990 = dma.done.wait [#allocation3 + $0x33], 16 }
 0x2fd   : > { %4991 = vsyncadd [#allocation3 + $0x33], 4294967280 }
 0x2fe   : > { %4992 = dma.done.wait [#allocation3 + $0x34], 16 }
 0x2ff   : > { %4993 = vsyncadd [#allocation3 + $0x34], 4294967280 }
 0x300   : > { %4994 = dma.done.wait [#allocation3 + $0x35], 16 }
 0x301   : > { %4995 = vsyncadd [#allocation3 + $0x35], 4294967280 }
 0x302   : > { %4996 = dma.done.wait [#allocation3 + $0x36], 16 }
 0x303   : > { %4997 = vsyncadd [#allocation3 + $0x36], 4294967280 }
 0x304   : > { %4998 = dma.done.wait [#allocation3 + $0x37], 16 }
 0x305   : > { %4999 = vsyncadd [#allocation3 + $0x37], 4294967280 }
 0x306   : > { %5000 = dma.done.wait [#allocation3 + $0x38], 16 }
 0x307   : > { %5001 = vsyncadd [#allocation3 + $0x38], 4294967280 }
 0x308   : > { %5002 = dma.done.wait [#allocation3 + $0x39], 16 }
 0x309   : > { %5003 = vsyncadd [#allocation3 + $0x39], 4294967280 }
 0x30a   : > { %5004 = dma.done.wait [#allocation3 + $0x3a], 16 }
 0x30b   : > { %5005 = vsyncadd [#allocation3 + $0x3a], 4294967280 }
 0x30c   : > { %5006 = dma.done.wait [#allocation3 + $0x3b], 16 }
 0x30d   : > { %5007 = vsyncadd [#allocation3 + $0x3b], 4294967280 }
 0x30e   : > { %5008 = dma.done.wait [#allocation3 + $0x3c], 16 }
 0x30f   : > { %5009 = vsyncadd [#allocation3 + $0x3c], 4294967280 }
 0x310   : > { %5010 = dma.done.wait [#allocation3 + $0x3d], 16 }
 0x311   : > { %5011 = vsyncadd [#allocation3 + $0x3d], 4294967280 }
 0x312   : > { %5012 = dma.done.wait [#allocation3 + $0x3e], 16 }
 0x313   : > { %5013 = vsyncadd [#allocation3 + $0x3e], 4294967280 }
 0x314   : > { %5014 = dma.done.wait [#allocation3 + $0x3f], 16 }
 0x315   : > { %5015 = vsyncadd [#allocation3 + $0x3f], 4294967280  ;;  %v5021_v0 = vmov 0.0   ;;  %vm5022_vm0 = vmmov 0   ;;  %v3419_v1 = vld [vmem:[%s5364_s2] sm:$0xff]  ;;  %v3420_v2 = vld [vmem:[%s5364_s2 + $0x8] sm:$0xff] }
 0x316   : > { %4847 = vmatprep.subr.bf16.mxu0 %v5021_v0  ;;  %4851 = vmatprep.mubr.msk.bf16.mxu0 %vm5022_vm0, %v5021_v0  ;;  %v3421_v3 = vld [vmem:[%s5364_s2 + $0x10] sm:$0xff]  ;;  %v3423_v4 = vpack.c.bf16 %v3420_v2, %v3419_v1  ;;  %v3422_v5 = vld [vmem:[%s5364_s2 + $0x18] sm:$0xff]  ;;  %v3402_v6 = vld [vmem:[#allocation2] sm:$0xff]  ;;  %vm3432_vm1 = vcmask 261120   ;;  %vm3482_vm2 = vcmask 64512  }
 0x317   : > { %v3403_v7 = vld [vmem:[#allocation2 + $0x8] sm:$0xff]  ;;  %v3405_v9 = vld [vmem:[#allocation2 + $0x10] sm:$0xff]  ;;  %v3424_v10 = vpack.c.bf16 %v3422_v5, %v3421_v3  ;;  %v3407_v11 = vld [vmem:[#allocation2 + $0x18] sm:$0xff] }
 0x318   : > { %v3404_v8 = vadd.f32 %v3403_v7, %v3402_v6  ;;  %4848 = vmatpush3.bf16.msra.mxu0 %v3423_v4  ;;  %v3409_v13 = vld [vmem:[#allocation2 + $0x20] sm:$0xff]  ;;  %v3411_v15 = vld [vmem:[#allocation2 + $0x28] sm:$0xff]  ;;  %v3413_v17 = vld [vmem:[#allocation2 + $0x30] sm:$0xff] }
 0x319   : > { %4849 = vmatprep.subr.bf16.mxu0 %v5021_v0  ;;  %v3415_v19 = vld [vmem:[#allocation2 + $0x38] sm:$0xff]  ;;  %v4753_v24 = vld [vmem:[%s5365_s3] ss:$0 sm:$0xff] }
 0x31a   : > { %v3406_v12 = vadd.f32 %v3405_v9, %v3404_v8 }
 0x31c   : > { %v3408_v14 = vadd.f32 %v3407_v11, %v3406_v12  ;;  %4850 = vmatpush3.bf16.msra.mxu0 %v3424_v10 }
 0x31e   : > { %v3410_v16 = vadd.f32 %v3409_v13, %v3408_v14 }
 0x320   : > { %v3412_v18 = vadd.f32 %v3411_v15, %v3410_v16 }
 0x322   : > { %v3414_v20 = vadd.f32 %v3413_v17, %v3412_v18 }
 0x324   : > { %v3416_v21 = vadd.f32 %v3415_v19, %v3414_v20 }
 0x326   : > { %v3417_v22 = vmul.f32 0.125, %v3416_v21 }
 0x328   : > { %v3418_v23 = vpack.c.bf16 %v3417_v22, %v3417_v22 }
 0x32a   : > { %4852 = vmatmul.mubr.msk.bf16.vlgmr.msra.gmra.mrb[0].mxu0 %vm3432_vm1, %v3418_v23 }
 0x3fd   : > { %v3470_v25 = vpop.f32.mrb[0].mxu0 }
 0x3fe   : > { %v3471_v26 = vadd.f32 %v4753_v24, %v3470_v25  ;;  %v4853_v27 = vpop.f32.mrb[1].mxu0 }
 0x3ff   : > { %v3473_v28 = vpop.f32.mrb[2].mxu0 }
 0x400   : > { %v4755_v29 = vmul.f32 -1.442695, %v3471_v26  ;;  %v4854_v30 = vpop.f32.mrb[3].mxu0 }
 0x402   : > { %4866 = vpow2.f32 %v4755_v29 }
 0x40c   : > { %v4867_v31 = vpop.eup %4866 }
 0x40d   : > { %v3479_v32 = vadd.f32 1.0, %v4867_v31 }
 0x40f   : > { %4868 = vrcp.f32 %v3479_v32 }
 0x419   : > { %v4869_v33 = vpop.eup %4868 }
 0x41a   : > { %3483 = vst.msk [vmem:[%s5065_s26] sm:$0xff] %vm3482_vm2, %v4869_v33 }
 0x41b PF: > { %s20_s20 = sadd.s32 1, %s5018_s20  }
 0x41c   : > { %p17_p9 = scmp.ge.s32.totalorder %s20_s20, 4  }
 0x41e   :  { %19 = sbr.rel (!%p17_p9) target bundleno = 16 (0x10), region = 2868 }
 0x425   :  { %3503 = vsyncmov [#allocation3] }
 0x428   :  { %s3504_s14 = vpop.sfrf %3503 }
 0x429   :  { %p4758_p10 = scmp.ne.s32.totalorder %s3504_s14, 0 }
 0x42b   :  { %3508 = shalt.err (%p4758_p10)  }
 0x42c   :  { %3510 = vsyncmov [#allocation3 + $0x1] }
 0x42f   :  { %s3511_s29 = vpop.sfrf %3510 }
 0x430   :  { %p4759_p11 = scmp.ne.s32.totalorder %s3511_s29, 0 }
 0x432   :  { %3515 = shalt.err (%p4759_p11)  }
 0x433   :  { %3517 = vsyncmov [#allocation3 + $0x2] }
 0x436   :  { %s3518_s5 = vpop.sfrf %3517 }
 0x437   :  { %p4760_p12 = scmp.ne.s32.totalorder %s3518_s5, 0 }
 0x439   :  { %3522 = shalt.err (%p4760_p12)  }
 0x43a   :  { %3524 = vsyncmov [#allocation3 + $0x3] }
 0x43d   :  { %s3525_s26 = vpop.sfrf %3524 }
 0x43e   :  { %p4761_p13 = scmp.ne.s32.totalorder %s3525_s26, 0 }
 0x440   :  { %3529 = shalt.err (%p4761_p13)  }
 0x441   :  { %3531 = vsyncmov [#allocation3 + $0x4] }
 0x444   :  { %s3532_s7 = vpop.sfrf %3531 }
 0x445   :  { %p4762_p0 = scmp.ne.s32.totalorder %s3532_s7, 0 }
 0x447   :  { %3536 = shalt.err (%p4762_p0)  }
 0x448   :  { %3538 = vsyncmov [#allocation3 + $0x5] }
 0x44b   :  { %s3539_s1 = vpop.sfrf %3538 }
 0x44c   :  { %p4763_p1 = scmp.ne.s32.totalorder %s3539_s1, 0 }
 0x44e   :  { %3543 = shalt.err (%p4763_p1)  }
 0x44f   :  { %3545 = vsyncmov [#allocation3 + $0x6] }
 0x452   :  { %s3546_s2 = vpop.sfrf %3545 }
 0x453   :  { %p4764_p2 = scmp.ne.s32.totalorder %s3546_s2, 0 }
 0x455   :  { %3550 = shalt.err (%p4764_p2)  }
 0x456   :  { %3552 = vsyncmov [#allocation3 + $0x7] }
 0x459   :  { %s3553_s3 = vpop.sfrf %3552 }
 0x45a   :  { %p4765_p3 = scmp.ne.s32.totalorder %s3553_s3, 0 }
 0x45c   :  { %3557 = shalt.err (%p4765_p3)  }
 0x45d   :  { %3559 = vsyncmov [#allocation3 + $0x8] }
 0x460   :  { %s3560_s4 = vpop.sfrf %3559 }
 0x461   :  { %p4766_p4 = scmp.ne.s32.totalorder %s3560_s4, 0 }
 0x463   :  { %3564 = shalt.err (%p4766_p4)  }
 0x464   :  { %3566 = vsyncmov [#allocation3 + $0x9] }
 0x467   :  { %s3567_s20 = vpop.sfrf %3566 }
 0x468   :  { %p4767_p5 = scmp.ne.s32.totalorder %s3567_s20, 0 }
 0x46a   :  { %3571 = shalt.err (%p4767_p5)  }
 0x46b   :  { %3573 = vsyncmov [#allocation3 + $0xa] }
 0x46e   :  { %s3574_s8 = vpop.sfrf %3573 }
 0x46f   :  { %p4768_p6 = scmp.ne.s32.totalorder %s3574_s8, 0 }
 0x471   :  { %3578 = shalt.err (%p4768_p6)  }
 0x472   :  { %3580 = vsyncmov [#allocation3 + $0xb] }
 0x475   :  { %s3581_s19 = vpop.sfrf %3580 }
 0x476   :  { %p4769_p7 = scmp.ne.s32.totalorder %s3581_s19, 0 }
 0x478   :  { %3585 = shalt.err (%p4769_p7)  }
 0x479   :  { %3587 = vsyncmov [#allocation3 + $0xc] }
 0x47c   :  { %s3588_s10 = vpop.sfrf %3587 }
 0x47d   :  { %p4770_p8 = scmp.ne.s32.totalorder %s3588_s10, 0 }
 0x47f   :  { %3592 = shalt.err (%p4770_p8)  }
 0x480   :  { %3594 = vsyncmov [#allocation3 + $0xd] }
 0x483   :  { %s3595_s21 = vpop.sfrf %3594 }
 0x484   :  { %p4771_p9 = scmp.ne.s32.totalorder %s3595_s21, 0 }
 0x486   :  { %3599 = shalt.err (%p4771_p9)  }
 0x487   :  { %3601 = vsyncmov [#allocation3 + $0xe] }
 0x48a   :  { %s3602_s11 = vpop.sfrf %3601 }
 0x48b   :  { %p4772_p10 = scmp.ne.s32.totalorder %s3602_s11, 0 }
 0x48d   :  { %3606 = shalt.err (%p4772_p10)  }
 0x48e   :  { %3608 = vsyncmov [#allocation3 + $0xf] }
 0x491   :  { %s3609_s13 = vpop.sfrf %3608 }
 0x492   :  { %p4773_p11 = scmp.ne.s32.totalorder %s3609_s13, 0 }
 0x494   :  { %3613 = shalt.err (%p4773_p11)  }
 0x495   :  { %3615 = vsyncmov [#allocation3 + $0x10] }
 0x498   :  { %s3616_s25 = vpop.sfrf %3615 }
 0x499   :  { %p4774_p12 = scmp.ne.s32.totalorder %s3616_s25, 0 }
 0x49b   :  { %3620 = shalt.err (%p4774_p12)  }
 0x49c   :  { %3622 = vsyncmov [#allocation3 + $0x11] }
 0x49f   :  { %s3623_s15 = vpop.sfrf %3622 }
 0x4a0   :  { %p4775_p13 = scmp.ne.s32.totalorder %s3623_s15, 0 }
 0x4a2   :  { %3627 = shalt.err (%p4775_p13)  }
 0x4a3   :  { %3629 = vsyncmov [#allocation3 + $0x12] }
 0x4a6   :  { %s3630_s16 = vpop.sfrf %3629 }
 0x4a7   :  { %p4776_p0 = scmp.ne.s32.totalorder %s3630_s16, 0 }
 0x4a9   :  { %3634 = shalt.err (%p4776_p0)  }
 0x4aa   :  { %3636 = vsyncmov [#allocation3 + $0x13] }
 0x4ad   :  { %s3637_s30 = vpop.sfrf %3636 }
 0x4ae   :  { %p4777_p1 = scmp.ne.s32.totalorder %s3637_s30, 0 }
 0x4b0   :  { %3641 = shalt.err (%p4777_p1)  }
 0x4b1   :  { %3643 = vsyncmov [#allocation3 + $0x14] }
 0x4b4   :  { %s3644_s17 = vpop.sfrf %3643 }
 0x4b5   :  { %p4778_p2 = scmp.ne.s32.totalorder %s3644_s17, 0 }
 0x4b7   :  { %3648 = shalt.err (%p4778_p2)  }
 0x4b8   :  { %3650 = vsyncmov [#allocation3 + $0x15] }
 0x4bb   :  { %s3651_s6 = vpop.sfrf %3650 }
 0x4bc   :  { %p4779_p3 = scmp.ne.s32.totalorder %s3651_s6, 0 }
 0x4be   :  { %3655 = shalt.err (%p4779_p3)  }
 0x4bf   :  { %3657 = vsyncmov [#allocation3 + $0x16] }
 0x4c2   :  { %s3658_s12 = vpop.sfrf %3657 }
 0x4c3   :  { %p4780_p4 = scmp.ne.s32.totalorder %s3658_s12, 0 }
 0x4c5   :  { %3662 = shalt.err (%p4780_p4)  }
 0x4c6   :  { %3664 = vsyncmov [#allocation3 + $0x17] }
 0x4c9   :  { %s3665_s18 = vpop.sfrf %3664 }
 0x4ca   :  { %p4781_p5 = scmp.ne.s32.totalorder %s3665_s18, 0 }
 0x4cc   :  { %3669 = shalt.err (%p4781_p5)  }
 0x4cd   :  { %3671 = vsyncmov [#allocation3 + $0x18] }
 0x4d0   :  { %s3672_s0 = vpop.sfrf %3671 }
 0x4d1   :  { %p4782_p6 = scmp.ne.s32.totalorder %s3672_s0, 0 }
 0x4d3   :  { %3676 = shalt.err (%p4782_p6)  }
 0x4d4   :  { %3678 = vsyncmov [#allocation3 + $0x19] }
 0x4d7   :  { %s3679_s22 = vpop.sfrf %3678 }
 0x4d8   :  { %p4783_p7 = scmp.ne.s32.totalorder %s3679_s22, 0 }
 0x4da   :  { %3683 = shalt.err (%p4783_p7)  }
 0x4db   :  { %3685 = vsyncmov [#allocation3 + $0x1a] }
 0x4de   :  { %s3686_s9 = vpop.sfrf %3685 }
 0x4df   :  { %p4784_p8 = scmp.ne.s32.totalorder %s3686_s9, 0 }
 0x4e1   :  { %3690 = shalt.err (%p4784_p8)  }
 0x4e2   :  { %3692 = vsyncmov [#allocation3 + $0x1b] }
 0x4e5   :  { %s3693_s23 = vpop.sfrf %3692 }
 0x4e6   :  { %p4785_p9 = scmp.ne.s32.totalorder %s3693_s23, 0 }
 0x4e8   :  { %3697 = shalt.err (%p4785_p9)  }
 0x4e9   :  { %3699 = vsyncmov [#allocation3 + $0x1c] }
 0x4ec   :  { %s3700_s24 = vpop.sfrf %3699 }
 0x4ed   :  { %p4786_p10 = scmp.ne.s32.totalorder %s3700_s24, 0 }
 0x4ef   :  { %3704 = shalt.err (%p4786_p10)  }
 0x4f0   :  { %3706 = vsyncmov [#allocation3 + $0x1d] }
 0x4f3   :  { %s3707_s27 = vpop.sfrf %3706 }
 0x4f4   :  { %p4787_p11 = scmp.ne.s32.totalorder %s3707_s27, 0 }
 0x4f6   :  { %3711 = shalt.err (%p4787_p11)  }
 0x4f7   :  { %3713 = vsyncmov [#allocation3 + $0x1e] }
 0x4fa   :  { %s3714_s28 = vpop.sfrf %3713 }
 0x4fb   :  { %p4788_p12 = scmp.ne.s32.totalorder %s3714_s28, 0 }
 0x4fd   :  { %3718 = shalt.err (%p4788_p12)  }
 0x4fe   :  { %3720 = vsyncmov [#allocation3 + $0x1f] }
 0x501   :  { %s3721_s14 = vpop.sfrf %3720 }
 0x502   :  { %p4789_p13 = scmp.ne.s32.totalorder %s3721_s14, 0 }
 0x504   :  { %3725 = shalt.err (%p4789_p13)  }
 0x505   :  { %3727 = vsyncmov [#allocation3 + $0x20] }
 0x508   :  { %s3728_s29 = vpop.sfrf %3727 }
 0x509   :  { %p4790_p0 = scmp.ne.s32.totalorder %s3728_s29, 0 }
 0x50b   :  { %3732 = shalt.err (%p4790_p0)  }
 0x50c   :  { %3734 = vsyncmov [#allocation3 + $0x21] }
 0x50f   :  { %s3735_s5 = vpop.sfrf %3734 }
 0x510   :  { %p4791_p1 = scmp.ne.s32.totalorder %s3735_s5, 0 }
 0x512   :  { %3739 = shalt.err (%p4791_p1)  }
 0x513   :  { %3741 = vsyncmov [#allocation3 + $0x22] }
 0x516   :  { %s3742_s26 = vpop.sfrf %3741 }
 0x517   :  { %p4792_p2 = scmp.ne.s32.totalorder %s3742_s26, 0 }
 0x519   :  { %3746 = shalt.err (%p4792_p2)  }
 0x51a   :  { %3748 = vsyncmov [#allocation3 + $0x23] }
 0x51d   :  { %s3749_s7 = vpop.sfrf %3748 }
 0x51e   :  { %p4793_p3 = scmp.ne.s32.totalorder %s3749_s7, 0 }
 0x520   :  { %3753 = shalt.err (%p4793_p3)  }
 0x521   :  { %3755 = vsyncmov [#allocation3 + $0x24] }
 0x524   :  { %s3756_s1 = vpop.sfrf %3755 }
 0x525   :  { %p4794_p4 = scmp.ne.s32.totalorder %s3756_s1, 0 }
 0x527   :  { %3760 = shalt.err (%p4794_p4)  }
 0x528   :  { %3762 = vsyncmov [#allocation3 + $0x25] }
 0x52b   :  { %s3763_s2 = vpop.sfrf %3762 }
 0x52c   :  { %p4795_p5 = scmp.ne.s32.totalorder %s3763_s2, 0 }
 0x52e   :  { %3767 = shalt.err (%p4795_p5)  }
 0x52f   :  { %3769 = vsyncmov [#allocation3 + $0x26] }
 0x532   :  { %s3770_s3 = vpop.sfrf %3769 }
 0x533   :  { %p4796_p6 = scmp.ne.s32.totalorder %s3770_s3, 0 }
 0x535   :  { %3774 = shalt.err (%p4796_p6)  }
 0x536   :  { %3776 = vsyncmov [#allocation3 + $0x27] }
 0x539   :  { %s3777_s4 = vpop.sfrf %3776 }
 0x53a   :  { %p4797_p7 = scmp.ne.s32.totalorder %s3777_s4, 0 }
 0x53c   :  { %3781 = shalt.err (%p4797_p7)  }
 0x53d   :  { %3783 = vsyncmov [#allocation3 + $0x28] }
 0x540   :  { %s3784_s20 = vpop.sfrf %3783 }
 0x541   :  { %p4798_p8 = scmp.ne.s32.totalorder %s3784_s20, 0 }
 0x543   :  { %3788 = shalt.err (%p4798_p8)  }
 0x544   :  { %3790 = vsyncmov [#allocation3 + $0x29] }
 0x547   :  { %s3791_s8 = vpop.sfrf %3790 }
 0x548   :  { %p4799_p9 = scmp.ne.s32.totalorder %s3791_s8, 0 }
 0x54a   :  { %3795 = shalt.err (%p4799_p9)  }
 0x54b   :  { %3797 = vsyncmov [#allocation3 + $0x2a] }
 0x54e   :  { %s3798_s19 = vpop.sfrf %3797 }
 0x54f   :  { %p4800_p10 = scmp.ne.s32.totalorder %s3798_s19, 0 }
 0x551   :  { %3802 = shalt.err (%p4800_p10)  }
 0x552   :  { %3804 = vsyncmov [#allocation3 + $0x2b] }
 0x555   :  { %s3805_s10 = vpop.sfrf %3804 }
 0x556   :  { %p4801_p11 = scmp.ne.s32.totalorder %s3805_s10, 0 }
 0x558   :  { %3809 = shalt.err (%p4801_p11)  }
 0x559   :  { %3811 = vsyncmov [#allocation3 + $0x2c] }
 0x55c   :  { %s3812_s21 = vpop.sfrf %3811 }
 0x55d   :  { %p4802_p12 = scmp.ne.s32.totalorder %s3812_s21, 0 }
 0x55f   :  { %3816 = shalt.err (%p4802_p12)  }
 0x560   :  { %3818 = vsyncmov [#allocation3 + $0x2d] }
 0x563   :  { %s3819_s11 = vpop.sfrf %3818 }
 0x564   :  { %p4803_p13 = scmp.ne.s32.totalorder %s3819_s11, 0 }
 0x566   :  { %3823 = shalt.err (%p4803_p13)  }
 0x567   :  { %3825 = vsyncmov [#allocation3 + $0x2e] }
 0x56a   :  { %s3826_s13 = vpop.sfrf %3825 }
 0x56b   :  { %p4804_p0 = scmp.ne.s32.totalorder %s3826_s13, 0 }
 0x56d   :  { %3830 = shalt.err (%p4804_p0)  }
 0x56e   :  { %3832 = vsyncmov [#allocation3 + $0x2f] }
 0x571   :  { %s3833_s25 = vpop.sfrf %3832 }
 0x572   :  { %p4805_p1 = scmp.ne.s32.totalorder %s3833_s25, 0 }
 0x574   :  { %3837 = shalt.err (%p4805_p1)  }
 0x575   :  { %3839 = vsyncmov [#allocation3 + $0x30] }
 0x578   :  { %s3840_s15 = vpop.sfrf %3839 }
 0x579   :  { %p4806_p2 = scmp.ne.s32.totalorder %s3840_s15, 0 }
 0x57b   :  { %3844 = shalt.err (%p4806_p2)  }
 0x57c   :  { %3846 = vsyncmov [#allocation3 + $0x31] }
 0x57f   :  { %s3847_s16 = vpop.sfrf %3846 }
 0x580   :  { %p4807_p3 = scmp.ne.s32.totalorder %s3847_s16, 0 }
 0x582   :  { %3851 = shalt.err (%p4807_p3)  }
 0x583   :  { %3853 = vsyncmov [#allocation3 + $0x32] }
 0x586   :  { %s3854_s30 = vpop.sfrf %3853 }
 0x587   :  { %p4808_p4 = scmp.ne.s32.totalorder %s3854_s30, 0 }
 0x589   :  { %3858 = shalt.err (%p4808_p4)  }
 0x58a   :  { %3860 = vsyncmov [#allocation3 + $0x33] }
 0x58d   :  { %s3861_s17 = vpop.sfrf %3860 }
 0x58e   :  { %p4809_p5 = scmp.ne.s32.totalorder %s3861_s17, 0 }
 0x590   :  { %3865 = shalt.err (%p4809_p5)  }
 0x591   :  { %3867 = vsyncmov [#allocation3 + $0x34] }
 0x594   :  { %s3868_s6 = vpop.sfrf %3867 }
 0x595   :  { %p4810_p6 = scmp.ne.s32.totalorder %s3868_s6, 0 }
 0x597   :  { %3872 = shalt.err (%p4810_p6)  }
 0x598   :  { %3874 = vsyncmov [#allocation3 + $0x35] }
 0x59b   :  { %s3875_s12 = vpop.sfrf %3874 }
 0x59c   :  { %p4811_p7 = scmp.ne.s32.totalorder %s3875_s12, 0 }
 0x59e   :  { %3879 = shalt.err (%p4811_p7)  }
 0x59f   :  { %3881 = vsyncmov [#allocation3 + $0x36] }
 0x5a2   :  { %s3882_s18 = vpop.sfrf %3881 }
 0x5a3   :  { %p4812_p8 = scmp.ne.s32.totalorder %s3882_s18, 0 }
 0x5a5   :  { %3886 = shalt.err (%p4812_p8)  }
 0x5a6   :  { %3888 = vsyncmov [#allocation3 + $0x37] }
 0x5a9   :  { %s3889_s0 = vpop.sfrf %3888 }
 0x5aa   :  { %p4813_p9 = scmp.ne.s32.totalorder %s3889_s0, 0 }
 0x5ac   :  { %3893 = shalt.err (%p4813_p9)  }
 0x5ad   :  { %3895 = vsyncmov [#allocation3 + $0x38] }
 0x5b0   :  { %s3896_s22 = vpop.sfrf %3895 }
 0x5b1   :  { %p4814_p10 = scmp.ne.s32.totalorder %s3896_s22, 0 }
 0x5b3   :  { %3900 = shalt.err (%p4814_p10)  }
 0x5b4   :  { %3902 = vsyncmov [#allocation3 + $0x39] }
 0x5b7   :  { %s3903_s9 = vpop.sfrf %3902 }
 0x5b8   :  { %p4815_p11 = scmp.ne.s32.totalorder %s3903_s9, 0 }
 0x5ba   :  { %3907 = shalt.err (%p4815_p11)  }
 0x5bb   :  { %3909 = vsyncmov [#allocation3 + $0x3a] }
 0x5be   :  { %s3910_s23 = vpop.sfrf %3909 }
 0x5bf   :  { %p4816_p12 = scmp.ne.s32.totalorder %s3910_s23, 0 }
 0x5c1   :  { %3914 = shalt.err (%p4816_p12)  }
 0x5c2   :  { %3916 = vsyncmov [#allocation3 + $0x3b] }
 0x5c5   :  { %s3917_s24 = vpop.sfrf %3916 }
 0x5c6   :  { %p4817_p13 = scmp.ne.s32.totalorder %s3917_s24, 0 }
 0x5c8   :  { %3921 = shalt.err (%p4817_p13)  }
 0x5c9   :  { %3923 = vsyncmov [#allocation3 + $0x3c] }
 0x5cc   :  { %s3924_s27 = vpop.sfrf %3923 }
 0x5cd   :  { %p4818_p0 = scmp.ne.s32.totalorder %s3924_s27, 0 }
 0x5cf   :  { %3928 = shalt.err (%p4818_p0)  }
 0x5d0   :  { %3930 = vsyncmov [#allocation3 + $0x3d] }
 0x5d3   :  { %s3931_s28 = vpop.sfrf %3930 }
 0x5d4   :  { %p4819_p1 = scmp.ne.s32.totalorder %s3931_s28, 0 }
 0x5d6   :  { %3935 = shalt.err (%p4819_p1)  }
 0x5d7   :  { %3937 = vsyncmov [#allocation3 + $0x3e] }
 0x5da   :  { %s3938_s14 = vpop.sfrf %3937 }
 0x5db   :  { %p4820_p2 = scmp.ne.s32.totalorder %s3938_s14, 0 }
 0x5dd   :  { %3942 = shalt.err (%p4820_p2)  }
 0x5de   :  { %3944 = vsyncmov [#allocation3 + $0x3f] }
 0x5e1   :  { %s3945_s29 = vpop.sfrf %3944 }
 0x5e2   :  { %p4821_p3 = scmp.ne.s32.totalorder %s3945_s29, 0 }
 0x5e4   :  { %3949 = shalt.err (%p4821_p3)  }

</bundles_post_ra>
